<compile_context>
chip_gen: v7x
topology: tpu7x:2x2x1
jax: 0.10.0
libtpu: 0.0.40
codegen_flags: <defaults>
</compile_context>

<pallas_src>
import functools

import jax
import jax.numpy as jnp
from jax.experimental import pallas as pl
from jax.experimental.pallas import tpu as pltpu

IMAGE_SIZE = 28
NUM_CLASSES = 10
Z_DIM = 100
BN_EPS = 1e-5

IN_DIM = Z_DIM + NUM_CLASSES          # 110
IN_PAD = 128                          # lane-dense K for layer 1 (and one-hot width)
OUT_DIM = IMAGE_SIZE * IMAGE_SIZE     # 784
OUT_PAD = 896                         # 7 * 128 -> unmasked lane-dense stores
BATCH_TILE = 8                        # f32 sublane tile
H1, H2, H3 = 256, 512, 1024


def generator_kernel(noise_ref, labels_ref, emb_ref,
                     w1_ref, g1_ref, be1_ref,
                     w2_ref, g2_ref, be2_ref,
                     g3_ref, be3_ref, b4_ref,
                     w3_hbm, w4_hbm,
                     o_ref,
                     w3_buf, w4_buf, dma_sem,
                     *, b_true, n_pad):
    """Whole-batch 4-layer MLP forward, fully VMEM resident.

    noise_ref : (B_pad, 128) bf16, zero rows for batch padding, zero cols >= 100.
    labels_ref: (B_pad, 1) int32, -1 marks padded rows.
    emb_ref   : (128, 128) bf16, row c holds Embedding(c) at columns 100..109.
    w3_hbm/w4_hbm are raw HBM refs; they are DMA'd into w3_buf/w4_buf scratch
    and waited on just before they are needed (overlap with layers 1-2).
    b_true / n_pad are baked Python ints (true batch size / # padded rows).
    """
    # Kick off the two big weight DMAs immediately so they overlap layer-1/2.
    cp3 = pltpu.make_async_copy(w3_hbm, w3_buf, dma_sem.at[0])
    cp4 = pltpu.make_async_copy(w4_hbm, w4_buf, dma_sem.at[1])
    cp3.start()
    cp4.start()

    inv_b = jnp.float32(1.0 / b_true)
    lab = labels_ref[...]                                        # (B_pad, 1) int32
    mask = jnp.where(lab >= 0, 1.0, 0.0).astype(jnp.float32)     # 1 = real row

    def dot(h, w):
        # bf16 x bf16 -> f32 accumulation on the MXU.
        return jnp.dot(h.astype(jnp.bfloat16), w,
                       preferred_element_type=jnp.float32)

    def bn_relu(h, gamma, beta):
        # Training-mode BatchNorm1d over the true batch only.  Padded rows of
        # h are exactly zero (zero input rows x weights; no pre-BN bias), so
        # sums over all rows equal sums over real rows; the padded rows'
        # (0 - mu)^2 contribution to the centered sum is removed analytically.
        mu = jnp.sum(h, axis=0, keepdims=True) * inv_b
        d = h - mu
        ss = jnp.sum(d * d, axis=0, keepdims=True)
        if n_pad > 0:
            ss = ss - jnp.float32(n_pad) * (mu * mu)
        var = ss * inv_b
        scale = gamma * jax.lax.rsqrt(var + BN_EPS)   # fused BN affine
        shift = beta - mu * scale
        return jnp.maximum(h * scale + shift, 0.0) * mask   # keep pad rows at 0

    # Build x = [noise | Embedding(labels)] in-kernel via a one-hot matmul
    # (exact: one-hot products copy bf16 table rows bit-exactly; padded rows
    #  have label -1 -> all-zero one-hot row).
    class_iota = jax.lax.broadcasted_iota(jnp.int32, (lab.shape[0], IN_PAD), 1)
    onehot = jnp.where(lab == class_iota, 1.0, 0.0).astype(jnp.bfloat16)
    x_emb = jnp.dot(onehot, emb_ref[...], preferred_element_type=jnp.float32)
    x = noise_ref[...].astype(jnp.float32) + x_emb               # disjoint columns

    h = bn_relu(dot(x, w1_ref[...]), g1_ref[...], be1_ref[...])
    h = bn_relu(dot(h, w2_ref[...]), g2_ref[...], be2_ref[...])
    cp3.wait()                                                   # w3 needed now
    h = bn_relu(dot(h, w3_buf[...]), g3_ref[...], be3_ref[...])
    cp4.wait()                                                   # w4 needed now
    o_ref[...] = jnp.tanh(dot(h, w4_buf[...]) + b4_ref[...])


def make_params(key):
    """Deterministic synthetic parameters matching the PyTorch module shapes."""
    dims = [(IN_DIM, H1), (H1, H2), (H2, H3), (H3, OUT_DIM)]
    params = {}
    k_emb, key = jax.random.split(key)
    params["emb"] = jax.random.normal(k_emb, (NUM_CLASSES, NUM_CLASSES), jnp.float32)
    for i, (din, dout) in enumerate(dims, start=1):
        kw, kb, key = jax.random.split(key, 3)
        scale = 1.0 / jnp.sqrt(jnp.float32(din))
        # store weights as (in, out) so the kernel does x @ W  (== PyTorch x @ W.T)
        params[f"w{i}"] = jax.random.uniform(kw, (din, dout), jnp.float32, -scale, scale)
        params[f"b{i}"] = jax.random.uniform(kb, (1, dout), jnp.float32, -scale, scale)
    for i, d in enumerate([H1, H2, H3], start=1):
        kg, key = jax.random.split(key)
        params[f"g{i}"] = jnp.ones((1, d), jnp.float32)
        params[f"be{i}"] = 0.01 * jax.random.normal(kg, (1, d), jnp.float32)
    return params


def pack_params(params):
    """Convert PyTorch-layout f32 params into padded bf16/f32 kernel operands.

    Done once outside the hot path.  b1/b2/b3 are intentionally dropped
    (cancelled exactly by the following BatchNorm's mean subtraction).
    The embedding table is lane-shifted so row c already sits at the x-columns
    100..109 it occupies after concatenation.
    """
    def pad2(a, rows, cols):
        return jnp.pad(a, ((0, rows - a.shape[0]), (0, cols - a.shape[1])))

    emb_shift = jnp.zeros((IN_PAD, IN_PAD), jnp.float32)
    emb_shift = emb_shift.at[:NUM_CLASSES, Z_DIM:Z_DIM + NUM_CLASSES].set(params["emb"])

    kp = {
        "emb": emb_shift.astype(jnp.bfloat16),
        "w1": pad2(params["w1"], IN_PAD, H1).astype(jnp.bfloat16),
        "w2": params["w2"].astype(jnp.bfloat16),
        # w3/w4 dominate HBM traffic; they stay in HBM (pl.ANY) and are DMA'd
        # inside the kernel.  (Optional further step: int8 on v5e/v6e or fp8
        # on v7x with scales folded into the BN scale.)
        "w3": params["w3"].astype(jnp.bfloat16),
        "w4": pad2(params["w4"], H3, OUT_PAD).astype(jnp.bfloat16),
        "b4": pad2(params["b4"], 1, OUT_PAD),
    }
    for i in (1, 2, 3):
        kp[f"g{i}"] = params[f"g{i}"]
        kp[f"be{i}"] = params[f"be{i}"]
    return kp


def _vmem_cap_bytes():
    """Physical VMEM per TensorCore, conservatively 64 MiB if unqueryable."""
    try:
        info = pltpu.get_tpu_info()
        cap = getattr(info, "vmem_capacity_bytes", None)
        if cap:
            return int(cap)
    except Exception:
        pass
    return 64 << 20


def generator_forward(noise, labels, kp):
    """noise: (B, 100) f32, labels: (B,) int -> (B, 1, 28, 28) f32."""
    B = noise.shape[0]
    b_pad = -(-B // BATCH_TILE) * BATCH_TILE
    n_pad = b_pad - B

    # Minimal wrapper glue: pad+cast noise, pad labels (sentinel -1 marks pad rows).
    noise_p = jnp.pad(noise, ((0, n_pad), (0, IN_PAD - Z_DIM))).astype(jnp.bfloat16)
    labels_p = jnp.pad(labels.astype(jnp.int32).reshape(-1, 1),
                       ((0, n_pad), (0, 0)), constant_values=-1)

    operands = [
        noise_p, labels_p, kp["emb"],
        kp["w1"], kp["g1"], kp["be1"],
        kp["w2"], kp["g2"], kp["be2"],
        kp["g3"], kp["be3"], kp["b4"],
        kp["w3"], kp["w4"],                      # HBM-resident (pl.ANY)
    ]

    vmem_spec = pl.BlockSpec(memory_space=pltpu.MemorySpace.VMEM)
    any_spec = pl.BlockSpec(memory_space=pl.ANY)
    in_specs = [vmem_spec] * 12 + [any_spec, any_spec]

    # VMEM budget from the actual footprint, capped well below physical VMEM
    # (v7x has only 64 MiB per TC; leave headroom for Mosaic scratch).
    out_bytes = b_pad * OUT_PAD * 4
    vmem_resident = sum(int(a.size) * a.dtype.itemsize for a in operands[:12])
    scratch_bytes = int(kp["w3"].size) * 2 + int(kp["w4"].size) * 2
    vmem_need = vmem_resident + out_bytes + scratch_bytes
    vmem_limit = int(min(0.72 * _vmem_cap_bytes(), max(16 << 20, 2 * vmem_need)))

    total_bytes = sum(int(a.size) * a.dtype.itemsize for a in operands) + out_bytes
    flops = 2 * b_pad * (IN_PAD * IN_PAD        # one-hot embedding matmul
                         + IN_PAD * H1 + H1 * H2 + H2 * H3 + H3 * OUT_PAD)
    cost = pl.CostEstimate(flops=flops,
                           transcendentals=b_pad * OUT_PAD + (H1 + H2 + H3),
                           bytes_accessed=total_bytes)

    kernel = functools.partial(generator_kernel, b_true=B, n_pad=n_pad)

    # NOTE(scaling): training-mode BN couples all rows, so a batch-tiled
    # "parallel" grid is NOT legal.  To scale: (a) grow this single block up
    # to the per-chip VMEM ceiling (re-derive per chip: ~half on v7x), or
    # (b) two-phase BN — an "arbitrary" batch axis accumulating per-feature
    # sum / sum-of-squares in VMEM scratch (init/finalize via pl.when), then a
    # second pass applying the fused scale/shift; only that pass may be marked
    # parallel / sharded across v7x's two TensorCores.  Weight index_maps stay
    # constant so weights are DMA'd once and remain VMEM-resident.
    out = pl.pallas_call(
        kernel,
        out_shape=jax.ShapeDtypeStruct((b_pad, OUT_PAD), jnp.float32),
        in_specs=in_specs,
        out_specs=vmem_spec,
        scratch_shapes=[
            pltpu.VMEM((H2, H3), jnp.bfloat16),        # w3 landing buffer
            pltpu.VMEM((H3, OUT_PAD), jnp.bfloat16),   # w4 landing buffer
            pltpu.SemaphoreType.DMA((2,)),
        ],
        compiler_params=pltpu.CompilerParams(vmem_limit_bytes=vmem_limit),
        cost_estimate=cost,
    )(*operands)

    return out[:B, :OUT_DIM].reshape(-1, 1, IMAGE_SIZE, IMAGE_SIZE)


def _reference_forward(noise, labels, params, *, matmul_dtype=jnp.float32):
    """Pure-JAX, PyTorch-faithful reference (includes the pre-BN biases).

    matmul_dtype=bfloat16 mirrors the kernel's matmul precision so the check
    isolates kernel correctness from the (accepted) bf16 weight quantization.
    """
    emb = jnp.take(params["emb"], labels, axis=0)
    h = jnp.concatenate([noise, emb], axis=1)

    def dot(a, w):
        return jnp.dot(a.astype(matmul_dtype), w.astype(matmul_dtype),
                       preferred_element_type=jnp.float32)

    def bn_relu(h, g, b):
        mu = jnp.mean(h, axis=0, keepdims=True)
        var = jnp.mean((h - mu) ** 2, axis=0, keepdims=True)
        return jnp.maximum((h - mu) / jnp.sqrt(var + BN_EPS) * g + b, 0.0)

    h = bn_relu(dot(h, params["w1"]) + params["b1"], params["g1"], params["be1"])
    h = bn_relu(dot(h, params["w2"]) + params["b2"], params["g2"], params["be2"])
    h = bn_relu(dot(h, params["w3"]) + params["b3"], params["g3"], params["be3"])
    h = jnp.tanh(dot(h, params["w4"]) + params["b4"])
    return h.reshape(-1, 1, IMAGE_SIZE, IMAGE_SIZE)


if __name__ == "__main__":
    key = jax.random.PRNGKey(0)
    k_params, k_noise, k_labels = jax.random.split(key, 3)

    B = 4
    params = make_params(k_params)
    kparams = pack_params(params)
    noise = jax.random.normal(k_noise, (B, Z_DIM), jnp.float32)
    labels = jax.random.randint(k_labels, (B,), 0, NUM_CLASSES, jnp.int32)

    fwd = jax.jit(generator_forward)
    out = jax.block_until_ready(fwd(noise, labels, kparams))
    assert out.shape == (B, 1, IMAGE_SIZE, IMAGE_SIZE), out.shape

    # Compare against a reference using the same bf16 matmul precision; the
    # remaining differences are accumulation order, the fused BN scale/shift,
    # and the (exactly-cancelling) dropped pre-BN biases.
    ref = jax.block_until_ready(
        _reference_forward(noise, labels, params, matmul_dtype=jnp.bfloat16))
    assert jnp.allclose(out, ref, atol=1e-2, rtol=0.0), "mismatch vs reference"

    print("KERNEL_OK")
</pallas_src>

<mosaic_0001>
module attributes {stable_mosaic.version = 11 : i64} {
  func.func @generator_kernel(%arg0: memref<8x128xbf16, #tpu.memory_space<vmem>>, %arg1: memref<8x1xi32, #tpu.memory_space<vmem>>, %arg2: memref<128x128xbf16, #tpu.memory_space<vmem>>, %arg3: memref<128x256xbf16, #tpu.memory_space<vmem>>, %arg4: memref<1x256xf32, #tpu.memory_space<vmem>>, %arg5: memref<1x256xf32, #tpu.memory_space<vmem>>, %arg6: memref<256x512xbf16, #tpu.memory_space<vmem>>, %arg7: memref<1x512xf32, #tpu.memory_space<vmem>>, %arg8: memref<1x512xf32, #tpu.memory_space<vmem>>, %arg9: memref<1x1024xf32, #tpu.memory_space<vmem>>, %arg10: memref<1x1024xf32, #tpu.memory_space<vmem>>, %arg11: memref<1x896xf32, #tpu.memory_space<vmem>>, %arg12: memref<512x1024xbf16, #tpu.memory_space<any>>, %arg13: memref<1024x896xbf16, #tpu.memory_space<any>>, %arg14: memref<8x896xf32, #tpu.memory_space<vmem>>, %arg15: memref<512x1024xbf16, #tpu.memory_space<vmem>>, %arg16: memref<1024x896xbf16, #tpu.memory_space<vmem>>, %arg17: memref<2x!tpu.dma_semaphore, #tpu.memory_space<semaphore_mem>>) attributes {dimension_semantics = [], scalar_prefetch = 0 : i64, scratch_operands = 3 : i64, tpu.core_type = #tpu.core_type<tc>} {
    %c0_i32 = arith.constant 0 : i32
    %0 = tpu.memref_slice %arg17[%c0_i32] : memref<2x!tpu.dma_semaphore, #tpu.memory_space<semaphore_mem>> -> memref<1x!tpu.dma_semaphore, #tpu.memory_space<semaphore_mem>>
    %1 = tpu.memref_squeeze %0 : memref<1x!tpu.dma_semaphore, #tpu.memory_space<semaphore_mem>> -> memref<!tpu.dma_semaphore, #tpu.memory_space<semaphore_mem>>
    tpu.enqueue_dma source(%arg12 : memref<512x1024xbf16, #tpu.memory_space<any>>) target(%arg15 : memref<512x1024xbf16, #tpu.memory_space<vmem>>) target_semaphore(%1 : memref<!tpu.dma_semaphore, #tpu.memory_space<semaphore_mem>>)
    %c1_i32 = arith.constant 1 : i32
    %2 = tpu.memref_slice %arg17[%c1_i32] : memref<2x!tpu.dma_semaphore, #tpu.memory_space<semaphore_mem>> -> memref<1x!tpu.dma_semaphore, #tpu.memory_space<semaphore_mem>>
    %3 = tpu.memref_squeeze %2 : memref<1x!tpu.dma_semaphore, #tpu.memory_space<semaphore_mem>> -> memref<!tpu.dma_semaphore, #tpu.memory_space<semaphore_mem>>
    tpu.enqueue_dma source(%arg13 : memref<1024x896xbf16, #tpu.memory_space<any>>) target(%arg16 : memref<1024x896xbf16, #tpu.memory_space<vmem>>) target_semaphore(%3 : memref<!tpu.dma_semaphore, #tpu.memory_space<semaphore_mem>>)
    %c0 = arith.constant 0 : index
    %c0_0 = arith.constant 0 : index
    %4 = vector.load %arg1[%c0, %c0_0] : memref<8x1xi32, #tpu.memory_space<vmem>>, vector<8x1xi32>
    %c0_i32_1 = arith.constant 0 : i32
    %5 = vector.broadcast %c0_i32_1 : i32 to vector<8x1xi32>
    %6 = arith.cmpi sge, %4, %5 : vector<8x1xi32>
    %cst = arith.constant 1.000000e+00 : f32
    %cst_2 = arith.constant 0.000000e+00 : f32
    %7 = vector.broadcast %cst : f32 to vector<8x1xf32>
    %8 = vector.broadcast %cst_2 : f32 to vector<8x1xf32>
    %9 = arith.select %6, %7, %8 : vector<8x1xi1>, vector<8x1xf32>
    %10 = tpu.iota {dimensions = array<i32: 1>} : vector<8x128xi32>
    %11 = vector.broadcast %4 : vector<8x1xi32> to vector<8x128xi32>
    %12 = arith.cmpi eq, %11, %10 : vector<8x128xi32>
    %cst_3 = arith.constant 1.000000e+00 : f32
    %cst_4 = arith.constant 0.000000e+00 : f32
    %13 = vector.broadcast %cst_3 : f32 to vector<8x128xf32>
    %14 = vector.broadcast %cst_4 : f32 to vector<8x128xf32>
    %15 = arith.select %12, %13, %14 : vector<8x128xi1>, vector<8x128xf32>
    %16 = arith.truncf %15 : vector<8x128xf32> to vector<8x128xbf16>
    %c0_5 = arith.constant 0 : index
    %c0_6 = arith.constant 0 : index
    %17 = vector.load %arg2[%c0_5, %c0_6] : memref<128x128xbf16, #tpu.memory_space<vmem>>, vector<128x128xbf16>
    %cst_7 = arith.constant dense<0.000000e+00> : vector<8x128xf32>
    %18 = tpu.matmul %16, %17, %cst_7 {dimension_numbers = #tpu.dot_dimension_numbers<[1], [0], [0], [1], [0, 0, 1, 1], [], []>} : vector<8x128xbf16>, vector<128x128xbf16>, vector<8x128xf32> -> vector<8x128xf32>
    %c0_8 = arith.constant 0 : index
    %c0_9 = arith.constant 0 : index
    %19 = vector.load %arg0[%c0_8, %c0_9] : memref<8x128xbf16, #tpu.memory_space<vmem>>, vector<8x128xbf16>
    %20 = arith.extf %19 : vector<8x128xbf16> to vector<8x128xf32>
    %21 = arith.addf %20, %18 : vector<8x128xf32>
    %c0_10 = arith.constant 0 : index
    %c0_11 = arith.constant 0 : index
    %22 = vector.load %arg3[%c0_10, %c0_11] : memref<128x256xbf16, #tpu.memory_space<vmem>>, vector<128x256xbf16>
    %23 = arith.truncf %21 : vector<8x128xf32> to vector<8x128xbf16>
    %cst_12 = arith.constant dense<0.000000e+00> : vector<8x256xf32>
    %24 = tpu.matmul %23, %22, %cst_12 {dimension_numbers = #tpu.dot_dimension_numbers<[1], [0], [0], [1], [0, 0, 1, 1], [], []>} : vector<8x128xbf16>, vector<128x256xbf16>, vector<8x256xf32> -> vector<8x256xf32>
    %c0_13 = arith.constant 0 : index
    %c0_14 = arith.constant 0 : index
    %25 = vector.load %arg4[%c0_13, %c0_14] : memref<1x256xf32, #tpu.memory_space<vmem>>, vector<1x256xf32>
    %c0_15 = arith.constant 0 : index
    %c0_16 = arith.constant 0 : index
    %26 = vector.load %arg5[%c0_15, %c0_16] : memref<1x256xf32, #tpu.memory_space<vmem>>, vector<1x256xf32>
    %cst_17 = arith.constant dense<0.000000e+00> : vector<256xf32>
    %27 = vector.multi_reduction <add>, %24, %cst_17 [0] : vector<8x256xf32> to vector<256xf32>
    %28 = vector.shape_cast %27 : vector<256xf32> to vector<1x256xf32>
    %cst_18 = arith.constant 2.500000e-01 : f32
    %29 = vector.broadcast %cst_18 : f32 to vector<1x256xf32>
    %30 = arith.mulf %28, %29 : vector<1x256xf32>
    %31 = vector.broadcast %30 : vector<1x256xf32> to vector<8x256xf32>
    %32 = arith.subf %24, %31 : vector<8x256xf32>
    %33 = arith.mulf %32, %32 : vector<8x256xf32>
    %cst_19 = arith.constant dense<0.000000e+00> : vector<256xf32>
    %34 = vector.multi_reduction <add>, %33, %cst_19 [0] : vector<8x256xf32> to vector<256xf32>
    %35 = vector.shape_cast %34 : vector<256xf32> to vector<1x256xf32>
    %36 = arith.mulf %30, %30 : vector<1x256xf32>
    %cst_20 = arith.constant 4.000000e+00 : f32
    %37 = vector.broadcast %cst_20 : f32 to vector<1x256xf32>
    %38 = arith.mulf %37, %36 : vector<1x256xf32>
    %39 = arith.subf %35, %38 : vector<1x256xf32>
    %cst_21 = arith.constant 2.500000e-01 : f32
    %40 = vector.broadcast %cst_21 : f32 to vector<1x256xf32>
    %41 = arith.mulf %39, %40 : vector<1x256xf32>
    %cst_22 = arith.constant 9.99999974E-6 : f32
    %42 = vector.broadcast %cst_22 : f32 to vector<1x256xf32>
    %43 = arith.addf %41, %42 : vector<1x256xf32>
    %44 = math.rsqrt %43 : vector<1x256xf32>
    %45 = arith.mulf %25, %44 : vector<1x256xf32>
    %46 = arith.mulf %30, %45 : vector<1x256xf32>
    %47 = arith.subf %26, %46 : vector<1x256xf32>
    %48 = vector.broadcast %45 : vector<1x256xf32> to vector<8x256xf32>
    %49 = arith.mulf %24, %48 : vector<8x256xf32>
    %50 = vector.broadcast %47 : vector<1x256xf32> to vector<8x256xf32>
    %51 = arith.addf %49, %50 : vector<8x256xf32>
    %cst_23 = arith.constant 0.000000e+00 : f32
    %52 = vector.broadcast %cst_23 : f32 to vector<8x256xf32>
    %53 = arith.maximumf %51, %52 : vector<8x256xf32>
    %54 = vector.broadcast %9 : vector<8x1xf32> to vector<8x256xf32>
    %55 = arith.mulf %53, %54 : vector<8x256xf32>
    %c0_24 = arith.constant 0 : index
    %c0_25 = arith.constant 0 : index
    %56 = vector.load %arg6[%c0_24, %c0_25] : memref<256x512xbf16, #tpu.memory_space<vmem>>, vector<256x512xbf16>
    %57 = arith.truncf %55 : vector<8x256xf32> to vector<8x256xbf16>
    %cst_26 = arith.constant dense<0.000000e+00> : vector<8x512xf32>
    %58 = tpu.matmul %57, %56, %cst_26 {dimension_numbers = #tpu.dot_dimension_numbers<[1], [0], [0], [1], [0, 0, 1, 1], [], []>} : vector<8x256xbf16>, vector<256x512xbf16>, vector<8x512xf32> -> vector<8x512xf32>
    %c0_27 = arith.constant 0 : index
    %c0_28 = arith.constant 0 : index
    %59 = vector.load %arg7[%c0_27, %c0_28] : memref<1x512xf32, #tpu.memory_space<vmem>>, vector<1x512xf32>
    %c0_29 = arith.constant 0 : index
    %c0_30 = arith.constant 0 : index
    %60 = vector.load %arg8[%c0_29, %c0_30] : memref<1x512xf32, #tpu.memory_space<vmem>>, vector<1x512xf32>
    %cst_31 = arith.constant dense<0.000000e+00> : vector<512xf32>
    %61 = vector.multi_reduction <add>, %58, %cst_31 [0] : vector<8x512xf32> to vector<512xf32>
    %62 = vector.shape_cast %61 : vector<512xf32> to vector<1x512xf32>
    %cst_32 = arith.constant 2.500000e-01 : f32
    %63 = vector.broadcast %cst_32 : f32 to vector<1x512xf32>
    %64 = arith.mulf %62, %63 : vector<1x512xf32>
    %65 = vector.broadcast %64 : vector<1x512xf32> to vector<8x512xf32>
    %66 = arith.subf %58, %65 : vector<8x512xf32>
    %67 = arith.mulf %66, %66 : vector<8x512xf32>
    %cst_33 = arith.constant dense<0.000000e+00> : vector<512xf32>
    %68 = vector.multi_reduction <add>, %67, %cst_33 [0] : vector<8x512xf32> to vector<512xf32>
    %69 = vector.shape_cast %68 : vector<512xf32> to vector<1x512xf32>
    %70 = arith.mulf %64, %64 : vector<1x512xf32>
    %cst_34 = arith.constant 4.000000e+00 : f32
    %71 = vector.broadcast %cst_34 : f32 to vector<1x512xf32>
    %72 = arith.mulf %71, %70 : vector<1x512xf32>
    %73 = arith.subf %69, %72 : vector<1x512xf32>
    %cst_35 = arith.constant 2.500000e-01 : f32
    %74 = vector.broadcast %cst_35 : f32 to vector<1x512xf32>
    %75 = arith.mulf %73, %74 : vector<1x512xf32>
    %cst_36 = arith.constant 9.99999974E-6 : f32
    %76 = vector.broadcast %cst_36 : f32 to vector<1x512xf32>
    %77 = arith.addf %75, %76 : vector<1x512xf32>
    %78 = math.rsqrt %77 : vector<1x512xf32>
    %79 = arith.mulf %59, %78 : vector<1x512xf32>
    %80 = arith.mulf %64, %79 : vector<1x512xf32>
    %81 = arith.subf %60, %80 : vector<1x512xf32>
    %82 = vector.broadcast %79 : vector<1x512xf32> to vector<8x512xf32>
    %83 = arith.mulf %58, %82 : vector<8x512xf32>
    %84 = vector.broadcast %81 : vector<1x512xf32> to vector<8x512xf32>
    %85 = arith.addf %83, %84 : vector<8x512xf32>
    %cst_37 = arith.constant 0.000000e+00 : f32
    %86 = vector.broadcast %cst_37 : f32 to vector<8x512xf32>
    %87 = arith.maximumf %85, %86 : vector<8x512xf32>
    %88 = vector.broadcast %9 : vector<8x1xf32> to vector<8x512xf32>
    %89 = arith.mulf %87, %88 : vector<8x512xf32>
    %c0_i32_38 = arith.constant 0 : i32
    %90 = tpu.memref_slice %arg17[%c0_i32_38] : memref<2x!tpu.dma_semaphore, #tpu.memory_space<semaphore_mem>> -> memref<1x!tpu.dma_semaphore, #tpu.memory_space<semaphore_mem>>
    %91 = tpu.memref_squeeze %90 : memref<1x!tpu.dma_semaphore, #tpu.memory_space<semaphore_mem>> -> memref<!tpu.dma_semaphore, #tpu.memory_space<semaphore_mem>>
    tpu.wait_dma2 semaphore(%91 : memref<!tpu.dma_semaphore, #tpu.memory_space<semaphore_mem>>) src(%arg12 : memref<512x1024xbf16, #tpu.memory_space<any>>) dst(%arg15 : memref<512x1024xbf16, #tpu.memory_space<vmem>>)
    %c0_39 = arith.constant 0 : index
    %c0_40 = arith.constant 0 : index
    %92 = vector.load %arg15[%c0_39, %c0_40] : memref<512x1024xbf16, #tpu.memory_space<vmem>>, vector<512x1024xbf16>
    %93 = arith.truncf %89 : vector<8x512xf32> to vector<8x512xbf16>
    %cst_41 = arith.constant dense<0.000000e+00> : vector<8x1024xf32>
    %94 = tpu.matmul %93, %92, %cst_41 {dimension_numbers = #tpu.dot_dimension_numbers<[1], [0], [0], [1], [0, 0, 1, 1], [], []>} : vector<8x512xbf16>, vector<512x1024xbf16>, vector<8x1024xf32> -> vector<8x1024xf32>
    %c0_42 = arith.constant 0 : index
    %c0_43 = arith.constant 0 : index
    %95 = vector.load %arg9[%c0_42, %c0_43] : memref<1x1024xf32, #tpu.memory_space<vmem>>, vector<1x1024xf32>
    %c0_44 = arith.constant 0 : index
    %c0_45 = arith.constant 0 : index
    %96 = vector.load %arg10[%c0_44, %c0_45] : memref<1x1024xf32, #tpu.memory_space<vmem>>, vector<1x1024xf32>
    %cst_46 = arith.constant dense<0.000000e+00> : vector<1024xf32>
    %97 = vector.multi_reduction <add>, %94, %cst_46 [0] : vector<8x1024xf32> to vector<1024xf32>
    %98 = vector.shape_cast %97 : vector<1024xf32> to vector<1x1024xf32>
    %cst_47 = arith.constant 2.500000e-01 : f32
    %99 = vector.broadcast %cst_47 : f32 to vector<1x1024xf32>
    %100 = arith.mulf %98, %99 : vector<1x1024xf32>
    %101 = vector.broadcast %100 : vector<1x1024xf32> to vector<8x1024xf32>
    %102 = arith.subf %94, %101 : vector<8x1024xf32>
    %103 = arith.mulf %102, %102 : vector<8x1024xf32>
    %cst_48 = arith.constant dense<0.000000e+00> : vector<1024xf32>
    %104 = vector.multi_reduction <add>, %103, %cst_48 [0] : vector<8x1024xf32> to vector<1024xf32>
    %105 = vector.shape_cast %104 : vector<1024xf32> to vector<1x1024xf32>
    %106 = arith.mulf %100, %100 : vector<1x1024xf32>
    %cst_49 = arith.constant 4.000000e+00 : f32
    %107 = vector.broadcast %cst_49 : f32 to vector<1x1024xf32>
    %108 = arith.mulf %107, %106 : vector<1x1024xf32>
    %109 = arith.subf %105, %108 : vector<1x1024xf32>
    %cst_50 = arith.constant 2.500000e-01 : f32
    %110 = vector.broadcast %cst_50 : f32 to vector<1x1024xf32>
    %111 = arith.mulf %109, %110 : vector<1x1024xf32>
    %cst_51 = arith.constant 9.99999974E-6 : f32
    %112 = vector.broadcast %cst_51 : f32 to vector<1x1024xf32>
    %113 = arith.addf %111, %112 : vector<1x1024xf32>
    %114 = math.rsqrt %113 : vector<1x1024xf32>
    %115 = arith.mulf %95, %114 : vector<1x1024xf32>
    %116 = arith.mulf %100, %115 : vector<1x1024xf32>
    %117 = arith.subf %96, %116 : vector<1x1024xf32>
    %118 = vector.broadcast %115 : vector<1x1024xf32> to vector<8x1024xf32>
    %119 = arith.mulf %94, %118 : vector<8x1024xf32>
    %120 = vector.broadcast %117 : vector<1x1024xf32> to vector<8x1024xf32>
    %121 = arith.addf %119, %120 : vector<8x1024xf32>
    %cst_52 = arith.constant 0.000000e+00 : f32
    %122 = vector.broadcast %cst_52 : f32 to vector<8x1024xf32>
    %123 = arith.maximumf %121, %122 : vector<8x1024xf32>
    %124 = vector.broadcast %9 : vector<8x1xf32> to vector<8x1024xf32>
    %125 = arith.mulf %123, %124 : vector<8x1024xf32>
    %c1_i32_53 = arith.constant 1 : i32
    %126 = tpu.memref_slice %arg17[%c1_i32_53] : memref<2x!tpu.dma_semaphore, #tpu.memory_space<semaphore_mem>> -> memref<1x!tpu.dma_semaphore, #tpu.memory_space<semaphore_mem>>
    %127 = tpu.memref_squeeze %126 : memref<1x!tpu.dma_semaphore, #tpu.memory_space<semaphore_mem>> -> memref<!tpu.dma_semaphore, #tpu.memory_space<semaphore_mem>>
    tpu.wait_dma2 semaphore(%127 : memref<!tpu.dma_semaphore, #tpu.memory_space<semaphore_mem>>) src(%arg13 : memref<1024x896xbf16, #tpu.memory_space<any>>) dst(%arg16 : memref<1024x896xbf16, #tpu.memory_space<vmem>>)
    %c0_54 = arith.constant 0 : index
    %c0_55 = arith.constant 0 : index
    %128 = vector.load %arg16[%c0_54, %c0_55] : memref<1024x896xbf16, #tpu.memory_space<vmem>>, vector<1024x896xbf16>
    %129 = arith.truncf %125 : vector<8x1024xf32> to vector<8x1024xbf16>
    %cst_56 = arith.constant dense<0.000000e+00> : vector<8x896xf32>
    %130 = tpu.matmul %129, %128, %cst_56 {dimension_numbers = #tpu.dot_dimension_numbers<[1], [0], [0], [1], [0, 0, 1, 1], [], []>} : vector<8x1024xbf16>, vector<1024x896xbf16>, vector<8x896xf32> -> vector<8x896xf32>
    %c0_57 = arith.constant 0 : index
    %c0_58 = arith.constant 0 : index
    %131 = vector.load %arg11[%c0_57, %c0_58] : memref<1x896xf32, #tpu.memory_space<vmem>>, vector<1x896xf32>
    %132 = vector.broadcast %131 : vector<1x896xf32> to vector<8x896xf32>
    %133 = arith.addf %130, %132 : vector<8x896xf32>
    %134 = math.tanh %133 : vector<8x896xf32>
    %c0_59 = arith.constant 0 : index
    %c0_60 = arith.constant 0 : index
    %135 = vector.load %arg14[%c0_59, %c0_60] : memref<8x896xf32, #tpu.memory_space<vmem>>, vector<8x896xf32>
    tpu.vector_store %arg14[%c0_59, %c0_60], %134 {strides = array<i32>} : memref<8x896xf32, #tpu.memory_space<vmem>>, vector<8x896xf32>,
    return
  }
}

</mosaic_0001>

<bundles_post_ra>
// kernel: generator_forward.1
= control target key start
LH: loop header
LB: loop body
LE: loop exit
PB: predicated region body
PF: predicated region fallthrough
CT: control target
= control target key end

     0   :  { %19 = vsyncpa [#allocation6], 0  ;;  %s4844_s0 = inlined_call_operand.vmem [shape: bf16[8,128], index: 0, kind: input, shape index: {}]   ;;  %s4845_s1 = inlined_call_operand.vmem [shape: s32[8,1], index: 1, kind: input, shape index: {}]   ;;  %s4846_s2 = inlined_call_operand.hbm [shape: bf16[128,128], index: 2, kind: input, shape index: {}]   ;;  %s4847_s3 = inlined_call_operand.hbm [shape: bf16[128,256], index: 3, kind: input, shape index: {}]   ;;  %s4848_s4 = inlined_call_operand.hbm [shape: f32[1,256], index: 4, kind: input, shape index: {}]   ;;  %s4849_s5 = inlined_call_operand.hbm [shape: f32[1,256], index: 5, kind: input, shape index: {}]   ;;  %s4850_s6 = inlined_call_operand.hbm [shape: bf16[256,512], index: 6, kind: input, shape index: {}]   ;;  %s4851_s7 = inlined_call_operand.hbm [shape: f32[1,512], index: 7, kind: input, shape index: {}]   ;;  %s4852_s8 = inlined_call_operand.hbm [shape: f32[1,512], index: 8, kind: input, shape index: {}]   ;;  %s4853_s9 = inlined_call_operand.hbm [shape: f32[1,1024], index: 9, kind: input, shape index: {}]   ;;  %s4854_s10 = inlined_call_operand.hbm [shape: f32[1,1024], index: 10, kind: input, shape index: {}]   ;;  %s4855_s11 = inlined_call_operand.hbm [shape: f32[1,896], index: 11, kind: input, shape index: {}]   ;;  %s4856_s12 = inlined_call_operand.hbm [shape: bf16[512,1024], index: 12, kind: input, shape index: {}]   ;;  %s4857_s13 = inlined_call_operand.hbm [shape: bf16[1024,896], index: 13, kind: input, shape index: {}]   ;;  %s4858_s14 = inlined_call_operand.vmem [shape: f32[8,896], index: 14, kind: output, shape index: {}]  }
   0x1   :  { %20 = vsyncpa [#allocation8], 0 }
   0x2   :  { %21 = vsyncpa [#allocation11], 0 }
   0x3   :  { %22 = vsyncpa [#allocation14], 0 }
   0x4   :  { %23 = vsyncpa [#allocation17], 0 }
   0x5   :  { %24 = vsyncpa [#allocation20], 0  ;;  %s4186_s29 = smov [#allocation7]   ;;  %s3950_s17 = scalar_lea.hbm %s4847_s3, 2048 }
   0x6   :  { %s46_s30 = sshll.u32 %s4186_s29, 4  ;;  %p3951_p0 = scmp.ne.s32.totalorder %s4847_s3, %s3950_s17  ;;  %s47_s30 = int_to_ptr.vmem [resolvable:$true] %s46_s30 }
   0x7   :  { %p3954_p1 = scmp.lt.u32.totalorder %s3950_s17, %s4847_s3 }
   0x9   :  { %p3956_p2 = pnand %p3954_p1, %p3951_p0 }
   0xb   :  { %3959 = shalt.err (!%p3956_p2)
}
   0xc   :  { %s3960_s22 = scalar_lea.vmem %s47_s30, 2048  ;;  %p3965_p4 = scmp.lt.s32.totalorder %s47_s30, %s47_s30 }
   0xd   :  { %p3961_p3 = scmp.ne.s32.totalorder %s47_s30, %s3960_s22  ;;  %p3966_p5 = scmp.lt.s32.totalorder %s3960_s22, %s3960_s22 }
   0xf   :  { %p3967_p6 = por %p3966_p5, %p3965_p4 }
  0x11   :  { %p3968_p7 = pnand %p3967_p6, %p3961_p3 }
  0x13   :  { %3971 = shalt.err (!%p3968_p7)
}
  0x14   :  { %s4187_s23 = smov 128   ;;  %s4188_s24 = smov 8  }
  0x15   :  { %52 = dma.hbm_to_vmem [thread:$0]  %s4847_s3, 2048, %s47_s30, [#allocation8], %s4187_s23, %s4187_s23, %s4188_s24  }
  0x16   :  { %s4189_s27 = smov [#allocation10]   ;;  %s4190_s29 = smov [#allocation13]  }
  0x17   :  { %s69_s28 = sshll.u32 %s4189_s27, 4  ;;  %s91_s15 = sshll.u32 %s4190_s29, 4  ;;  %s70_s28 = int_to_ptr.vmem [resolvable:$true] %s69_s28  ;;  %s92_s15 = int_to_ptr.vmem [resolvable:$true] %s91_s15 }
  0x18   :  { %s3972_s18 = scalar_lea.hbm %s4849_s5, 32 }
  0x19   :  { %p3973_p8 = scmp.ne.s32.totalorder %s4849_s5, %s3972_s18  ;;  %p3976_p9 = scmp.lt.u32.totalorder %s3972_s18, %s4849_s5 }
  0x1b   :  { %p3978_p10 = pnand %p3976_p9, %p3973_p8 }
  0x1d   :  { %3981 = shalt.err (!%p3978_p10)
}
  0x1e   :  { %s3982_s3 = scalar_lea.vmem %s70_s28, 32  ;;  %p3987_p12 = scmp.lt.s32.totalorder %s70_s28, %s70_s28 }
  0x1f   :  { %p3983_p11 = scmp.ne.s32.totalorder %s70_s28, %s3982_s3  ;;  %p3988_p13 = scmp.lt.s32.totalorder %s3982_s3, %s3982_s3 }
  0x21   :  { %p3989_p0 = por %p3988_p13, %p3987_p12 }
  0x23   :  { %p3990_p1 = pnand %p3989_p0, %p3983_p11 }
  0x25   :  { %3993 = shalt.err (!%p3990_p1)
}
  0x26   :  { %72 = dma.hbm_to_vmem [thread:$0]  %s4849_s5, 32, %s70_s28, [#allocation11]  }
  0x27   :  { %s3994_s29 = scalar_lea.hbm %s4851_s7, 64 }
  0x28   :  { %p3995_p2 = scmp.ne.s32.totalorder %s4851_s7, %s3994_s29  ;;  %p3998_p3 = scmp.lt.u32.totalorder %s3994_s29, %s4851_s7 }
  0x2a   :  { %p4000_p4 = pnand %p3998_p3, %p3995_p2 }
  0x2c   :  { %4003 = shalt.err (!%p4000_p4)
}
  0x2d   :  { %s4004_s20 = scalar_lea.vmem %s92_s15, 64  ;;  %p4009_p6 = scmp.lt.s32.totalorder %s92_s15, %s92_s15 }
  0x2e   :  { %p4005_p5 = scmp.ne.s32.totalorder %s92_s15, %s4004_s20  ;;  %p4010_p7 = scmp.lt.s32.totalorder %s4004_s20, %s4004_s20 }
  0x30   :  { %p4011_p8 = por %p4010_p7, %p4009_p6 }
  0x32   :  { %p4012_p9 = pnand %p4011_p8, %p4005_p5 }
  0x34   :  { %4015 = shalt.err (!%p4012_p9)
}
  0x35   :  { %94 = dma.hbm_to_vmem [thread:$0]  %s4851_s7, 64, %s92_s15, [#allocation14]  }
  0x36   :  { %s4191_s21 = smov [#allocation16]   ;;  %s4192_s3 = smov [#allocation5]  }
  0x37   :  { %s111_s22 = sshll.u32 %s4191_s21, 4  ;;  %s34_s30 = sshll.u32 %s4192_s3, 4  ;;  %s112_s22 = int_to_ptr.vmem [resolvable:$true] %s111_s22  ;;  %s35_s30 = int_to_ptr.vmem [resolvable:$true] %s34_s30 }
  0x38   :  { %s4016_s27 = scalar_lea.hbm %s4853_s9, 128 }
  0x39   :  { %p4017_p10 = scmp.ne.s32.totalorder %s4853_s9, %s4016_s27  ;;  %p4020_p11 = scmp.lt.u32.totalorder %s4016_s27, %s4853_s9 }
  0x3b   :  { %p4022_p12 = pnand %p4020_p11, %p4017_p10 }
  0x3d   :  { %4025 = shalt.err (!%p4022_p12)
}
  0x3e   :  { %s4026_s7 = scalar_lea.vmem %s112_s22, 128  ;;  %p4031_p0 = scmp.lt.s32.totalorder %s112_s22, %s112_s22 }
  0x3f   :  { %p4027_p13 = scmp.ne.s32.totalorder %s112_s22, %s4026_s7  ;;  %p4032_p1 = scmp.lt.s32.totalorder %s4026_s7, %s4026_s7 }
  0x41   :  { %p4033_p2 = por %p4032_p1, %p4031_p0 }
  0x43   :  { %p4034_p3 = pnand %p4033_p2, %p4027_p13 }
  0x45   :  { %4037 = shalt.err (!%p4034_p3)
}
  0x46   :  { %114 = dma.hbm_to_vmem [thread:$0]  %s4853_s9, 128, %s112_s22, [#allocation17]  }
  0x47   :  { %s4038_s28 = scalar_lea.hbm %s4846_s2, 1024 }
  0x48   :  { %p4039_p4 = scmp.ne.s32.totalorder %s4846_s2, %s4038_s28  ;;  %p4042_p5 = scmp.lt.u32.totalorder %s4038_s28, %s4846_s2 }
  0x4a   :  { %p4044_p6 = pnand %p4042_p5, %p4039_p4 }
  0x4c   :  { %4047 = shalt.err (!%p4044_p6)
}
  0x4d   :  { %s4048_s27 = scalar_lea.vmem %s35_s30, 1024  ;;  %p4053_p8 = scmp.lt.s32.totalorder %s35_s30, %s35_s30 }
  0x4e   :  { %p4049_p7 = scmp.ne.s32.totalorder %s35_s30, %s4048_s27  ;;  %p4054_p9 = scmp.lt.s32.totalorder %s4048_s27, %s4048_s27 }
  0x50   :  { %p4055_p10 = por %p4054_p9, %p4053_p8 }
  0x52   :  { %p4056_p11 = pnand %p4055_p10, %p4049_p7 }
  0x54   :  { %4059 = shalt.err (!%p4056_p11)
}
  0x55   :  { %s4193_s9 = smov 64   ;;  %s4194_s22 = smov 4  }
  0x56   :  { %40 = dma.hbm_to_vmem [thread:$0]  %s4846_s2, 1024, %s35_s30, [#allocation6], %s4193_s9, %s4193_s9, %s4194_s22  }
  0x57   :  { %s4195_s17 = smov [#allocation9]   ;;  %s4196_s7 = smov [#allocation12]  }
  0x58   :  { %s59_s18 = sshll.u32 %s4195_s17, 4  ;;  %s78_s15 = sshll.u32 %s4196_s7, 4  ;;  %s60_s18 = int_to_ptr.vmem [resolvable:$true] %s59_s18  ;;  %s79_s15 = int_to_ptr.vmem [resolvable:$true] %s78_s15 }
  0x59   :  { %s4060_s5 = scalar_lea.hbm %s4848_s4, 32 }
  0x5a   :  { %p4061_p12 = scmp.ne.s32.totalorder %s4848_s4, %s4060_s5  ;;  %p4064_p13 = scmp.lt.u32.totalorder %s4060_s5, %s4848_s4 }
  0x5c   :  { %p4066_p0 = pnand %p4064_p13, %p4061_p12 }
  0x5e   :  { %4069 = shalt.err (!%p4066_p0)
}
  0x5f   :  { %s4070_s2 = scalar_lea.vmem %s60_s18, 32  ;;  %p4075_p2 = scmp.lt.s32.totalorder %s60_s18, %s60_s18 }
  0x60   :  { %p4071_p1 = scmp.ne.s32.totalorder %s60_s18, %s4070_s2  ;;  %p4076_p3 = scmp.lt.s32.totalorder %s4070_s2, %s4070_s2 }
  0x62   :  { %p4077_p4 = por %p4076_p3, %p4075_p2 }
  0x64   :  { %p4078_p5 = pnand %p4077_p4, %p4071_p1 }
  0x66   :  { %4081 = shalt.err (!%p4078_p5)
}
  0x67   :  { %62 = dma.hbm_to_vmem [thread:$0]  %s4848_s4, 32, %s60_s18, [#allocation8]  }
  0x68   :  { %s4082_s16 = scalar_lea.hbm %s4850_s6, 8192 }
  0x69   :  { %p4083_p6 = scmp.ne.s32.totalorder %s4850_s6, %s4082_s16  ;;  %p4086_p7 = scmp.lt.u32.totalorder %s4082_s16, %s4850_s6 }
  0x6b   :  { %p4088_p8 = pnand %p4086_p7, %p4083_p6 }
  0x6d   :  { %4091 = shalt.err (!%p4088_p8)
}
  0x6e   :  { %s4092_s5 = scalar_lea.vmem %s79_s15, 8192  ;;  %p4097_p10 = scmp.lt.s32.totalorder %s79_s15, %s79_s15 }
  0x6f   :  { %p4093_p9 = scmp.ne.s32.totalorder %s79_s15, %s4092_s5  ;;  %p4098_p11 = scmp.lt.s32.totalorder %s4092_s5, %s4092_s5 }
  0x71   :  { %p4099_p12 = por %p4098_p11, %p4097_p10 }
  0x73   :  { %p4100_p13 = pnand %p4099_p12, %p4093_p9 }
  0x75   :  { %4103 = shalt.err (!%p4100_p13)
}
  0x76   :  { %s4197_s4 = smov 256   ;;  %s4198_s18 = smov 16  }
  0x77   :  { %84 = dma.hbm_to_vmem [thread:$0]  %s4850_s6, 8192, %s79_s15, [#allocation11], %s4197_s4, %s4197_s4, %s4198_s18  }
  0x78   :  { %s4199_s3 = smov [#allocation15]   ;;  %s4200_s2 = smov [#allocation18]  }
  0x79   :  { %s101_s25 = sshll.u32 %s4199_s3, 4  ;;  %s121_s30 = sshll.u32 %s4200_s2, 4  ;;  %s102_s25 = int_to_ptr.vmem [resolvable:$true] %s101_s25  ;;  %s122_s30 = int_to_ptr.vmem [resolvable:$true] %s121_s30 }
  0x7a   :  { %s4104_s29 = scalar_lea.hbm %s4852_s8, 64 }
  0x7b   :  { %p4105_p0 = scmp.ne.s32.totalorder %s4852_s8, %s4104_s29  ;;  %p4108_p1 = scmp.lt.u32.totalorder %s4104_s29, %s4852_s8 }
  0x7d   :  { %p4110_p2 = pnand %p4108_p1, %p4105_p0 }
  0x7f   :  { %4113 = shalt.err (!%p4110_p2)
}
  0x80   :  { %s4114_s6 = scalar_lea.vmem %s102_s25, 64  ;;  %p4119_p4 = scmp.lt.s32.totalorder %s102_s25, %s102_s25 }
  0x81   :  { %p4115_p3 = scmp.ne.s32.totalorder %s102_s25, %s4114_s6  ;;  %p4120_p5 = scmp.lt.s32.totalorder %s4114_s6, %s4114_s6 }
  0x83   :  { %p4121_p6 = por %p4120_p5, %p4119_p4 }
  0x85   :  { %p4122_p7 = pnand %p4121_p6, %p4115_p3 }
  0x87   :  { %4125 = shalt.err (!%p4122_p7)
}
  0x88   :  { %104 = dma.hbm_to_vmem [thread:$0]  %s4852_s8, 64, %s102_s25, [#allocation14]  }
  0x89   :  { %s4126_s18 = scalar_lea.hbm %s4854_s10, 128 }
  0x8a   :  { %p4127_p8 = scmp.ne.s32.totalorder %s4854_s10, %s4126_s18  ;;  %p4130_p9 = scmp.lt.u32.totalorder %s4126_s18, %s4854_s10 }
  0x8c   :  { %p4132_p10 = pnand %p4130_p9, %p4127_p8 }
  0x8e   :  { %4135 = shalt.err (!%p4132_p10)
}
  0x8f   :  { %s4136_s26 = scalar_lea.vmem %s122_s30, 128  ;;  %p4141_p12 = scmp.lt.s32.totalorder %s122_s30, %s122_s30 }
  0x90   :  { %p4137_p11 = scmp.ne.s32.totalorder %s122_s30, %s4136_s26  ;;  %p4142_p13 = scmp.lt.s32.totalorder %s4136_s26, %s4136_s26 }
  0x92   :  { %p4143_p0 = por %p4142_p13, %p4141_p12 }
  0x94   :  { %p4144_p1 = pnand %p4143_p0, %p4137_p11 }
  0x96   :  { %4147 = shalt.err (!%p4144_p1)
}
  0x97   :  { %124 = dma.hbm_to_vmem [thread:$0]  %s4854_s10, 128, %s122_s30, [#allocation17]  }
  0x98   :  { %s4201_s27 = smov [#allocation19]   ;;  %s4148_s7 = scalar_lea.hbm %s4855_s11, 112 }
  0x99   :  { %s131_s29 = sshll.u32 %s4201_s27, 4  ;;  %p4149_p2 = scmp.ne.s32.totalorder %s4855_s11, %s4148_s7  ;;  %s132_s29 = int_to_ptr.vmem [resolvable:$true] %s131_s29 }
  0x9a   :  { %p4152_p3 = scmp.lt.u32.totalorder %s4148_s7, %s4855_s11 }
  0x9c   :  { %p4154_p4 = pnand %p4152_p3, %p4149_p2 }
  0x9e   :  { %4157 = shalt.err (!%p4154_p4)
}
  0x9f   :  { %s4158_s5 = scalar_lea.vmem %s132_s29, 112  ;;  %s4162_s10 = scalar_lea.vmem %s132_s29, 128 }
  0xa0   :  { %p4159_p5 = scmp.ne.s32.totalorder %s132_s29, %s4158_s5  ;;  %p4163_p6 = scmp.lt.s32.totalorder %s132_s29, %s132_s29 }
  0xa1   :  { %p4164_p7 = scmp.lt.s32.totalorder %s4162_s10, %s4158_s5 }
  0xa3   :  { %p4165_p8 = por %p4164_p7, %p4163_p6 }
  0xa5   :  { %p4166_p9 = pnand %p4165_p8, %p4159_p5 }
  0xa7   :  { %4169 = shalt.err (!%p4166_p9)
}
  0xa8   :  { %134 = dma.hbm_to_vmem [thread:$0]  %s4855_s11, 112, %s132_s29, [#allocation20]  }
  0xa9   :  { %4170 = dma.done.wait [#allocation6], 1024  }
  0xaa   :  { %4171 = vsyncadd [#allocation6], 4294966272 }
  0xab   :  { %4172 = dma.done.wait [#allocation8], 2080  }
  0xac   :  { %4173 = vsyncadd [#allocation8], 4294965216 }
  0xad   :  { %4174 = dma.done.wait [#allocation11], 8224  }
  0xae   :  { %4175 = vsyncadd [#allocation11], 4294959072 }
  0xaf   :  { %4176 = dma.done.wait [#allocation14], 128  }
  0xb0   :  { %4177 = vsyncadd [#allocation14], 4294967168 }
  0xb1   :  { %4178 = dma.done.wait [#allocation17], 256  }
  0xb2   :  { %4179 = vsyncadd [#allocation17], 4294967040 }
  0xb3   :  { %4180 = dma.done.wait [#allocation20], 112  }
  0xb4   :  { %4181 = vsyncadd [#allocation20], 4294967184  ;;  %s170_s18 = sld [smem:[#allocation0]]   ;;  %s4202_s28 = smov 1024   ;;  %v4203_v0 = vmov 0   ;;  %v4204_v1 = vmov 0.0   ;;  %v239_v26 = vlaneseq }
  0xb5   :  { %182 = sst [smem:[#allocation22]] %s4202_s28  ;;  %3779 = vset.pattern.permute.xlu0 %v4203_v0  ;;  %3668 = vmatprep.subr.bf16.mxu0 %v4204_v1  ;;  %s4205_s11 = smov [#allocation2]   ;;  %vm4216_vm1 = vmmov 0   ;;  %v4217_v29 = vmov 1.0|1.0  }
  0xb6   :  { %184 = sst [smem:[#allocation22 + $0x1]] %s4202_s28  ;;  %483 = vmatprep.mubr.bf16.mxu1 %v4203_v0  ;;  %s178_s21 = sshll.u32 %s4205_s11, 4  ;;  %3684 = vmatprep.mubr.msk.bf16.mxu0 %vm4216_vm1, %v4204_v1  ;;  %v240_v27 = vand.u32 127, %v239_v26  ;;  %s179_s21 = int_to_ptr.vmem [resolvable:$true] %s178_s21 }
  0xb7   :  { %186 = sst [smem:[#allocation22 + $0x2]] %s4188_s24  ;;  %s4206_s3 = smov 512  }
  0xb8   :  { %188 = sst [smem:[#allocation22 + $0x3]] %s4193_s9  ;;  %s4207_s8 = smov 2  }
  0xb9   :  { %190 = sst [smem:[#allocation22 + $0x4]] %s4187_s23  ;;  %s4208_s25 = smov [#allocation4]  }
  0xba   :  { %194 = sst [smem:[#allocation22 + $0x6]] %s4206_s3  ;;  %s3475_s2 = sshll.u32 %s170_s18, 26 }
  0xbb   :  { %196 = sst [smem:[#allocation22 + $0x7]] %s4193_s9  ;;  %s3476_s26 = sadd.s32 134217728, %s3475_s2 }
  0xbc   :  { %198 = sst [smem:[#allocation22 + $0x8]] %s4194_s22  ;;  %s4209_s27 = smov [#allocation21]  }
  0xbd   :  { %192 = sst [smem:[#allocation22 + $0x5]] %s4207_s8  ;;  %s4210_s16 = smov 896  }
  0xbe   :  { %200 = dma.general %s4856_s12, 32768, %s179_s21, %s4208_s25, %s4209_s27, [#allocation22], %s3476_s26, 0  }
  0xbf   :  { %217 = sst [smem:[#allocation24]] %s4210_s16  ;;  %s4211_s17 = smov 7  }
  0xc0   :  { %219 = sst [smem:[#allocation24 + $0x1]] %s4210_s16  ;;  %s4212_s7 = smov [#allocation3]  }
  0xc1   :  { %221 = sst [smem:[#allocation24 + $0x2]] %s4211_s17  ;;  %s213_s19 = sshll.u32 %s4212_s7, 4  ;;  %s214_s19 = int_to_ptr.vmem [resolvable:$true] %s213_s19 }
  0xc2   :  { %223 = sst [smem:[#allocation24 + $0x3]] %s4193_s9  ;;  %s4213_s6 = smov 448  }
  0xc3   :  { %225 = sst [smem:[#allocation24 + $0x4]] %s4187_s23  ;;  %s4214_s12 = smov [#allocation4 + $0x1]  }
  0xc4   :  { %227 = sst [smem:[#allocation24 + $0x5]] %s4207_s8  ;;  %s4215_s15 = smov [#allocation23]  }
  0xc5   :  { %229 = sst [smem:[#allocation24 + $0x6]] %s4213_s6 }
  0xc6   :  { %231 = sst [smem:[#allocation24 + $0x7]] %s4193_s9 }
  0xc7   :  { %233 = sst [smem:[#allocation24 + $0x8]] %s4194_s22 }
  0xc8   :  { %235 = dma.general %s4857_s13, 57344, %s214_s19, %s4214_s12, %s4215_s15, [#allocation24], %s3476_s26, 0  }
  0xc9   :  { %v236_v2 = vld [vmem:[%s4845_s1] sm:$0xff]  ;;  %v3781_v5 = vld [vmem:[#allocation5 + $0x8] sm:$0xff]   ;;  %v3782_v6 = vld [vmem:[#allocation5 + $0x10] sm:$0xff]  }
  0xca   :  { %242 = vperm.xlu0 %3779, %v236_v2   ;;  %vm237_vm0 = vcmp.ge.s32.totalorder %v236_v2, 0  ;;  %v3780_v3 = vld [vmem:[#allocation5] sm:$0xff]   ;;  %v3791_v9 = vld [vmem:[#allocation7 + $0x14] ss:$8 sps:$4 sm:$0xff]   ;;  %v3793_v11 = vld [vmem:[#allocation7 + $0x10] ss:$8 sps:$4 sm:$0xff]  }
  0xcb   :  { %v238_v4 = vsel %vm237_vm0, 1.0, %v4204_v1  ;;  %3669 = vmatpush3.bf16.msra.mxu0 %v3780_v3  ;;  %v3788_v7 = vld [vmem:[#allocation7 + $0x4] ss:$8 sps:$4 sm:$0xff]   ;;  %v3790_v8 = vld [vmem:[#allocation7] ss:$8 sps:$4 sm:$0xff]   ;;  %v3783_v10 = vld [vmem:[#allocation5 + $0x18] sm:$0xff]  }
  0xcc   :  { %3670 = vmatprep.subr.bf16.mxu0 %v4204_v1  ;;  %451 = vmatprep.subr.bf16.mxu1 %v3788_v7  ;;  %v3794_v12 = vld [vmem:[#allocation7 + $0x24] ss:$8 sps:$4 sm:$0xff]   ;;  %v3796_v14 = vld [vmem:[#allocation7 + $0x20] ss:$8 sps:$4 sm:$0xff]   ;;  %v3797_v16 = vld [vmem:[#allocation7 + $0x34] ss:$8 sps:$4 sm:$0xff]  }
  0xcd   :  { %452 = vmatpush1.bf16.msra.mxu1 %v3790_v8  ;;  %v3784_v13 = vld [vmem:[#allocation5 + $0x20] sm:$0xff]   ;;  %v3785_v15 = vld [vmem:[#allocation5 + $0x28] sm:$0xff]   ;;  %v3799_v17 = vld [vmem:[#allocation7 + $0x30] ss:$8 sps:$4 sm:$0xff]  }
  0xce   :  { %606 = vperm.xlu0 %3779, %v238_v4   ;;  %453 = vmatprep.subr.bf16.mxu1 %v3791_v9  ;;  %v3800_v18 = vld [vmem:[#allocation7 + $0x44] ss:$8 sps:$4 sm:$0xff]   ;;  %v3786_v19 = vld [vmem:[#allocation5 + $0x30] sm:$0xff]   ;;  %v3802_v20 = vld [vmem:[#allocation7 + $0x40] ss:$8 sps:$4 sm:$0xff]  }
  0xcf   :  { %3671 = vmatpush3.bf16.msra.mxu0 %v3781_v5  ;;  %v3803_v21 = vld [vmem:[#allocation7 + $0x54] ss:$8 sps:$4 sm:$0xff]   ;;  %v3805_v23 = vld [vmem:[#allocation7 + $0x50] ss:$8 sps:$4 sm:$0xff]   ;;  %v3806_v24 = vld [vmem:[#allocation7 + $0x64] ss:$8 sps:$4 sm:$0xff]  }
  0xd0   :  { %3672 = vmatprep.subr.bf16.mxu0 %v4204_v1  ;;  %v3787_v22 = vld [vmem:[#allocation5 + $0x38] sm:$0xff]   ;;  %v3808_v25 = vld [vmem:[#allocation7 + $0x60] ss:$8 sps:$4 sm:$0xff]   ;;  %v3812_v41 = vld [vmem:[#allocation12] ss:$16 sps:$4 sm:$0xff]  }
  0xd1   :  { %454 = vmatpush1.bf16.msra.mxu1 %v3793_v11  ;;  %v3809_v30 = vld [vmem:[#allocation7 + $0x74] ss:$8 sps:$4 sm:$0xff]   ;;  %v3811_v31 = vld [vmem:[#allocation7 + $0x70] ss:$8 sps:$4 sm:$0xff]   ;;  %v351_v32 = vld [vmem:[%s4844_s0] sm:$0xf] }
  0xd2   :  { %455 = vmatprep.subr.bf16.mxu1 %v3794_v12  ;;  %v352_v33 = vunpack.c.l.bf16 %v351_v32  ;;  %v3814_v40 = vld [vmem:[#allocation12 + $0x4] ss:$16 sps:$4 sm:$0xff]   ;;  %v3815_v43 = vld [vmem:[#allocation12 + $0x20] ss:$16 sps:$4 sm:$0xff]   ;;  %v3862_v8 = vld [vmem:[#allocation12 + $0xc] ss:$16 sps:$4 sm:$0xff]  }
  0xd3   :  { %3673 = vmatpush3.bf16.msra.mxu0 %v3782_v6  ;;  %v3817_v42 = vld [vmem:[#allocation12 + $0x24] ss:$16 sps:$4 sm:$0xff]   ;;  %v3818_v45 = vld [vmem:[#allocation12 + $0x40] ss:$16 sps:$4 sm:$0xff]  }
  0xd4   :  { %3674 = vmatprep.subr.bf16.mxu0 %v4204_v1  ;;  %v3820_v44 = vld [vmem:[#allocation12 + $0x44] ss:$16 sps:$4 sm:$0xff]   ;;  %v3821_v47 = vld [vmem:[#allocation12 + $0x60] ss:$16 sps:$4 sm:$0xff]  }
  0xd5   :  { %456 = vmatpush1.bf16.msra.mxu1 %v3796_v14  ;;  %v3823_v46 = vld [vmem:[#allocation12 + $0x64] ss:$16 sps:$4 sm:$0xff]   ;;  %v3824_v49 = vld [vmem:[#allocation12 + $0x80] ss:$16 sps:$4 sm:$0xff]  }
  0xd6   :  { %457 = vmatprep.subr.bf16.mxu1 %v3797_v16  ;;  %v3826_v48 = vld [vmem:[#allocation12 + $0x84] ss:$16 sps:$4 sm:$0xff]   ;;  %v3827_v51 = vld [vmem:[#allocation12 + $0xa0] ss:$16 sps:$4 sm:$0xff]  }
  0xd7   :  { %3675 = vmatpush3.bf16.msra.mxu0 %v3783_v10  ;;  %v3829_v50 = vld [vmem:[#allocation12 + $0xa4] ss:$16 sps:$4 sm:$0xff]   ;;  %v3830_v53 = vld [vmem:[#allocation12 + $0xc0] ss:$16 sps:$4 sm:$0xff]  }
  0xd8   :  { %3676 = vmatprep.subr.bf16.mxu0 %v4204_v1  ;;  %v3832_v52 = vld [vmem:[#allocation12 + $0xc4] ss:$16 sps:$4 sm:$0xff]   ;;  %v3833_v55 = vld [vmem:[#allocation12 + $0xe0] ss:$16 sps:$4 sm:$0xff]  }
  0xd9   :  { %458 = vmatpush1.bf16.msra.mxu1 %v3799_v17  ;;  %v3835_v54 = vld [vmem:[#allocation12 + $0xe4] ss:$16 sps:$4 sm:$0xff]   ;;  %v3836_v57 = vld [vmem:[#allocation12 + $0x100] ss:$16 sps:$4 sm:$0xff]  }
  0xda   :  { %459 = vmatprep.subr.bf16.mxu1 %v3800_v18  ;;  %v3838_v56 = vld [vmem:[#allocation12 + $0x104] ss:$16 sps:$4 sm:$0xff]   ;;  %v3839_v59 = vld [vmem:[#allocation12 + $0x120] ss:$16 sps:$4 sm:$0xff]  }
  0xdb   :  { %3677 = vmatpush3.bf16.msra.mxu0 %v3784_v13  ;;  %v3841_v58 = vld [vmem:[#allocation12 + $0x124] ss:$16 sps:$4 sm:$0xff]   ;;  %v3842_v61 = vld [vmem:[#allocation12 + $0x140] ss:$16 sps:$4 sm:$0xff]  }
  0xdc   :  { %3678 = vmatprep.subr.bf16.mxu0 %v4204_v1  ;;  %v3844_v60 = vld [vmem:[#allocation12 + $0x144] ss:$16 sps:$4 sm:$0xff]   ;;  %v3845_v63 = vld [vmem:[#allocation12 + $0x160] ss:$16 sps:$4 sm:$0xff]  }
  0xdd   :  { %460 = vmatpush1.bf16.msra.mxu1 %v3802_v20  ;;  %v3847_v62 = vld [vmem:[#allocation12 + $0x164] ss:$16 sps:$4 sm:$0xff]   ;;  %v3851_v3 = vld [vmem:[#allocation12 + $0x1a0] ss:$16 sps:$4 sm:$0xff]  }
  0xde   :  { %461 = vmatprep.subr.bf16.mxu1 %v3803_v21  ;;  %v3850_v0 = vld [vmem:[#allocation12 + $0x184] ss:$16 sps:$4 sm:$0xff]   ;;  %v3854_v5 = vld [vmem:[#allocation12 + $0x1c0] ss:$16 sps:$4 sm:$0xff]  }
  0xdf   :  { %3679 = vmatpush3.bf16.msra.mxu0 %v3785_v15  ;;  %v3853_v2 = vld [vmem:[#allocation12 + $0x1a4] ss:$16 sps:$4 sm:$0xff]   ;;  %v3857_v7 = vld [vmem:[#allocation12 + $0x1e0] ss:$16 sps:$4 sm:$0xff]  }
  0xe0   :  { %3680 = vmatprep.subr.bf16.mxu0 %v4204_v1  ;;  %v3856_v4 = vld [vmem:[#allocation12 + $0x1c4] ss:$16 sps:$4 sm:$0xff]  }
  0xe1   :  { %462 = vmatpush1.bf16.msra.mxu1 %v3805_v23  ;;  %v3859_v6 = vld [vmem:[#allocation12 + $0x1e4] ss:$16 sps:$4 sm:$0xff]  }
  0xe2   :  { %463 = vmatprep.subr.bf16.mxu1 %v3806_v24 }
  0xe3   :  { %3681 = vmatpush3.bf16.msra.mxu0 %v3786_v19 }
  0xe4   :  { %3682 = vmatprep.subr.bf16.mxu0 %v4204_v1  ;;  %v3848_v1 = vld [vmem:[#allocation12 + $0x180] ss:$16 sps:$4 sm:$0xff]  }
  0xe5   :  { %464 = vmatpush1.bf16.msra.mxu1 %v3808_v25 }
  0xe6   :  { %465 = vmatprep.subr.bf16.mxu1 %v3809_v30 }
  0xe7   :  { %3683 = vmatpush3.bf16.msra.mxu0 %v3787_v22 }
  0xe9   :  { %466 = vmatpush1.bf16.msra.mxu1 %v3811_v31 }
  0xea   :  { %997 = vmatprep.subr.bf16.mxu1 %v3814_v40 }
 0x149   :  { %v243_v28 = vpop.permute.xlu0 %242 }
 0x14a   :  { %vm244_vm2 = vcmp.eq.s32.totalorder %v243_v28, %v240_v27 }
 0x14b   :  { %vm3487_vm3 = vmpackc.low %vm244_vm2, %vm244_vm2 }
 0x14c   :  { %3685 = vmatmul.mubr.msk.bf16.vlgmr.msra.gmra.mrb[0].mxu0 %vm3487_vm3, %v4217_v29 }
 0x21f   :  { %v345_v34 = vpop.f32.mrb[0].mxu0 }
 0x220   :  { %v353_v35 = vadd.f32 %v352_v33, %v345_v34  ;;  %v3686_v36 = vpop.f32.mrb[1].mxu0 }
 0x221   :  { %v348_v37 = vpop.f32.mrb[2].mxu0 }
 0x222   :  { %v370_v38 = vpack.c.bf16 %v353_v35, %v353_v35  ;;  %v3687_v39 = vpop.f32.mrb[3].mxu0 }
 0x224   :  { %484 = vmatmul.mubr.bf16.vlgmr.msra.gmra.mrb[0].mxu1 %v370_v38 }
 0x225   :  { %998 = vmatpush1.bf16.msra.mxu1 %v3812_v41 }
 0x226   :  { %999 = vmatprep.subr.bf16.mxu1 %v3817_v42 }
 0x229   :  { %1000 = vmatpush1.bf16.msra.mxu1 %v3815_v43 }
 0x22a   :  { %1001 = vmatprep.subr.bf16.mxu1 %v3820_v44 }
 0x22d   :  { %1002 = vmatpush1.bf16.msra.mxu1 %v3818_v45 }
 0x22e   :  { %1003 = vmatprep.subr.bf16.mxu1 %v3823_v46 }
 0x231   :  { %1004 = vmatpush1.bf16.msra.mxu1 %v3821_v47 }
 0x232   :  { %1005 = vmatprep.subr.bf16.mxu1 %v3826_v48 }
 0x235   :  { %1006 = vmatpush1.bf16.msra.mxu1 %v3824_v49 }
 0x236   :  { %1007 = vmatprep.subr.bf16.mxu1 %v3829_v50 }
 0x239   :  { %1008 = vmatpush1.bf16.msra.mxu1 %v3827_v51 }
 0x23a   :  { %1009 = vmatprep.subr.bf16.mxu1 %v3832_v52 }
 0x23d   :  { %1010 = vmatpush1.bf16.msra.mxu1 %v3830_v53 }
 0x23e   :  { %1011 = vmatprep.subr.bf16.mxu1 %v3835_v54  ;;  %v4218_v54 = vmov 1966171168  }
 0x241   :  { %1012 = vmatpush1.bf16.msra.mxu1 %v3833_v55  ;;  %v540_v55 = vunpack.c.l.s4 %v4218_v54  ;;  %v3902_v54 = vld [vmem:[#allocation12 + $0x1c8] ss:$16 sps:$4 sm:$0xff]  }
 0x242   :  { %1013 = vmatprep.subr.bf16.mxu1 %v3838_v56 }
 0x243   :  { %v541_v56 = vunpack.c.0.s8 %v540_v55  ;;  %v3907_v55 = vld [vmem:[#allocation12 + $0x1ec] ss:$16 sps:$4 sm:$0xff]  }
 0x245   :  { %1014 = vmatpush1.bf16.msra.mxu1 %v3836_v57  ;;  %v4458_v57 = vshrl.u32 %v239_v26, 7 }
 0x246   :  { %1015 = vmatprep.subr.bf16.mxu1 %v3841_v58 }
 0x249   :  { %1016 = vmatpush1.bf16.msra.mxu1 %v3839_v59  ;;  %v4461_v59 = vsub.s32 %v541_v56, %v4458_v57  ;;  %v3905_v56 = vld [vmem:[#allocation12 + $0x1e8] ss:$16 sps:$4 sm:$0xff]  }
 0x24a   :  { %1017 = vmatprep.subr.bf16.mxu1 %v3844_v60 }
 0x24d   :  { %1018 = vmatpush1.bf16.msra.mxu1 %v3842_v61 }
 0x24e   :  { %1019 = vmatprep.subr.bf16.mxu1 %v3847_v62 }
 0x251   :  { %1020 = vmatpush1.bf16.msra.mxu1 %v3845_v63  ;;  %v492_v63 = vld [vmem:[#allocation9] sm:$0x3] }
 0x252   :  { %1021 = vmatprep.subr.bf16.mxu1 %v3850_v0  ;;  %v4465_v0 = vsub.s32 0, %v4458_v57 }
 0x255   :  { %1022 = vmatpush1.bf16.msra.mxu1 %v3848_v1 }
 0x256   :  { %1023 = vmatprep.subr.bf16.mxu1 %v3853_v2  ;;  %v4469_v2 = vsub.s32 1, %v4458_v57 }
 0x259   :  { %1024 = vmatpush1.bf16.msra.mxu1 %v3851_v3 }
 0x25a   :  { %1025 = vmatprep.subr.bf16.mxu1 %v3856_v4 }
 0x25d   :  { %1026 = vmatpush1.bf16.msra.mxu1 %v3854_v5 }
 0x25e   :  { %1027 = vmatprep.subr.bf16.mxu1 %v3859_v6 }
 0x261   :  { %1028 = vmatpush1.bf16.msra.mxu1 %v3857_v7 }
 0x262   :  { %1038 = vmatprep.subr.bf16.mxu1 %v3862_v8 }
 0x2f7   :  { %v4452_v9 = vpop.f32.mrb[0].mxu1 }
 0x2f8   :  { %v494_v10 = vrot.slane %v4452_v9, 4  ;;  %v487_v11 = vpop.f32.mrb[1].mxu1 }
 0x2f9   :  { %v500_v12 = vrot.slane %v487_v11, 4  ;;  %v489_v13 = vpop.f32.mrb[2].mxu1 }
 0x2fa   :  { %v495_v14 = vadd.f32 %v494_v10, %v4452_v9  ;;  %v490_v15 = vpop.f32.mrb[3].mxu1  ;;  %v493_v13 = vld [vmem:[#allocation10] sm:$0x3] }
 0x2fb   :  { %v501_v16 = vadd.f32 %v500_v12, %v487_v11 }
 0x2fc   :  { %v496_v17 = vrot.slane %v495_v14, 2 }
 0x2fd   :  { %v502_v18 = vrot.slane %v501_v16, 2 }
 0x2fe   :  { %v497_v19 = vadd.f32 %v496_v17, %v495_v14 }
 0x2ff   :  { %v503_v20 = vadd.f32 %v502_v18, %v501_v16 }
 0x300   :  { %v498_v21 = vrot.slane %v497_v19, 1 }
 0x301   :  { %v504_v22 = vrot.slane %v503_v20, 1 }
 0x302   :  { %v499_v23 = vadd.f32 %v498_v21, %v497_v19 }
 0x303   :  { %v505_v24 = vadd.f32 %v504_v22, %v503_v20  ;;  %v4478_v22 = vpop.permute.xlu0 %606 }
 0x304   :  { %v506_v25 = vmul.f32 0.25, %v499_v23 }
 0x305   :  { %v507_v27 = vmul.f32 0.25, %v505_v24  ;;  %v3860_v24 = vld [vmem:[#allocation12 + $0x8] ss:$16 sps:$4 sm:$0xff]  }
 0x306   :  { %v508_v28 = vsub.f32 %v4452_v9, %v506_v25  ;;  %v524_v39 = vmul.f32 %v506_v25, %v506_v25 }
 0x307   :  { %v509_v29 = vsub.f32 %v487_v11, %v507_v27  ;;  %v525_v41 = vmul.f32 %v507_v27, %v507_v27 }
 0x308   :  { %v510_v30 = vmul.f32 %v508_v28, %v508_v28  ;;  %v526_v45 = vmul.f32 4.0, %v524_v39  ;;  %v3863_v28 = vld [vmem:[#allocation12 + $0x28] ss:$16 sps:$4 sm:$0xff]   ;;  %v3883_v39 = vld [vmem:[#allocation12 + $0xec] ss:$16 sps:$4 sm:$0xff]  }
 0x309   :  { %v511_v31 = vmul.f32 %v509_v29, %v509_v29  ;;  %v527_v47 = vmul.f32 4.0, %v525_v41  ;;  %v3868_v29 = vld [vmem:[#allocation12 + $0x4c] ss:$16 sps:$4 sm:$0xff]  }
 0x30a   :  { %v512_v32 = vrot.slane %v510_v30, 4  ;;  %v3886_v41 = vld [vmem:[#allocation12 + $0x10c] ss:$16 sps:$4 sm:$0xff]  }
 0x30b   :  { %v518_v33 = vrot.slane %v511_v31, 4 }
 0x30c   :  { %v513_v34 = vadd.f32 %v512_v32, %v510_v30  ;;  %v3866_v30 = vld [vmem:[#allocation12 + $0x48] ss:$16 sps:$4 sm:$0xff]  }
 0x30d   :  { %v519_v35 = vadd.f32 %v518_v33, %v511_v31  ;;  %v3871_v31 = vld [vmem:[#allocation12 + $0x6c] ss:$16 sps:$4 sm:$0xff]   ;;  %v3869_v32 = vld [vmem:[#allocation12 + $0x68] ss:$16 sps:$4 sm:$0xff]  }
 0x30e   :  { %v514_v36 = vrot.slane %v513_v34, 2  ;;  %v3874_v33 = vld [vmem:[#allocation12 + $0x8c] ss:$16 sps:$4 sm:$0xff]  }
 0x30f   :  { %v520_v37 = vrot.slane %v519_v35, 2 }
 0x310   :  { %v515_v38 = vadd.f32 %v514_v36, %v513_v34  ;;  %v3872_v34 = vld [vmem:[#allocation12 + $0x88] ss:$16 sps:$4 sm:$0xff]  }
 0x311   :  { %v521_v40 = vadd.f32 %v520_v37, %v519_v35  ;;  %v3877_v35 = vld [vmem:[#allocation12 + $0xac] ss:$16 sps:$4 sm:$0xff]   ;;  %v3875_v36 = vld [vmem:[#allocation12 + $0xa8] ss:$16 sps:$4 sm:$0xff]  }
 0x312   :  { %v516_v42 = vrot.slane %v515_v38, 1  ;;  %v3880_v37 = vld [vmem:[#allocation12 + $0xcc] ss:$16 sps:$4 sm:$0xff]  }
 0x313   :  { %v522_v43 = vrot.slane %v521_v40, 1 }
 0x314   :  { %v517_v44 = vadd.f32 %v516_v42, %v515_v38  ;;  %v3878_v38 = vld [vmem:[#allocation12 + $0xc8] ss:$16 sps:$4 sm:$0xff]  }
 0x315   :  { %v523_v46 = vadd.f32 %v522_v43, %v521_v40  ;;  %v3881_v40 = vld [vmem:[#allocation12 + $0xe8] ss:$16 sps:$4 sm:$0xff]   ;;  %v3889_v43 = vld [vmem:[#allocation12 + $0x12c] ss:$16 sps:$4 sm:$0xff]  }
 0x316   :  { %v528_v48 = vsub.f32 %v517_v44, %v526_v45  ;;  %v3884_v42 = vld [vmem:[#allocation12 + $0x108] ss:$16 sps:$4 sm:$0xff]   ;;  %v3892_v45 = vld [vmem:[#allocation12 + $0x14c] ss:$16 sps:$4 sm:$0xff]  }
 0x317   :  { %v529_v49 = vsub.f32 %v523_v46, %v527_v47  ;;  %v3887_v44 = vld [vmem:[#allocation12 + $0x128] ss:$16 sps:$4 sm:$0xff]   ;;  %v3895_v47 = vld [vmem:[#allocation12 + $0x16c] ss:$16 sps:$4 sm:$0xff]  }
 0x318   :  { %v530_v50 = vmul.f32 0.25, %v528_v48  ;;  %v3890_v46 = vld [vmem:[#allocation12 + $0x148] ss:$16 sps:$4 sm:$0xff]  }
 0x319   :  { %v531_v51 = vmul.f32 0.25, %v529_v49  ;;  %v3893_v48 = vld [vmem:[#allocation12 + $0x168] ss:$16 sps:$4 sm:$0xff]   ;;  %v3898_v49 = vld [vmem:[#allocation12 + $0x18c] ss:$16 sps:$4 sm:$0xff]  }
 0x31a   :  { %v532_v52 = vadd.f32 1e-05, %v530_v50  ;;  %v3896_v50 = vld [vmem:[#allocation12 + $0x188] ss:$16 sps:$4 sm:$0xff]  }
 0x31b   :  { %v533_v53 = vadd.f32 1e-05, %v531_v51  ;;  %v3901_v51 = vld [vmem:[#allocation12 + $0x1ac] ss:$16 sps:$4 sm:$0xff]  }
 0x31c   :  { %3908 = vrsqrt.f32 %v532_v52  ;;  %v3899_v52 = vld [vmem:[#allocation12 + $0x1a8] ss:$16 sps:$4 sm:$0xff]  }
 0x31d   :  { %3910 = vrsqrt.f32 %v533_v53  ;;  %v3904_v53 = vld [vmem:[#allocation12 + $0x1cc] ss:$16 sps:$4 sm:$0xff]  }
 0x326   :  { %v3909_v58 = vpop.eup %3908 }
 0x327   :  { %v3911_v60 = vpop.eup %3910 }
 0x328   :  { %v538_v61 = vcombine.low %v3909_v58, %v3911_v60 }
 0x32a   :  { %v545_v62 = vrot.slane %v538_v61, %v4461_v59 }
 0x32c   :  { %v552_v1 = vrot.slane %v545_v62, %v4461_v59 }
 0x32e   :  { %v554_v3 = vmul.f32 %v552_v1, %v492_v63 }
 0x330   :  { %v559_v26 = vrot.slane %v554_v3, %v4465_v0  ;;  %v563_v4 = vrot.slane %v554_v3, %v4469_v2 }
 0x332   :  { %v566_v5 = vmul.f32 %v559_v26, %v506_v25  ;;  %v567_v6 = vmul.f32 %v563_v4, %v507_v27  ;;  %v588_v7 = vmul.f32 %v563_v4, %v487_v11  ;;  %v587_v8 = vmul.f32 %v559_v26, %v4452_v9  ;;  %v3865_v27 = vld [vmem:[#allocation12 + $0x2c] ss:$16 sps:$4 sm:$0xff]  }
 0x334   :  { %v570_v10 = vcombine.low %v566_v5, %v567_v6 }
 0x336   :  { %v577_v12 = vrot.slane %v570_v10, %v4461_v59 }
 0x338   :  { %v584_v14 = vrot.slane %v577_v12, %v4461_v59 }
 0x33a   :  { %v586_v15 = vsub.f32 %v493_v13, %v584_v14 }
 0x33c   :  { %v597_v16 = vrot.slane %v586_v15, %v4469_v2  ;;  %v593_v17 = vrot.slane %v586_v15, %v4465_v0 }
 0x33e   :  { %v601_v18 = vadd.f32 %v597_v16, %v588_v7  ;;  %v600_v19 = vadd.f32 %v593_v17, %v587_v8 }
 0x340   :  { %v603_v20 = vmax.f32 %v601_v18, 0.0  ;;  %v602_v21 = vmax.f32 %v600_v19, 0.0 }
 0x342   :  { %v610_v11 = vmul.f32 %v4478_v22, %v603_v20  ;;  %v609_v9 = vmul.f32 %v4478_v22, %v602_v21 }
 0x344   :  { %v676_v23 = vpack.c.bf16 %v610_v11, %v610_v11  ;;  %v4482_v25 = vpack.c.bf16 %v609_v9, %v609_v9 }
 0x346   :  { %1029 = vmatprep.mubr.bf16.mxu1 %v676_v23 }
 0x347   :  { %1030 = vmatmul.mubr.bf16.vlgmr.msra.gmra.mrb[4].mxu1 %v4482_v25 }
 0x348   :  { %1039 = vmatpush1.bf16.msra.mxu1 %v3860_v24  ;;  %1070 = vmatprep.mubr.bf16.mxu1 %v676_v23 }
 0x349   :  { %1040 = vmatprep.subr.bf16.mxu1 %v3865_v27 }
 0x34c   :  { %1041 = vmatpush1.bf16.msra.mxu1 %v3863_v28 }
 0x34d   :  { %1042 = vmatprep.subr.bf16.mxu1 %v3868_v29 }
 0x350   :  { %1043 = vmatpush1.bf16.msra.mxu1 %v3866_v30 }
 0x351   :  { %1044 = vmatprep.subr.bf16.mxu1 %v3871_v31 }
 0x354   :  { %1045 = vmatpush1.bf16.msra.mxu1 %v3869_v32 }
 0x355   :  { %1046 = vmatprep.subr.bf16.mxu1 %v3874_v33 }
 0x358   :  { %1047 = vmatpush1.bf16.msra.mxu1 %v3872_v34 }
 0x359   :  { %1048 = vmatprep.subr.bf16.mxu1 %v3877_v35 }
 0x35c   :  { %1049 = vmatpush1.bf16.msra.mxu1 %v3875_v36 }
 0x35d   :  { %1050 = vmatprep.subr.bf16.mxu1 %v3880_v37 }
 0x360   :  { %1051 = vmatpush1.bf16.msra.mxu1 %v3878_v38 }
 0x361   :  { %1052 = vmatprep.subr.bf16.mxu1 %v3883_v39 }
 0x364   :  { %1053 = vmatpush1.bf16.msra.mxu1 %v3881_v40 }
 0x365   :  { %1054 = vmatprep.subr.bf16.mxu1 %v3886_v41 }
 0x368   :  { %1055 = vmatpush1.bf16.msra.mxu1 %v3884_v42 }
 0x369   :  { %1056 = vmatprep.subr.bf16.mxu1 %v3889_v43 }
 0x36c   :  { %1057 = vmatpush1.bf16.msra.mxu1 %v3887_v44 }
 0x36d   :  { %1058 = vmatprep.subr.bf16.mxu1 %v3892_v45 }
 0x370   :  { %1059 = vmatpush1.bf16.msra.mxu1 %v3890_v46 }
 0x371   :  { %1060 = vmatprep.subr.bf16.mxu1 %v3895_v47 }
 0x374   :  { %1061 = vmatpush1.bf16.msra.mxu1 %v3893_v48 }
 0x375   :  { %1062 = vmatprep.subr.bf16.mxu1 %v3898_v49 }
 0x378   :  { %1063 = vmatpush1.bf16.msra.mxu1 %v3896_v50 }
 0x379   :  { %1064 = vmatprep.subr.bf16.mxu1 %v3901_v51 }
 0x37c   :  { %1065 = vmatpush1.bf16.msra.mxu1 %v3899_v52 }
 0x37d   :  { %1066 = vmatprep.subr.bf16.mxu1 %v3904_v53 }
 0x380   :  { %1067 = vmatpush1.bf16.msra.mxu1 %v3902_v54 }
 0x381   :  { %1068 = vmatprep.subr.bf16.mxu1 %v3907_v55 }
 0x384   :  { %1069 = vmatpush1.bf16.msra.mxu1 %v3905_v56 }
 0x387   :  { %1071 = vmatmul.mubr.bf16.vlgmr.msra.gmra.mrb[8].mxu1 %v4482_v25 }
 0x41a   :  { %v4486_v58 = vpop.f32.mrb[4].mxu1 }
 0x41b   :  { %v1081_v60 = vrot.slane %v4486_v58, 4  ;;  %v4489_v61 = vpop.f32.mrb[5].mxu1 }
 0x41c   :  { %v1087_v62 = vrot.slane %v4489_v61, 4  ;;  %v1035_v63 = vpop.f32.mrb[6].mxu1 }
 0x41d   :  { %v1082_v1 = vadd.f32 %v1081_v60, %v4486_v58  ;;  %v1036_v3 = vpop.f32.mrb[7].mxu1 }
 0x41e   :  { %v1088_v26 = vadd.f32 %v1087_v62, %v4489_v61 }
 0x41f   :  { %v1083_v4 = vrot.slane %v1082_v1, 2 }
 0x420   :  { %v1089_v5 = vrot.slane %v1088_v26, 2 }
 0x421   :  { %v1084_v6 = vadd.f32 %v1083_v4, %v1082_v1 }
 0x422   :  { %v1090_v7 = vadd.f32 %v1089_v5, %v1088_v26 }
 0x423   :  { %v1085_v8 = vrot.slane %v1084_v6, 1 }
 0x424   :  { %v1091_v10 = vrot.slane %v1090_v7, 1 }
 0x425   :  { %v1086_v12 = vadd.f32 %v1085_v8, %v1084_v6 }
 0x426   :  { %v1092_v13 = vadd.f32 %v1091_v10, %v1090_v7 }
 0x427   :  { %v4494_v14 = vmul.f32 0.25, %v1086_v12 }
 0x428   :  { %v4496_v15 = vmul.f32 0.25, %v1092_v13 }
 0x429   :  { %v1109_v16 = vsub.f32 %v4486_v58, %v4494_v14  ;;  %v1141_v27 = vmul.f32 %v4494_v14, %v4494_v14 }
 0x42a   :  { %v1110_v17 = vsub.f32 %v4489_v61, %v4496_v15  ;;  %v1142_v29 = vmul.f32 %v4496_v15, %v4496_v15 }
 0x42b   :  { %v1113_v18 = vmul.f32 %v1109_v16, %v1109_v16  ;;  %v1145_v33 = vmul.f32 4.0, %v1141_v27 }
 0x42c   :  { %v1114_v19 = vmul.f32 %v1110_v17, %v1110_v17  ;;  %v1146_v35 = vmul.f32 4.0, %v1142_v29 }
 0x42d   :  { %v1117_v20 = vrot.slane %v1113_v18, 4 }
 0x42e   :  { %v1123_v21 = vrot.slane %v1114_v19, 4 }
 0x42f   :  { %v1118_v11 = vadd.f32 %v1117_v20, %v1113_v18 }
 0x430   :  { %v1124_v9 = vadd.f32 %v1123_v21, %v1114_v19 }
 0x431   :  { %v1119_v23 = vrot.slane %v1118_v11, 2 }
 0x432   :  { %v1125_v24 = vrot.slane %v1124_v9, 2 }
 0x433   :  { %v1120_v25 = vadd.f32 %v1119_v23, %v1118_v11 }
 0x434   :  { %v1126_v28 = vadd.f32 %v1125_v24, %v1124_v9 }
 0x435   :  { %v1121_v30 = vrot.slane %v1120_v25, 1 }
 0x436   :  { %v1127_v31 = vrot.slane %v1126_v28, 1 }
 0x437   :  { %v1122_v32 = vadd.f32 %v1121_v30, %v1120_v25 }
 0x438   :  { %v1128_v34 = vadd.f32 %v1127_v31, %v1126_v28 }
 0x439   :  { %v1149_v36 = vsub.f32 %v1122_v32, %v1145_v33 }
 0x43a   :  { %v1150_v37 = vsub.f32 %v1128_v34, %v1146_v35 }
 0x43b   :  { %v1153_v38 = vmul.f32 0.25, %v1149_v36 }
 0x43c   :  { %v1154_v39 = vmul.f32 0.25, %v1150_v37 }
 0x43d   :  { %v1157_v40 = vadd.f32 1e-05, %v1153_v38 }
 0x43e   :  { %v1158_v41 = vadd.f32 1e-05, %v1154_v39 }
 0x43f   :  { %3912 = vrsqrt.f32 %v1157_v40  ;;  %v1079_v40 = vld [vmem:[#allocation13] sm:$0xf] }
 0x440   :  { %3914 = vrsqrt.f32 %v1158_v41 }
 0x449   :  { %v3913_v42 = vpop.eup %3912 }
 0x44a   :  { %v3915_v43 = vpop.eup %3914 }
 0x44b   :  { %v1169_v44 = vcombine.low %v3913_v42, %v3915_v43  ;;  %v4520_v42 = vsub.s32 2, %v4458_v57  ;;  %v4523_v43 = vsub.s32 3, %v4458_v57 }
 0x44d   :  { %v1177_v37 = vrot.slane %v1169_v44, %v4461_v59 }
 0x45a   :  { %v4506_v45 = vpop.f32.mrb[8].mxu1 }
 0x45b   :  { %v1093_v46 = vrot.slane %v4506_v45, 4  ;;  %v4509_v47 = vpop.f32.mrb[9].mxu1 }
 0x45c   :  { %v1099_v48 = vrot.slane %v4509_v47, 4  ;;  %v1076_v49 = vpop.f32.mrb[10].mxu1 }
 0x45d   :  { %v1094_v50 = vadd.f32 %v1093_v46, %v4506_v45  ;;  %v1077_v51 = vpop.f32.mrb[11].mxu1 }
 0x45e   :  { %v1100_v52 = vadd.f32 %v1099_v48, %v4509_v47 }
 0x45f   :  { %v1095_v53 = vrot.slane %v1094_v50, 2 }
 0x460   :  { %v1101_v54 = vrot.slane %v1100_v52, 2 }
 0x461   :  { %v1096_v55 = vadd.f32 %v1095_v53, %v1094_v50 }
 0x462   :  { %v1102_v56 = vadd.f32 %v1101_v54, %v1100_v52 }
 0x463   :  { %v1097_v60 = vrot.slane %v1096_v55, 1 }
 0x464   :  { %v1103_v62 = vrot.slane %v1102_v56, 1 }
 0x465   :  { %v1098_v63 = vadd.f32 %v1097_v60, %v1096_v55 }
 0x466   :  { %v1104_v1 = vadd.f32 %v1103_v62, %v1102_v56 }
 0x467   :  { %v1107_v3 = vmul.f32 0.25, %v1098_v63 }
 0x468   :  { %v1108_v26 = vmul.f32 0.25, %v1104_v1 }
 0x469   :  { %v1111_v4 = vsub.f32 %v4506_v45, %v1107_v3  ;;  %v1143_v19 = vmul.f32 %v1107_v3, %v1107_v3 }
 0x46a   :  { %v1112_v5 = vsub.f32 %v4509_v47, %v1108_v26  ;;  %v1144_v21 = vmul.f32 %v1108_v26, %v1108_v26 }
 0x46b   :  { %v1115_v6 = vmul.f32 %v1111_v4, %v1111_v4  ;;  %v1147_v24 = vmul.f32 4.0, %v1143_v19 }
 0x46c   :  { %v1116_v7 = vmul.f32 %v1112_v5, %v1112_v5  ;;  %v1148_v27 = vmul.f32 4.0, %v1144_v21 }
 0x46d   :  { %v1129_v8 = vrot.slane %v1115_v6, 4 }
 0x46e   :  { %v1135_v10 = vrot.slane %v1116_v7, 4 }
 0x46f   :  { %v1130_v12 = vadd.f32 %v1129_v8, %v1115_v6 }
 0x470   :  { %v1136_v13 = vadd.f32 %v1135_v10, %v1116_v7 }
 0x471   :  { %v1131_v16 = vrot.slane %v1130_v12, 2 }
 0x472   :  { %v1137_v17 = vrot.slane %v1136_v13, 2 }
 0x473   :  { %v1132_v18 = vadd.f32 %v1131_v16, %v1130_v12 }
 0x474   :  { %v1138_v20 = vadd.f32 %v1137_v17, %v1136_v13 }
 0x475   :  { %v1133_v11 = vrot.slane %v1132_v18, 1 }
 0x476   :  { %v1139_v9 = vrot.slane %v1138_v20, 1 }
 0x477   :  { %v1134_v23 = vadd.f32 %v1133_v11, %v1132_v18 }
 0x478   :  { %v1140_v25 = vadd.f32 %v1139_v9, %v1138_v20 }
 0x479   :  { %v1151_v28 = vsub.f32 %v1134_v23, %v1147_v24 }
 0x47a   :  { %v1152_v29 = vsub.f32 %v1140_v25, %v1148_v27 }
 0x47b   :  { %v1155_v30 = vmul.f32 0.25, %v1151_v28 }
 0x47c   :  { %v1156_v31 = vmul.f32 0.25, %v1152_v29 }
 0x47d   :  { %v1159_v32 = vadd.f32 1e-05, %v1155_v30 }
 0x47e   :  { %v1160_v33 = vadd.f32 1e-05, %v1156_v31 }
 0x47f   :  { %3916 = vrsqrt.f32 %v1159_v32 }
 0x480   :  { %3918 = vrsqrt.f32 %v1160_v33 }
 0x489   :  { %v3917_v34 = vpop.eup %3916 }
 0x48a   :  { %v3919_v35 = vpop.eup %3918 }
 0x48b   :  { %v1170_v36 = vcombine.low %v3917_v34, %v3919_v35 }
 0x48d   :  { %v1184_v38 = vrot.slane %v1170_v36, %v4461_v59 }
 0x48f   :  { %v1185_v39 = vcombine.low %v1177_v37, %v1184_v38 }
 0x491   :  { %v1192_v41 = vrot.slane %v1185_v39, %v4461_v59 }
 0x493   :  { %v1194_v46 = vmul.f32 %v1192_v41, %v1079_v40 }
 0x495   :  { %v1199_v48 = vrot.slane %v1194_v46, %v4465_v0  ;;  %v1203_v49 = vrot.slane %v1194_v46, %v4469_v2  ;;  %v1207_v50 = vrot.slane %v1194_v46, %v4520_v42  ;;  %v1211_v44 = vrot.slane %v1194_v46, %v4523_v43 }
 0x497   :  { %v1216_v51 = vmul.f32 %v1199_v48, %v4494_v14  ;;  %v1217_v52 = vmul.f32 %v1203_v49, %v4496_v15  ;;  %v1218_v53 = vmul.f32 %v1207_v50, %v1107_v3  ;;  %v1219_v54 = vmul.f32 %v1211_v44, %v1108_v26  ;;  %v1080_v14 = vld [vmem:[#allocation15] sm:$0xf] }
 0x498   :  { %v1250_v55 = vmul.f32 %v1199_v48, %v4486_v58  ;;  %v1251_v56 = vmul.f32 %v1203_v49, %v4489_v61  ;;  %v1252_v60 = vmul.f32 %v1207_v50, %v4506_v45  ;;  %v1253_v62 = vmul.f32 %v1211_v44, %v4509_v47 }
 0x499   :  { %v1224_v63 = vcombine.low %v1216_v51, %v1217_v52  ;;  %v1225_v1 = vcombine.low %v1218_v53, %v1219_v54 }
 0x49b   :  { %v1232_v4 = vrot.slane %v1224_v63, %v4461_v59  ;;  %v1239_v5 = vrot.slane %v1225_v1, %v4461_v59 }
 0x49d   :  { %v1240_v6 = vcombine.low %v1232_v4, %v1239_v5 }
 0x49f   :  { %v1247_v15 = vrot.slane %v1240_v6, %v4461_v59 }
 0x4a1   :  { %v1249_v3 = vsub.f32 %v1080_v14, %v1247_v15 }
 0x4a3   :  { %v1258_v26 = vrot.slane %v1249_v3, %v4465_v0  ;;  %v1262_v58 = vrot.slane %v1249_v3, %v4469_v2  ;;  %v1266_v61 = vrot.slane %v1249_v3, %v4520_v42  ;;  %v1270_v45 = vrot.slane %v1249_v3, %v4523_v43 }
 0x4a5   :  { %v1275_v47 = vadd.f32 %v1258_v26, %v1250_v55  ;;  %v1276_v7 = vadd.f32 %v1262_v58, %v1251_v56  ;;  %v1277_v8 = vadd.f32 %v1266_v61, %v1252_v60  ;;  %v1278_v10 = vadd.f32 %v1270_v45, %v1253_v62 }
 0x4a7   :  { %v1279_v12 = vmax.f32 %v1275_v47, 0.0  ;;  %v1280_v13 = vmax.f32 %v1276_v7, 0.0  ;;  %v1281_v16 = vmax.f32 %v1277_v8, 0.0  ;;  %v1282_v17 = vmax.f32 %v1278_v10, 0.0 }
 0x4a9   :  { %v4543_v18 = vmul.f32 %v1279_v12, %v4478_v22  ;;  %v1284_v19 = vmul.f32 %v1280_v13, %v4478_v22  ;;  %v4547_v20 = vmul.f32 %v1281_v16, %v4478_v22  ;;  %v4550_v21 = vmul.f32 %v1282_v17, %v4478_v22 }
 0x4aa   :  { %4182 = dma.done.wait [#allocation4], 32768 }
 0x4ab   :  { %4183 = vsyncadd [#allocation4], 4294934528  ;;  %v4552_v11 = vpack.c.bf16 %v1284_v19, %v1284_v19  ;;  %v1292_v9 = vld [vmem:[#allocation2 + $0x8] sm:$0xff]  ;;  %v1294_v23 = vld [vmem:[#allocation2 + $0x18] sm:$0xff] }
 0x4ac   :  { %v1291_v24 = vld [vmem:[#allocation2] sm:$0xff]  ;;  %1551 = vmatprep.subr.bf16.mxu0 %v1292_v9  ;;  %1633 = vmatprep.subr.bf16.mxu1 %v1294_v23  ;;  %v1293_v25 = vld [vmem:[#allocation2 + $0x10] sm:$0xff]  ;;  %v1300_v27 = vld [vmem:[#allocation2 + $0x48] sm:$0xff] }
 0x4ad   :  { %1583 = vmatprep.mubr.bf16.mxu0 %v4552_v11  ;;  %1665 = vmatprep.mubr.bf16.mxu1 %v4552_v11  ;;  %v1302_v28 = vld [vmem:[#allocation2 + $0x58] sm:$0xff]  ;;  %v1299_v29 = vld [vmem:[#allocation2 + $0x40] sm:$0xff]  ;;  %v1301_v30 = vld [vmem:[#allocation2 + $0x50] sm:$0xff] }
 0x4ae   :  { %1552 = vmatpush1.bf16.msra.mxu0 %v1291_v24  ;;  %1634 = vmatpush1.bf16.msra.mxu1 %v1293_v25  ;;  %v1308_v31 = vld [vmem:[#allocation2 + $0x88] sm:$0xff]  ;;  %v1310_v32 = vld [vmem:[#allocation2 + $0x98] sm:$0xff]  ;;  %v1307_v33 = vld [vmem:[#allocation2 + $0x80] sm:$0xff] }
 0x4af   :  { %1553 = vmatprep.subr.bf16.mxu0 %v1300_v27  ;;  %1635 = vmatprep.subr.bf16.mxu1 %v1302_v28  ;;  %v1309_v34 = vld [vmem:[#allocation2 + $0x90] sm:$0xff]  ;;  %v1316_v35 = vld [vmem:[#allocation2 + $0xc8] sm:$0xff]  ;;  %v1318_v36 = vld [vmem:[#allocation2 + $0xd8] sm:$0xff] }
 0x4b0   :  { %v1315_v37 = vld [vmem:[#allocation2 + $0xc0] sm:$0xff]  ;;  %v1317_v38 = vld [vmem:[#allocation2 + $0xd0] sm:$0xff]  ;;  %v1324_v39 = vld [vmem:[#allocation2 + $0x108] sm:$0xff] }
 0x4b1   :  { %v1326_v40 = vld [vmem:[#allocation2 + $0x118] sm:$0xff]  ;;  %v1323_v41 = vld [vmem:[#allocation2 + $0x100] sm:$0xff]  ;;  %v1325_v46 = vld [vmem:[#allocation2 + $0x110] sm:$0xff] }
 0x4b2   :  { %1554 = vmatpush1.bf16.msra.mxu0 %v1299_v29  ;;  %1636 = vmatpush1.bf16.msra.mxu1 %v1301_v30  ;;  %v1332_v48 = vld [vmem:[#allocation2 + $0x148] sm:$0xff]  ;;  %v1334_v49 = vld [vmem:[#allocation2 + $0x158] sm:$0xff]  ;;  %v1331_v50 = vld [vmem:[#allocation2 + $0x140] sm:$0xff] }
 0x4b3   :  { %1555 = vmatprep.subr.bf16.mxu0 %v1308_v31  ;;  %1637 = vmatprep.subr.bf16.mxu1 %v1310_v32  ;;  %v1333_v44 = vld [vmem:[#allocation2 + $0x150] sm:$0xff]  ;;  %v1340_v51 = vld [vmem:[#allocation2 + $0x188] sm:$0xff]  ;;  %v1342_v52 = vld [vmem:[#allocation2 + $0x198] sm:$0xff] }
 0x4b4   :  { %v1339_v53 = vld [vmem:[#allocation2 + $0x180] sm:$0xff]  ;;  %v1341_v54 = vld [vmem:[#allocation2 + $0x190] sm:$0xff]  ;;  %v1348_v55 = vld [vmem:[#allocation2 + $0x1c8] sm:$0xff] }
 0x4b5   :  { %v1350_v56 = vld [vmem:[#allocation2 + $0x1d8] sm:$0xff]  ;;  %v1347_v60 = vld [vmem:[#allocation2 + $0x1c0] sm:$0xff]  ;;  %v1349_v62 = vld [vmem:[#allocation2 + $0x1d0] sm:$0xff] }
 0x4b6   :  { %1556 = vmatpush1.bf16.msra.mxu0 %v1307_v33  ;;  %1638 = vmatpush1.bf16.msra.mxu1 %v1309_v34  ;;  %v1356_v63 = vld [vmem:[#allocation2 + $0x208] sm:$0xff]  ;;  %v1358_v1 = vld [vmem:[#allocation2 + $0x218] sm:$0xff]  ;;  %v1355_v4 = vld [vmem:[#allocation2 + $0x200] sm:$0xff] }
 0x4b7   :  { %1557 = vmatprep.subr.bf16.mxu0 %v1316_v35  ;;  %1639 = vmatprep.subr.bf16.mxu1 %v1318_v36  ;;  %v1357_v5 = vld [vmem:[#allocation2 + $0x210] sm:$0xff]  ;;  %v1364_v6 = vld [vmem:[#allocation2 + $0x248] sm:$0xff]  ;;  %v1366_v14 = vld [vmem:[#allocation2 + $0x258] sm:$0xff]  ;;  %v4558_v36 = vpack.c.bf16 %v4543_v18, %v4543_v18 }
 0x4b8   :  { %v1363_v15 = vld [vmem:[#allocation2 + $0x240] sm:$0xff]  ;;  %v1365_v3 = vld [vmem:[#allocation2 + $0x250] sm:$0xff]  ;;  %v1372_v26 = vld [vmem:[#allocation2 + $0x288] sm:$0xff] }
 0x4b9   :  { %v1374_v58 = vld [vmem:[#allocation2 + $0x298] sm:$0xff]  ;;  %v1371_v61 = vld [vmem:[#allocation2 + $0x280] sm:$0xff]  ;;  %v1373_v45 = vld [vmem:[#allocation2 + $0x290] sm:$0xff] }
 0x4ba   :  { %1558 = vmatpush1.bf16.msra.mxu0 %v1315_v37  ;;  %1640 = vmatpush1.bf16.msra.mxu1 %v1317_v38  ;;  %v1380_v47 = vld [vmem:[#allocation2 + $0x2c8] sm:$0xff]  ;;  %v1382_v7 = vld [vmem:[#allocation2 + $0x2d8] sm:$0xff]  ;;  %v1379_v8 = vld [vmem:[#allocation2 + $0x2c0] sm:$0xff] }
 0x4bb   :  { %1559 = vmatprep.subr.bf16.mxu0 %v1324_v39  ;;  %1641 = vmatprep.subr.bf16.mxu1 %v1326_v40  ;;  %v1381_v10 = vld [vmem:[#allocation2 + $0x2d0] sm:$0xff]  ;;  %v1388_v12 = vld [vmem:[#allocation2 + $0x308] sm:$0xff]  ;;  %v1390_v13 = vld [vmem:[#allocation2 + $0x318] sm:$0xff] }
 0x4bc   :  { %v1387_v16 = vld [vmem:[#allocation2 + $0x300] sm:$0xff]  ;;  %v1389_v17 = vld [vmem:[#allocation2 + $0x310] sm:$0xff]  ;;  %v1396_v19 = vld [vmem:[#allocation2 + $0x348] sm:$0xff] }
 0x4bd   :  { %v1398_v9 = vld [vmem:[#allocation2 + $0x358] sm:$0xff]  ;;  %v1395_v23 = vld [vmem:[#allocation2 + $0x340] sm:$0xff]  ;;  %v1397_v24 = vld [vmem:[#allocation2 + $0x350] sm:$0xff] }
 0x4be   :  { %1560 = vmatpush1.bf16.msra.mxu0 %v1323_v41  ;;  %1642 = vmatpush1.bf16.msra.mxu1 %v1325_v46  ;;  %v1404_v25 = vld [vmem:[#allocation2 + $0x388] sm:$0xff]  ;;  %v1406_v27 = vld [vmem:[#allocation2 + $0x398] sm:$0xff]  ;;  %v1403_v28 = vld [vmem:[#allocation2 + $0x380] sm:$0xff]  ;;  %v4562_v41 = vpack.c.bf16 %v4550_v21, %v4550_v21 }
 0x4bf   :  { %1561 = vmatprep.subr.bf16.mxu0 %v1332_v48  ;;  %1643 = vmatprep.subr.bf16.mxu1 %v1334_v49  ;;  %v1405_v29 = vld [vmem:[#allocation2 + $0x390] sm:$0xff]  ;;  %v1412_v30 = vld [vmem:[#allocation2 + $0x3c8] sm:$0xff]  ;;  %v1414_v31 = vld [vmem:[#allocation2 + $0x3d8] sm:$0xff] }
 0x4c0   :  { %v1411_v32 = vld [vmem:[#allocation2 + $0x3c0] sm:$0xff]  ;;  %v1413_v33 = vld [vmem:[#allocation2 + $0x3d0] sm:$0xff]  ;;  %v1420_v34 = vld [vmem:[#allocation2 + $0x408] sm:$0xff] }
 0x4c1   :  { %v1422_v35 = vld [vmem:[#allocation2 + $0x418] sm:$0xff]  ;;  %v1419_v37 = vld [vmem:[#allocation2 + $0x400] sm:$0xff]  ;;  %v1421_v38 = vld [vmem:[#allocation2 + $0x410] sm:$0xff] }
 0x4c2   :  { %1562 = vmatpush1.bf16.msra.mxu0 %v1331_v50  ;;  %1644 = vmatpush1.bf16.msra.mxu1 %v1333_v44  ;;  %v1428_v39 = vld [vmem:[#allocation2 + $0x448] sm:$0xff]  ;;  %v1430_v40 = vld [vmem:[#allocation2 + $0x458] sm:$0xff]  ;;  %v1427_v18 = vld [vmem:[#allocation2 + $0x440] sm:$0xff] }
 0x4c3   :  { %1563 = vmatprep.subr.bf16.mxu0 %v1340_v51  ;;  %1645 = vmatprep.subr.bf16.mxu1 %v1342_v52  ;;  %v1429_v46 = vld [vmem:[#allocation2 + $0x450] sm:$0xff]  ;;  %v1436_v48 = vld [vmem:[#allocation2 + $0x488] sm:$0xff]  ;;  %v1438_v49 = vld [vmem:[#allocation2 + $0x498] sm:$0xff] }
 0x4c4   :  { %v1435_v21 = vld [vmem:[#allocation2 + $0x480] sm:$0xff]  ;;  %v1437_v50 = vld [vmem:[#allocation2 + $0x490] sm:$0xff]  ;;  %v1444_v44 = vld [vmem:[#allocation2 + $0x4c8] sm:$0xff] }
 0x4c5   :  { %v1446_v51 = vld [vmem:[#allocation2 + $0x4d8] sm:$0xff]  ;;  %v1443_v52 = vld [vmem:[#allocation2 + $0x4c0] sm:$0xff] }
 0x4c6   :  { %1564 = vmatpush1.bf16.msra.mxu0 %v1339_v53  ;;  %1646 = vmatpush1.bf16.msra.mxu1 %v1341_v54  ;;  %v1445_v53 = vld [vmem:[#allocation2 + $0x4d0] sm:$0xff]  ;;  %v1452_v54 = vld [vmem:[#allocation2 + $0x508] sm:$0xff] }
 0x4c7   :  { %1565 = vmatprep.subr.bf16.mxu0 %v1348_v55  ;;  %1647 = vmatprep.subr.bf16.mxu1 %v1350_v56  ;;  %v1454_v55 = vld [vmem:[#allocation2 + $0x518] sm:$0xff]  ;;  %v1451_v56 = vld [vmem:[#allocation2 + $0x500] sm:$0xff] }
 0x4ca   :  { %1566 = vmatpush1.bf16.msra.mxu0 %v1347_v60  ;;  %1648 = vmatpush1.bf16.msra.mxu1 %v1349_v62  ;;  %v1453_v60 = vld [vmem:[#allocation2 + $0x510] sm:$0xff]  ;;  %v1460_v62 = vld [vmem:[#allocation2 + $0x548] sm:$0xff] }
 0x4cb   :  { %1567 = vmatprep.subr.bf16.mxu0 %v1356_v63  ;;  %1649 = vmatprep.subr.bf16.mxu1 %v1358_v1  ;;  %v1462_v63 = vld [vmem:[#allocation2 + $0x558] sm:$0xff]  ;;  %v1459_v1 = vld [vmem:[#allocation2 + $0x540] sm:$0xff] }
 0x4ce   :  { %1568 = vmatpush1.bf16.msra.mxu0 %v1355_v4  ;;  %1650 = vmatpush1.bf16.msra.mxu1 %v1357_v5  ;;  %v1461_v4 = vld [vmem:[#allocation2 + $0x550] sm:$0xff]  ;;  %v1468_v5 = vld [vmem:[#allocation2 + $0x588] sm:$0xff] }
 0x4cf   :  { %1569 = vmatprep.subr.bf16.mxu0 %v1364_v6  ;;  %1651 = vmatprep.subr.bf16.mxu1 %v1366_v14  ;;  %v1470_v6 = vld [vmem:[#allocation2 + $0x598] sm:$0xff]  ;;  %v1467_v14 = vld [vmem:[#allocation2 + $0x580] sm:$0xff] }
 0x4d2   :  { %1570 = vmatpush1.bf16.msra.mxu0 %v1363_v15  ;;  %1652 = vmatpush1.bf16.msra.mxu1 %v1365_v3  ;;  %v1469_v15 = vld [vmem:[#allocation2 + $0x590] sm:$0xff]  ;;  %v1476_v3 = vld [vmem:[#allocation2 + $0x5c8] sm:$0xff] }
 0x4d3   :  { %1571 = vmatprep.subr.bf16.mxu0 %v1372_v26  ;;  %1653 = vmatprep.subr.bf16.mxu1 %v1374_v58  ;;  %v1478_v26 = vld [vmem:[#allocation2 + $0x5d8] sm:$0xff]  ;;  %v1475_v58 = vld [vmem:[#allocation2 + $0x5c0] sm:$0xff] }
 0x4d6   :  { %1572 = vmatpush1.bf16.msra.mxu0 %v1371_v61  ;;  %1654 = vmatpush1.bf16.msra.mxu1 %v1373_v45  ;;  %v1477_v61 = vld [vmem:[#allocation2 + $0x5d0] sm:$0xff]  ;;  %v1484_v45 = vld [vmem:[#allocation2 + $0x608] sm:$0xff] }
 0x4d7   :  { %1573 = vmatprep.subr.bf16.mxu0 %v1380_v47  ;;  %1655 = vmatprep.subr.bf16.mxu1 %v1382_v7  ;;  %v1486_v47 = vld [vmem:[#allocation2 + $0x618] sm:$0xff]  ;;  %v1483_v7 = vld [vmem:[#allocation2 + $0x600] sm:$0xff] }
 0x4da   :  { %1574 = vmatpush1.bf16.msra.mxu0 %v1379_v8  ;;  %1656 = vmatpush1.bf16.msra.mxu1 %v1381_v10  ;;  %v1485_v8 = vld [vmem:[#allocation2 + $0x610] sm:$0xff]  ;;  %v1492_v10 = vld [vmem:[#allocation2 + $0x648] sm:$0xff] }
 0x4db   :  { %1575 = vmatprep.subr.bf16.mxu0 %v1388_v12  ;;  %1657 = vmatprep.subr.bf16.mxu1 %v1390_v13  ;;  %v1494_v12 = vld [vmem:[#allocation2 + $0x658] sm:$0xff]  ;;  %v1491_v13 = vld [vmem:[#allocation2 + $0x640] sm:$0xff] }
 0x4de   :  { %1576 = vmatpush1.bf16.msra.mxu0 %v1387_v16  ;;  %1658 = vmatpush1.bf16.msra.mxu1 %v1389_v17  ;;  %v1493_v16 = vld [vmem:[#allocation2 + $0x650] sm:$0xff]  ;;  %v1500_v17 = vld [vmem:[#allocation2 + $0x688] sm:$0xff] }
 0x4df   :  { %1577 = vmatprep.subr.bf16.mxu0 %v1396_v19  ;;  %1659 = vmatprep.subr.bf16.mxu1 %v1398_v9  ;;  %v1502_v19 = vld [vmem:[#allocation2 + $0x698] sm:$0xff]  ;;  %v1499_v9 = vld [vmem:[#allocation2 + $0x680] sm:$0xff] }
 0x4e2   :  { %1578 = vmatpush1.bf16.msra.mxu0 %v1395_v23  ;;  %1660 = vmatpush1.bf16.msra.mxu1 %v1397_v24  ;;  %v1501_v23 = vld [vmem:[#allocation2 + $0x690] sm:$0xff]  ;;  %v1508_v24 = vld [vmem:[#allocation2 + $0x6c8] sm:$0xff] }
 0x4e3   :  { %1579 = vmatprep.subr.bf16.mxu0 %v1404_v25  ;;  %1661 = vmatprep.subr.bf16.mxu1 %v1406_v27  ;;  %v1510_v25 = vld [vmem:[#allocation2 + $0x6d8] sm:$0xff]  ;;  %v1507_v27 = vld [vmem:[#allocation2 + $0x6c0] sm:$0xff] }
 0x4e6   :  { %1580 = vmatpush1.bf16.msra.mxu0 %v1403_v28  ;;  %1662 = vmatpush1.bf16.msra.mxu1 %v1405_v29  ;;  %v1509_v28 = vld [vmem:[#allocation2 + $0x6d0] sm:$0xff]  ;;  %v1516_v29 = vld [vmem:[#allocation2 + $0x708] sm:$0xff] }
 0x4e7   :  { %1581 = vmatprep.subr.bf16.mxu0 %v1412_v30  ;;  %1663 = vmatprep.subr.bf16.mxu1 %v1414_v31  ;;  %v1518_v30 = vld [vmem:[#allocation2 + $0x718] sm:$0xff]  ;;  %v1515_v31 = vld [vmem:[#allocation2 + $0x700] sm:$0xff] }
 0x4ea   :  { %1582 = vmatpush1.bf16.msra.mxu0 %v1411_v32  ;;  %1664 = vmatpush1.bf16.msra.mxu1 %v1413_v33  ;;  %v1517_v32 = vld [vmem:[#allocation2 + $0x710] sm:$0xff]  ;;  %v1524_v33 = vld [vmem:[#allocation2 + $0x748] sm:$0xff] }
 0x4eb   :  { %1592 = vmatprep.subr.bf16.mxu0 %v1420_v34  ;;  %1674 = vmatprep.subr.bf16.mxu1 %v1422_v35  ;;  %v1526_v34 = vld [vmem:[#allocation2 + $0x758] sm:$0xff]  ;;  %v1523_v35 = vld [vmem:[#allocation2 + $0x740] sm:$0xff] }
 0x4ed   :  { %1584 = vmatmul.mubr.bf16.vlgmr.msra.gmra.mrb[4].mxu0 %v4558_v36  ;;  %1666 = vmatmul.mubr.bf16.vlgmr.msra.gmra.mrb[12].mxu1 %v4558_v36 }
 0x4ee   :  { %1593 = vmatpush1.bf16.msra.mxu0 %v1419_v37  ;;  %1675 = vmatpush1.bf16.msra.mxu1 %v1421_v38  ;;  %v1525_v37 = vld [vmem:[#allocation2 + $0x750] sm:$0xff]  ;;  %v1532_v38 = vld [vmem:[#allocation2 + $0x788] sm:$0xff] }
 0x4ef   :  { %1594 = vmatprep.subr.bf16.mxu0 %v1428_v39  ;;  %1676 = vmatprep.subr.bf16.mxu1 %v1430_v40  ;;  %v1534_v39 = vld [vmem:[#allocation2 + $0x798] sm:$0xff]  ;;  %v1531_v40 = vld [vmem:[#allocation2 + $0x780] sm:$0xff] }
 0x4f0   :  { %1624 = vmatprep.mubr.bf16.mxu0 %v4562_v41  ;;  %1706 = vmatprep.mubr.bf16.mxu1 %v4562_v41 }
 0x4f2   :  { %1595 = vmatpush1.bf16.msra.mxu0 %v1427_v18  ;;  %1677 = vmatpush1.bf16.msra.mxu1 %v1429_v46  ;;  %v1533_v18 = vld [vmem:[#allocation2 + $0x790] sm:$0xff]  ;;  %v1540_v46 = vld [vmem:[#allocation2 + $0x7c8] sm:$0xff] }
 0x4f3   :  { %1596 = vmatprep.subr.bf16.mxu0 %v1436_v48  ;;  %1678 = vmatprep.subr.bf16.mxu1 %v1438_v49  ;;  %v1542_v48 = vld [vmem:[#allocation2 + $0x7d8] sm:$0xff]  ;;  %v1539_v49 = vld [vmem:[#allocation2 + $0x7c0] sm:$0xff] }
 0x4f6   :  { %1597 = vmatpush1.bf16.msra.mxu0 %v1435_v21  ;;  %1679 = vmatpush1.bf16.msra.mxu1 %v1437_v50  ;;  %v1541_v21 = vld [vmem:[#allocation2 + $0x7d0] sm:$0xff]  ;;  %v1296_v50 = vld [vmem:[#allocation2 + $0x28] sm:$0xff] }
 0x4f7   :  { %1598 = vmatprep.subr.bf16.mxu0 %v1444_v44  ;;  %1680 = vmatprep.subr.bf16.mxu1 %v1446_v51  ;;  %v1298_v44 = vld [vmem:[#allocation2 + $0x38] sm:$0xff]  ;;  %v4570_v51 = vpack.c.bf16 %v4547_v20, %v4547_v20  ;;  %v1312_v20 = vld [vmem:[#allocation2 + $0xa8] sm:$0xff] }
 0x4fa   :  { %1599 = vmatpush1.bf16.msra.mxu0 %v1443_v52  ;;  %1681 = vmatpush1.bf16.msra.mxu1 %v1445_v53  ;;  %v1295_v52 = vld [vmem:[#allocation2 + $0x20] sm:$0xff]  ;;  %v1297_v53 = vld [vmem:[#allocation2 + $0x30] sm:$0xff] }
 0x4fb   :  { %1600 = vmatprep.subr.bf16.mxu0 %v1452_v54  ;;  %1682 = vmatprep.subr.bf16.mxu1 %v1454_v55  ;;  %v1304_v54 = vld [vmem:[#allocation2 + $0x68] sm:$0xff]  ;;  %v1306_v55 = vld [vmem:[#allocation2 + $0x78] sm:$0xff] }
 0x4fe   :  { %1601 = vmatpush1.bf16.msra.mxu0 %v1451_v56  ;;  %1683 = vmatpush1.bf16.msra.mxu1 %v1453_v60  ;;  %v1303_v56 = vld [vmem:[#allocation2 + $0x60] sm:$0xff]  ;;  %v1305_v60 = vld [vmem:[#allocation2 + $0x70] sm:$0xff] }
 0x4ff   :  { %1602 = vmatprep.subr.bf16.mxu0 %v1460_v62  ;;  %1684 = vmatprep.subr.bf16.mxu1 %v1462_v63  ;;  %v1314_v62 = vld [vmem:[#allocation2 + $0xb8] sm:$0xff]  ;;  %v1311_v63 = vld [vmem:[#allocation2 + $0xa0] sm:$0xff] }
 0x502   :  { %1603 = vmatpush1.bf16.msra.mxu0 %v1459_v1  ;;  %1685 = vmatpush1.bf16.msra.mxu1 %v1461_v4  ;;  %v1313_v1 = vld [vmem:[#allocation2 + $0xb0] sm:$0xff]  ;;  %v1320_v4 = vld [vmem:[#allocation2 + $0xe8] sm:$0xff] }
 0x503   :  { %1604 = vmatprep.subr.bf16.mxu0 %v1468_v5  ;;  %1686 = vmatprep.subr.bf16.mxu1 %v1470_v6  ;;  %v1322_v5 = vld [vmem:[#allocation2 + $0xf8] sm:$0xff]  ;;  %v1319_v6 = vld [vmem:[#allocation2 + $0xe0] sm:$0xff] }
 0x506   :  { %1605 = vmatpush1.bf16.msra.mxu0 %v1467_v14  ;;  %1687 = vmatpush1.bf16.msra.mxu1 %v1469_v15  ;;  %v1321_v14 = vld [vmem:[#allocation2 + $0xf0] sm:$0xff]  ;;  %v1328_v15 = vld [vmem:[#allocation2 + $0x128] sm:$0xff] }
 0x507   :  { %1606 = vmatprep.subr.bf16.mxu0 %v1476_v3  ;;  %1688 = vmatprep.subr.bf16.mxu1 %v1478_v26  ;;  %v1330_v3 = vld [vmem:[#allocation2 + $0x138] sm:$0xff]  ;;  %v1329_v26 = vld [vmem:[#allocation2 + $0x130] sm:$0xff] }
 0x50a   :  { %1607 = vmatpush1.bf16.msra.mxu0 %v1475_v58  ;;  %1689 = vmatpush1.bf16.msra.mxu1 %v1477_v61  ;;  %v1336_v58 = vld [vmem:[#allocation2 + $0x168] sm:$0xff]  ;;  %v1338_v61 = vld [vmem:[#allocation2 + $0x178] sm:$0xff] }
 0x50b   :  { %1608 = vmatprep.subr.bf16.mxu0 %v1484_v45  ;;  %1690 = vmatprep.subr.bf16.mxu1 %v1486_v47  ;;  %v1335_v45 = vld [vmem:[#allocation2 + $0x160] sm:$0xff]  ;;  %v1337_v47 = vld [vmem:[#allocation2 + $0x170] sm:$0xff] }
 0x50e   :  { %1609 = vmatpush1.bf16.msra.mxu0 %v1483_v7  ;;  %1691 = vmatpush1.bf16.msra.mxu1 %v1485_v8  ;;  %v1344_v7 = vld [vmem:[#allocation2 + $0x1a8] sm:$0xff]  ;;  %v1346_v8 = vld [vmem:[#allocation2 + $0x1b8] sm:$0xff] }
 0x50f   :  { %1610 = vmatprep.subr.bf16.mxu0 %v1492_v10  ;;  %1692 = vmatprep.subr.bf16.mxu1 %v1494_v12  ;;  %v1343_v10 = vld [vmem:[#allocation2 + $0x1a0] sm:$0xff]  ;;  %v1345_v12 = vld [vmem:[#allocation2 + $0x1b0] sm:$0xff] }
 0x512   :  { %1611 = vmatpush1.bf16.msra.mxu0 %v1491_v13  ;;  %1693 = vmatpush1.bf16.msra.mxu1 %v1493_v16  ;;  %v1352_v13 = vld [vmem:[#allocation2 + $0x1e8] sm:$0xff]  ;;  %v1354_v16 = vld [vmem:[#allocation2 + $0x1f8] sm:$0xff] }
 0x513   :  { %1612 = vmatprep.subr.bf16.mxu0 %v1500_v17  ;;  %1694 = vmatprep.subr.bf16.mxu1 %v1502_v19  ;;  %v1351_v17 = vld [vmem:[#allocation2 + $0x1e0] sm:$0xff]  ;;  %v1353_v19 = vld [vmem:[#allocation2 + $0x1f0] sm:$0xff] }
 0x516   :  { %1613 = vmatpush1.bf16.msra.mxu0 %v1499_v9  ;;  %1695 = vmatpush1.bf16.msra.mxu1 %v1501_v23  ;;  %v1360_v9 = vld [vmem:[#allocation2 + $0x228] sm:$0xff]  ;;  %v1362_v23 = vld [vmem:[#allocation2 + $0x238] sm:$0xff] }
 0x517   :  { %1614 = vmatprep.subr.bf16.mxu0 %v1508_v24  ;;  %1696 = vmatprep.subr.bf16.mxu1 %v1510_v25  ;;  %v1359_v24 = vld [vmem:[#allocation2 + $0x220] sm:$0xff]  ;;  %v1361_v25 = vld [vmem:[#allocation2 + $0x230] sm:$0xff] }
 0x51a   :  { %1615 = vmatpush1.bf16.msra.mxu0 %v1507_v27  ;;  %1697 = vmatpush1.bf16.msra.mxu1 %v1509_v28  ;;  %v1368_v27 = vld [vmem:[#allocation2 + $0x268] sm:$0xff]  ;;  %v1370_v28 = vld [vmem:[#allocation2 + $0x278] sm:$0xff] }
 0x51b   :  { %1616 = vmatprep.subr.bf16.mxu0 %v1516_v29  ;;  %1698 = vmatprep.subr.bf16.mxu1 %v1518_v30  ;;  %v1367_v29 = vld [vmem:[#allocation2 + $0x260] sm:$0xff]  ;;  %v1369_v30 = vld [vmem:[#allocation2 + $0x270] sm:$0xff] }
 0x51e   :  { %1617 = vmatpush1.bf16.msra.mxu0 %v1515_v31  ;;  %1699 = vmatpush1.bf16.msra.mxu1 %v1517_v32  ;;  %v1376_v31 = vld [vmem:[#allocation2 + $0x2a8] sm:$0xff]  ;;  %v1378_v32 = vld [vmem:[#allocation2 + $0x2b8] sm:$0xff] }
 0x51f   :  { %1618 = vmatprep.subr.bf16.mxu0 %v1524_v33  ;;  %1700 = vmatprep.subr.bf16.mxu1 %v1526_v34  ;;  %v1375_v33 = vld [vmem:[#allocation2 + $0x2a0] sm:$0xff]  ;;  %v1377_v34 = vld [vmem:[#allocation2 + $0x2b0] sm:$0xff] }
 0x522   :  { %1619 = vmatpush1.bf16.msra.mxu0 %v1523_v35  ;;  %1701 = vmatpush1.bf16.msra.mxu1 %v1525_v37  ;;  %v1384_v35 = vld [vmem:[#allocation2 + $0x2e8] sm:$0xff]  ;;  %v1386_v37 = vld [vmem:[#allocation2 + $0x2f8] sm:$0xff] }
 0x523   :  { %1620 = vmatprep.subr.bf16.mxu0 %v1532_v38  ;;  %1702 = vmatprep.subr.bf16.mxu1 %v1534_v39  ;;  %v1383_v38 = vld [vmem:[#allocation2 + $0x2e0] sm:$0xff]  ;;  %v1385_v39 = vld [vmem:[#allocation2 + $0x2f0] sm:$0xff] }
 0x526   :  { %1621 = vmatpush1.bf16.msra.mxu0 %v1531_v40  ;;  %1703 = vmatpush1.bf16.msra.mxu1 %v1533_v18  ;;  %v1392_v40 = vld [vmem:[#allocation2 + $0x328] sm:$0xff]  ;;  %v1394_v18 = vld [vmem:[#allocation2 + $0x338] sm:$0xff] }
 0x527   :  { %1622 = vmatprep.subr.bf16.mxu0 %v1540_v46  ;;  %1704 = vmatprep.subr.bf16.mxu1 %v1542_v48  ;;  %v1391_v46 = vld [vmem:[#allocation2 + $0x320] sm:$0xff]  ;;  %v1393_v48 = vld [vmem:[#allocation2 + $0x330] sm:$0xff] }
 0x52a   :  { %1623 = vmatpush1.bf16.msra.mxu0 %v1539_v49  ;;  %1705 = vmatpush1.bf16.msra.mxu1 %v1541_v21  ;;  %v1400_v49 = vld [vmem:[#allocation2 + $0x368] sm:$0xff]  ;;  %v1402_v21 = vld [vmem:[#allocation2 + $0x378] sm:$0xff] }
 0x52b   :  { %1715 = vmatprep.subr.bf16.mxu0 %v1296_v50  ;;  %1797 = vmatprep.subr.bf16.mxu1 %v1298_v44  ;;  %v1399_v50 = vld [vmem:[#allocation2 + $0x360] sm:$0xff]  ;;  %v1401_v44 = vld [vmem:[#allocation2 + $0x370] sm:$0xff] }
 0x52d   :  { %1625 = vmatmul.mubr.bf16.vlgmr.msra.gmra.mrb[4].mxu0 %v4570_v51  ;;  %1707 = vmatmul.mubr.bf16.vlgmr.msra.gmra.mrb[12].mxu1 %v4570_v51 }
 0x52e   :  { %1716 = vmatpush1.bf16.msra.mxu0 %v1295_v52  ;;  %1798 = vmatpush1.bf16.msra.mxu1 %v1297_v53  ;;  %v1408_v52 = vld [vmem:[#allocation2 + $0x3a8] sm:$0xff]  ;;  %v1410_v53 = vld [vmem:[#allocation2 + $0x3b8] sm:$0xff] }
 0x52f   :  { %1717 = vmatprep.subr.bf16.mxu0 %v1304_v54  ;;  %1799 = vmatprep.subr.bf16.mxu1 %v1306_v55  ;;  %v1407_v54 = vld [vmem:[#allocation2 + $0x3a0] sm:$0xff]  ;;  %v1409_v55 = vld [vmem:[#allocation2 + $0x3b0] sm:$0xff] }
 0x530   :  { %1747 = vmatprep.mubr.bf16.mxu0 %v4552_v11  ;;  %1829 = vmatprep.mubr.bf16.mxu1 %v4552_v11  ;;  %v1327_v11 = vld [vmem:[#allocation2 + $0x120] sm:$0xff] }
 0x532   :  { %1718 = vmatpush1.bf16.msra.mxu0 %v1303_v56  ;;  %1800 = vmatpush1.bf16.msra.mxu1 %v1305_v60  ;;  %v1416_v56 = vld [vmem:[#allocation2 + $0x3e8] sm:$0xff]  ;;  %v1418_v60 = vld [vmem:[#allocation2 + $0x3f8] sm:$0xff] }
 0x533   :  { %1719 = vmatprep.subr.bf16.mxu0 %v1312_v20  ;;  %1801 = vmatprep.subr.bf16.mxu1 %v1314_v62  ;;  %v1415_v20 = vld [vmem:[#allocation2 + $0x3e0] sm:$0xff]  ;;  %v1417_v62 = vld [vmem:[#allocation2 + $0x3f0] sm:$0xff] }
 0x536   :  { %1720 = vmatpush1.bf16.msra.mxu0 %v1311_v63  ;;  %1802 = vmatpush1.bf16.msra.mxu1 %v1313_v1  ;;  %v1424_v63 = vld [vmem:[#allocation2 + $0x428] sm:$0xff]  ;;  %v1426_v1 = vld [vmem:[#allocation2 + $0x438] sm:$0xff] }
 0x537   :  { %1721 = vmatprep.subr.bf16.mxu0 %v1320_v4  ;;  %1803 = vmatprep.subr.bf16.mxu1 %v1322_v5  ;;  %v1423_v4 = vld [vmem:[#allocation2 + $0x420] sm:$0xff]  ;;  %v1425_v5 = vld [vmem:[#allocation2 + $0x430] sm:$0xff] }
 0x53a   :  { %1722 = vmatpush1.bf16.msra.mxu0 %v1319_v6  ;;  %1804 = vmatpush1.bf16.msra.mxu1 %v1321_v14  ;;  %v1432_v6 = vld [vmem:[#allocation2 + $0x468] sm:$0xff]  ;;  %v1434_v14 = vld [vmem:[#allocation2 + $0x478] sm:$0xff] }
 0x53b   :  { %1723 = vmatprep.subr.bf16.mxu0 %v1328_v15  ;;  %1805 = vmatprep.subr.bf16.mxu1 %v1330_v3  ;;  %v1431_v15 = vld [vmem:[#allocation2 + $0x460] sm:$0xff]  ;;  %v1433_v3 = vld [vmem:[#allocation2 + $0x470] sm:$0xff] }
 0x53e   :  { %1724 = vmatpush1.bf16.msra.mxu0 %v1327_v11  ;;  %1806 = vmatpush1.bf16.msra.mxu1 %v1329_v26  ;;  %v1440_v11 = vld [vmem:[#allocation2 + $0x4a8] sm:$0xff]  ;;  %v1442_v26 = vld [vmem:[#allocation2 + $0x4b8] sm:$0xff] }
 0x53f   :  { %1725 = vmatprep.subr.bf16.mxu0 %v1336_v58  ;;  %1807 = vmatprep.subr.bf16.mxu1 %v1338_v61  ;;  %v1439_v58 = vld [vmem:[#allocation2 + $0x4a0] sm:$0xff]  ;;  %v1441_v61 = vld [vmem:[#allocation2 + $0x4b0] sm:$0xff] }
 0x542   :  { %1726 = vmatpush1.bf16.msra.mxu0 %v1335_v45  ;;  %1808 = vmatpush1.bf16.msra.mxu1 %v1337_v47  ;;  %v1448_v45 = vld [vmem:[#allocation2 + $0x4e8] sm:$0xff]  ;;  %v1447_v47 = vld [vmem:[#allocation2 + $0x4e0] sm:$0xff] }
 0x543   :  { %1727 = vmatprep.subr.bf16.mxu0 %v1344_v7  ;;  %1809 = vmatprep.subr.bf16.mxu1 %v1346_v8  ;;  %v1449_v7 = vld [vmem:[#allocation2 + $0x4f0] sm:$0xff]  ;;  %v1456_v8 = vld [vmem:[#allocation2 + $0x528] sm:$0xff] }
 0x546   :  { %1728 = vmatpush1.bf16.msra.mxu0 %v1343_v10  ;;  %1810 = vmatpush1.bf16.msra.mxu1 %v1345_v12  ;;  %v1458_v10 = vld [vmem:[#allocation2 + $0x538] sm:$0xff]  ;;  %v1457_v12 = vld [vmem:[#allocation2 + $0x530] sm:$0xff] }
 0x547   :  { %1729 = vmatprep.subr.bf16.mxu0 %v1352_v13  ;;  %1811 = vmatprep.subr.bf16.mxu1 %v1354_v16  ;;  %v1464_v13 = vld [vmem:[#allocation2 + $0x568] sm:$0xff]  ;;  %v1466_v16 = vld [vmem:[#allocation2 + $0x578] sm:$0xff] }
 0x54a   :  { %1730 = vmatpush1.bf16.msra.mxu0 %v1351_v17  ;;  %1812 = vmatpush1.bf16.msra.mxu1 %v1353_v19  ;;  %v1463_v17 = vld [vmem:[#allocation2 + $0x560] sm:$0xff]  ;;  %v1465_v19 = vld [vmem:[#allocation2 + $0x570] sm:$0xff] }
 0x54b   :  { %1731 = vmatprep.subr.bf16.mxu0 %v1360_v9  ;;  %1813 = vmatprep.subr.bf16.mxu1 %v1362_v23  ;;  %v1472_v9 = vld [vmem:[#allocation2 + $0x5a8] sm:$0xff]  ;;  %v1474_v23 = vld [vmem:[#allocation2 + $0x5b8] sm:$0xff] }
 0x54e   :  { %1732 = vmatpush1.bf16.msra.mxu0 %v1359_v24  ;;  %1814 = vmatpush1.bf16.msra.mxu1 %v1361_v25  ;;  %v1471_v24 = vld [vmem:[#allocation2 + $0x5a0] sm:$0xff]  ;;  %v1473_v25 = vld [vmem:[#allocation2 + $0x5b0] sm:$0xff] }
 0x54f   :  { %1733 = vmatprep.subr.bf16.mxu0 %v1368_v27  ;;  %1815 = vmatprep.subr.bf16.mxu1 %v1370_v28  ;;  %v1480_v27 = vld [vmem:[#allocation2 + $0x5e8] sm:$0xff]  ;;  %v1482_v28 = vld [vmem:[#allocation2 + $0x5f8] sm:$0xff] }
 0x552   :  { %1734 = vmatpush1.bf16.msra.mxu0 %v1367_v29  ;;  %1816 = vmatpush1.bf16.msra.mxu1 %v1369_v30  ;;  %v1479_v29 = vld [vmem:[#allocation2 + $0x5e0] sm:$0xff]  ;;  %v1481_v30 = vld [vmem:[#allocation2 + $0x5f0] sm:$0xff] }
 0x553   :  { %1735 = vmatprep.subr.bf16.mxu0 %v1376_v31  ;;  %1817 = vmatprep.subr.bf16.mxu1 %v1378_v32  ;;  %v1488_v31 = vld [vmem:[#allocation2 + $0x628] sm:$0xff]  ;;  %v1490_v32 = vld [vmem:[#allocation2 + $0x638] sm:$0xff] }
 0x556   :  { %1736 = vmatpush1.bf16.msra.mxu0 %v1375_v33  ;;  %1818 = vmatpush1.bf16.msra.mxu1 %v1377_v34  ;;  %v1487_v33 = vld [vmem:[#allocation2 + $0x620] sm:$0xff]  ;;  %v1489_v34 = vld [vmem:[#allocation2 + $0x630] sm:$0xff] }
 0x557   :  { %1737 = vmatprep.subr.bf16.mxu0 %v1384_v35  ;;  %1819 = vmatprep.subr.bf16.mxu1 %v1386_v37  ;;  %v1496_v35 = vld [vmem:[#allocation2 + $0x668] sm:$0xff]  ;;  %v1498_v37 = vld [vmem:[#allocation2 + $0x678] sm:$0xff] }
 0x55a   :  { %1738 = vmatpush1.bf16.msra.mxu0 %v1383_v38  ;;  %1820 = vmatpush1.bf16.msra.mxu1 %v1385_v39  ;;  %v1495_v38 = vld [vmem:[#allocation2 + $0x660] sm:$0xff]  ;;  %v1497_v39 = vld [vmem:[#allocation2 + $0x670] sm:$0xff] }
 0x55b   :  { %1739 = vmatprep.subr.bf16.mxu0 %v1392_v40  ;;  %1821 = vmatprep.subr.bf16.mxu1 %v1394_v18  ;;  %v1504_v40 = vld [vmem:[#allocation2 + $0x6a8] sm:$0xff]  ;;  %v1506_v18 = vld [vmem:[#allocation2 + $0x6b8] sm:$0xff] }
 0x55e   :  { %1740 = vmatpush1.bf16.msra.mxu0 %v1391_v46  ;;  %1822 = vmatpush1.bf16.msra.mxu1 %v1393_v48  ;;  %v1503_v46 = vld [vmem:[#allocation2 + $0x6a0] sm:$0xff]  ;;  %v1505_v48 = vld [vmem:[#allocation2 + $0x6b0] sm:$0xff] }
 0x55f   :  { %1741 = vmatprep.subr.bf16.mxu0 %v1400_v49  ;;  %1823 = vmatprep.subr.bf16.mxu1 %v1402_v21  ;;  %v1512_v49 = vld [vmem:[#allocation2 + $0x6e8] sm:$0xff]  ;;  %v1514_v21 = vld [vmem:[#allocation2 + $0x6f8] sm:$0xff] }
 0x562   :  { %1742 = vmatpush1.bf16.msra.mxu0 %v1399_v50  ;;  %1824 = vmatpush1.bf16.msra.mxu1 %v1401_v44  ;;  %v1511_v50 = vld [vmem:[#allocation2 + $0x6e0] sm:$0xff]  ;;  %v1513_v44 = vld [vmem:[#allocation2 + $0x6f0] sm:$0xff] }
 0x563   :  { %1743 = vmatprep.subr.bf16.mxu0 %v1408_v52  ;;  %1825 = vmatprep.subr.bf16.mxu1 %v1410_v53  ;;  %v1520_v52 = vld [vmem:[#allocation2 + $0x728] sm:$0xff]  ;;  %v1522_v53 = vld [vmem:[#allocation2 + $0x738] sm:$0xff] }
 0x566   :  { %1744 = vmatpush1.bf16.msra.mxu0 %v1407_v54  ;;  %1826 = vmatpush1.bf16.msra.mxu1 %v1409_v55  ;;  %v1519_v54 = vld [vmem:[#allocation2 + $0x720] sm:$0xff]  ;;  %v1521_v55 = vld [vmem:[#allocation2 + $0x730] sm:$0xff] }
 0x567   :  { %1745 = vmatprep.subr.bf16.mxu0 %v1416_v56  ;;  %1827 = vmatprep.subr.bf16.mxu1 %v1418_v60  ;;  %v1528_v56 = vld [vmem:[#allocation2 + $0x768] sm:$0xff]  ;;  %v1530_v60 = vld [vmem:[#allocation2 + $0x778] sm:$0xff] }
 0x56a   :  { %1746 = vmatpush1.bf16.msra.mxu0 %v1415_v20  ;;  %1828 = vmatpush1.bf16.msra.mxu1 %v1417_v62  ;;  %v1527_v20 = vld [vmem:[#allocation2 + $0x760] sm:$0xff]  ;;  %v1529_v62 = vld [vmem:[#allocation2 + $0x770] sm:$0xff] }
 0x56b   :  { %1756 = vmatprep.subr.bf16.mxu0 %v1424_v63  ;;  %1838 = vmatprep.subr.bf16.mxu1 %v1426_v1  ;;  %v1536_v63 = vld [vmem:[#allocation2 + $0x7a8] sm:$0xff]  ;;  %v1538_v1 = vld [vmem:[#allocation2 + $0x7b8] sm:$0xff] }
 0x56d   :  { %1748 = vmatmul.mubr.bf16.vlgmr.msra.gmra.mrb[8].mxu0 %v4558_v36  ;;  %1830 = vmatmul.mubr.bf16.vlgmr.msra.gmra.mrb[16].mxu1 %v4558_v36  ;;  %v1450_v36 = vld [vmem:[#allocation2 + $0x4f8] sm:$0xff] }
 0x56e   :  { %1757 = vmatpush1.bf16.msra.mxu0 %v1423_v4  ;;  %1839 = vmatpush1.bf16.msra.mxu1 %v1425_v5  ;;  %v1535_v4 = vld [vmem:[#allocation2 + $0x7a0] sm:$0xff]  ;;  %v1537_v5 = vld [vmem:[#allocation2 + $0x7b0] sm:$0xff] }
 0x56f   :  { %1758 = vmatprep.subr.bf16.mxu0 %v1432_v6  ;;  %1840 = vmatprep.subr.bf16.mxu1 %v1434_v14  ;;  %v1544_v6 = vld [vmem:[#allocation2 + $0x7e8] sm:$0xff]  ;;  %v1546_v14 = vld [vmem:[#allocation2 + $0x7f8] sm:$0xff] }
 0x570   :  { %1788 = vmatprep.mubr.bf16.mxu0 %v4562_v41  ;;  %1870 = vmatprep.mubr.bf16.mxu1 %v4562_v41  ;;  %v1455_v41 = vld [vmem:[#allocation2 + $0x520] sm:$0xff] }
 0x572   :  { %1759 = vmatpush1.bf16.msra.mxu0 %v1431_v15  ;;  %1841 = vmatpush1.bf16.msra.mxu1 %v1433_v3  ;;  %v1543_v15 = vld [vmem:[#allocation2 + $0x7e0] sm:$0xff]  ;;  %v1545_v3 = vld [vmem:[#allocation2 + $0x7f0] sm:$0xff] }
 0x573   :  { %1760 = vmatprep.subr.bf16.mxu0 %v1440_v11  ;;  %1842 = vmatprep.subr.bf16.mxu1 %v1442_v26 }
 0x576   :  { %1761 = vmatpush1.bf16.msra.mxu0 %v1439_v58  ;;  %1843 = vmatpush1.bf16.msra.mxu1 %v1441_v61 }
 0x577   :  { %1762 = vmatprep.subr.bf16.mxu0 %v1448_v45  ;;  %1844 = vmatprep.subr.bf16.mxu1 %v1450_v36 }
 0x57a   :  { %1763 = vmatpush1.bf16.msra.mxu0 %v1447_v47  ;;  %1845 = vmatpush1.bf16.msra.mxu1 %v1449_v7 }
 0x57b   :  { %1764 = vmatprep.subr.bf16.mxu0 %v1456_v8  ;;  %1846 = vmatprep.subr.bf16.mxu1 %v1458_v10 }
 0x57e   :  { %1765 = vmatpush1.bf16.msra.mxu0 %v1455_v41  ;;  %1847 = vmatpush1.bf16.msra.mxu1 %v1457_v12 }
 0x57f   :  { %1766 = vmatprep.subr.bf16.mxu0 %v1464_v13  ;;  %1848 = vmatprep.subr.bf16.mxu1 %v1466_v16 }
 0x582   :  { %1767 = vmatpush1.bf16.msra.mxu0 %v1463_v17  ;;  %1849 = vmatpush1.bf16.msra.mxu1 %v1465_v19 }
 0x583   :  { %1768 = vmatprep.subr.bf16.mxu0 %v1472_v9  ;;  %1850 = vmatprep.subr.bf16.mxu1 %v1474_v23 }
 0x586   :  { %1769 = vmatpush1.bf16.msra.mxu0 %v1471_v24  ;;  %1851 = vmatpush1.bf16.msra.mxu1 %v1473_v25 }
 0x587   :  { %1770 = vmatprep.subr.bf16.mxu0 %v1480_v27  ;;  %1852 = vmatprep.subr.bf16.mxu1 %v1482_v28 }
 0x58a   :  { %1771 = vmatpush1.bf16.msra.mxu0 %v1479_v29  ;;  %1853 = vmatpush1.bf16.msra.mxu1 %v1481_v30 }
 0x58b   :  { %1772 = vmatprep.subr.bf16.mxu0 %v1488_v31  ;;  %1854 = vmatprep.subr.bf16.mxu1 %v1490_v32 }
 0x58e   :  { %1773 = vmatpush1.bf16.msra.mxu0 %v1487_v33  ;;  %1855 = vmatpush1.bf16.msra.mxu1 %v1489_v34 }
 0x58f   :  { %1774 = vmatprep.subr.bf16.mxu0 %v1496_v35  ;;  %1856 = vmatprep.subr.bf16.mxu1 %v1498_v37 }
 0x592   :  { %1775 = vmatpush1.bf16.msra.mxu0 %v1495_v38  ;;  %1857 = vmatpush1.bf16.msra.mxu1 %v1497_v39 }
 0x593   :  { %1776 = vmatprep.subr.bf16.mxu0 %v1504_v40  ;;  %1858 = vmatprep.subr.bf16.mxu1 %v1506_v18 }
 0x596   :  { %1777 = vmatpush1.bf16.msra.mxu0 %v1503_v46  ;;  %1859 = vmatpush1.bf16.msra.mxu1 %v1505_v48 }
 0x597   :  { %1778 = vmatprep.subr.bf16.mxu0 %v1512_v49  ;;  %1860 = vmatprep.subr.bf16.mxu1 %v1514_v21 }
 0x59a   :  { %1779 = vmatpush1.bf16.msra.mxu0 %v1511_v50  ;;  %1861 = vmatpush1.bf16.msra.mxu1 %v1513_v44 }
 0x59b   :  { %1780 = vmatprep.subr.bf16.mxu0 %v1520_v52  ;;  %1862 = vmatprep.subr.bf16.mxu1 %v1522_v53 }
 0x59e   :  { %1781 = vmatpush1.bf16.msra.mxu0 %v1519_v54  ;;  %1863 = vmatpush1.bf16.msra.mxu1 %v1521_v55 }
 0x59f   :  { %1782 = vmatprep.subr.bf16.mxu0 %v1528_v56  ;;  %1864 = vmatprep.subr.bf16.mxu1 %v1530_v60 }
 0x5a2   :  { %1783 = vmatpush1.bf16.msra.mxu0 %v1527_v20  ;;  %1865 = vmatpush1.bf16.msra.mxu1 %v1529_v62 }
 0x5a3   :  { %1784 = vmatprep.subr.bf16.mxu0 %v1536_v63  ;;  %1866 = vmatprep.subr.bf16.mxu1 %v1538_v1 }
 0x5a6   :  { %1785 = vmatpush1.bf16.msra.mxu0 %v1535_v4  ;;  %1867 = vmatpush1.bf16.msra.mxu1 %v1537_v5 }
 0x5a7   :  { %1786 = vmatprep.subr.bf16.mxu0 %v1544_v6  ;;  %1868 = vmatprep.subr.bf16.mxu1 %v1546_v14 }
 0x5aa   :  { %1787 = vmatpush1.bf16.msra.mxu0 %v1543_v15  ;;  %1869 = vmatpush1.bf16.msra.mxu1 %v1545_v3 }
 0x5ad   :  { %1789 = vmatmul.mubr.bf16.vlgmr.msra.gmra.mrb[8].mxu0 %v4570_v51  ;;  %1871 = vmatmul.mubr.bf16.vlgmr.msra.gmra.mrb[16].mxu1 %v4570_v51 }
 0x600   :  { %v4582_v11 = vpop.f32.mrb[4].mxu0  ;;  %v4584_v26 = vpop.f32.mrb[12].mxu1 }
 0x601   :  { %v1881_v58 = vrot.slane %v4582_v11, 4  ;;  %v1893_v61 = vrot.slane %v4584_v26, 4  ;;  %v4588_v45 = vpop.f32.mrb[5].mxu0  ;;  %v4590_v36 = vpop.f32.mrb[13].mxu1 }
 0x602   :  { %v1887_v47 = vrot.slane %v4588_v45, 4  ;;  %v1899_v7 = vrot.slane %v4590_v36, 4  ;;  %v1630_v8 = vpop.f32.mrb[6].mxu0  ;;  %v1712_v10 = vpop.f32.mrb[14].mxu1 }
 0x603   :  { %v1882_v51 = vadd.f32 %v1881_v58, %v4582_v11  ;;  %v1894_v41 = vadd.f32 %v1893_v61, %v4584_v26  ;;  %v1631_v12 = vpop.f32.mrb[7].mxu0  ;;  %v1713_v13 = vpop.f32.mrb[15].mxu1 }
 0x604   :  { %v1888_v16 = vadd.f32 %v1887_v47, %v4588_v45  ;;  %v1900_v17 = vadd.f32 %v1899_v7, %v4590_v36 }
 0x605   :  { %v1883_v19 = vrot.slane %v1882_v51, 2  ;;  %v1895_v9 = vrot.slane %v1894_v41, 2 }
 0x606   :  { %v1889_v23 = vrot.slane %v1888_v16, 2  ;;  %v1901_v24 = vrot.slane %v1900_v17, 2 }
 0x607   :  { %v1884_v25 = vadd.f32 %v1883_v19, %v1882_v51  ;;  %v1896_v27 = vadd.f32 %v1895_v9, %v1894_v41 }
 0x608   :  { %v1890_v28 = vadd.f32 %v1889_v23, %v1888_v16  ;;  %v1902_v29 = vadd.f32 %v1901_v24, %v1900_v17 }
 0x609   :  { %v1885_v30 = vrot.slane %v1884_v25, 1  ;;  %v1897_v31 = vrot.slane %v1896_v27, 1 }
 0x60a   :  { %v1891_v32 = vrot.slane %v1890_v28, 1  ;;  %v1903_v33 = vrot.slane %v1902_v29, 1 }
 0x60b   :  { %v1886_v34 = vadd.f32 %v1885_v30, %v1884_v25  ;;  %v1898_v35 = vadd.f32 %v1897_v31, %v1896_v27 }
 0x60c   :  { %v1892_v37 = vadd.f32 %v1891_v32, %v1890_v28  ;;  %v1904_v38 = vadd.f32 %v1903_v33, %v1902_v29 }
 0x60d   :  { %v4598_v39 = vmul.f32 0.25, %v1886_v34  ;;  %v4600_v40 = vmul.f32 0.25, %v1898_v35 }
 0x60e   :  { %v4602_v18 = vmul.f32 0.25, %v1892_v37  ;;  %v4604_v46 = vmul.f32 0.25, %v1904_v38 }
 0x60f   :  { %v1937_v48 = vsub.f32 %v4582_v11, %v4598_v39  ;;  %v1939_v49 = vsub.f32 %v4584_v26, %v4600_v40  ;;  %v2001_v58 = vmul.f32 %v4598_v39, %v4598_v39  ;;  %v2003_v47 = vmul.f32 %v4600_v40, %v4600_v40 }
 0x610   :  { %v1938_v21 = vsub.f32 %v4588_v45, %v4602_v18  ;;  %v1940_v50 = vsub.f32 %v4590_v36, %v4604_v46  ;;  %v2002_v8 = vmul.f32 %v4602_v18, %v4602_v18  ;;  %v2004_v51 = vmul.f32 %v4604_v46, %v4604_v46 }
 0x611   :  { %v1945_v44 = vmul.f32 %v1937_v48, %v1937_v48  ;;  %v1947_v52 = vmul.f32 %v1939_v49, %v1939_v49  ;;  %v2009_v19 = vmul.f32 4.0, %v2001_v58  ;;  %v2011_v23 = vmul.f32 4.0, %v2003_v47 }
 0x612   :  { %v1946_v53 = vmul.f32 %v1938_v21, %v1938_v21  ;;  %v1948_v54 = vmul.f32 %v1940_v50, %v1940_v50  ;;  %v2010_v25 = vmul.f32 4.0, %v2002_v8  ;;  %v2012_v28 = vmul.f32 4.0, %v2004_v51 }
 0x613   :  { %v1953_v55 = vrot.slane %v1945_v44, 4  ;;  %v1965_v56 = vrot.slane %v1947_v52, 4 }
 0x614   :  { %v1959_v60 = vrot.slane %v1946_v53, 4  ;;  %v1971_v20 = vrot.slane %v1948_v54, 4 }
 0x615   :  { %v1954_v62 = vadd.f32 %v1953_v55, %v1945_v44  ;;  %v1966_v63 = vadd.f32 %v1965_v56, %v1947_v52 }
 0x616   :  { %v1960_v1 = vadd.f32 %v1959_v60, %v1946_v53  ;;  %v1972_v4 = vadd.f32 %v1971_v20, %v1948_v54 }
 0x617   :  { %v1955_v5 = vrot.slane %v1954_v62, 2  ;;  %v1967_v6 = vrot.slane %v1966_v63, 2 }
 0x618   :  { %v1961_v14 = vrot.slane %v1960_v1, 2  ;;  %v1973_v15 = vrot.slane %v1972_v4, 2 }
 0x619   :  { %v1956_v3 = vadd.f32 %v1955_v5, %v1954_v62  ;;  %v1968_v61 = vadd.f32 %v1967_v6, %v1966_v63 }
 0x61a   :  { %v1962_v7 = vadd.f32 %v1961_v14, %v1960_v1  ;;  %v1974_v10 = vadd.f32 %v1973_v15, %v1972_v4 }
 0x61b   :  { %v1957_v41 = vrot.slane %v1956_v3, 1  ;;  %v1969_v12 = vrot.slane %v1968_v61, 1 }
 0x61c   :  { %v1963_v13 = vrot.slane %v1962_v7, 1  ;;  %v1975_v16 = vrot.slane %v1974_v10, 1 }
 0x61d   :  { %v1958_v17 = vadd.f32 %v1957_v41, %v1956_v3  ;;  %v1970_v9 = vadd.f32 %v1969_v12, %v1968_v61 }
 0x61e   :  { %v1964_v24 = vadd.f32 %v1963_v13, %v1962_v7  ;;  %v1976_v27 = vadd.f32 %v1975_v16, %v1974_v10 }
 0x61f   :  { %v2017_v29 = vsub.f32 %v1958_v17, %v2009_v19  ;;  %v2019_v30 = vsub.f32 %v1970_v9, %v2011_v23 }
 0x620   :  { %v2018_v31 = vsub.f32 %v1964_v24, %v2010_v25  ;;  %v2020_v32 = vsub.f32 %v1976_v27, %v2012_v28 }
 0x621   :  { %v2025_v33 = vmul.f32 0.25, %v2017_v29  ;;  %v2027_v34 = vmul.f32 0.25, %v2019_v30 }
 0x622   :  { %v2026_v35 = vmul.f32 0.25, %v2018_v31  ;;  %v2028_v37 = vmul.f32 0.25, %v2020_v32 }
 0x623   :  { %v2033_v38 = vadd.f32 1e-05, %v2025_v33  ;;  %v2035_v48 = vadd.f32 1e-05, %v2027_v34 }
 0x624   :  { %v2034_v49 = vadd.f32 1e-05, %v2026_v35  ;;  %v2036_v21 = vadd.f32 1e-05, %v2028_v37 }
 0x625   :  { %3920 = vrsqrt.f32 %v2033_v38 }
 0x626   :  { %3922 = vrsqrt.f32 %v2035_v48 }
 0x627   :  { %3924 = vrsqrt.f32 %v2034_v49 }
 0x628   :  { %3926 = vrsqrt.f32 %v2036_v21 }
 0x62f   :  { %v3921_v50 = vpop.eup %3920 }
 0x630   :  { %v3923_v44 = vpop.eup %3922 }
 0x631   :  { %v3925_v52 = vpop.eup %3924 }
 0x632   :  { %v3927_v53 = vpop.eup %3926  ;;  %v2057_v54 = vcombine.low %v3921_v50, %v3925_v52 }
 0x633   :  { %v2058_v55 = vcombine.low %v3923_v44, %v3927_v53 }
 0x634   :  { %v4623_v56 = vrot.slane %v2057_v54, %v4461_v59 }
 0x635   :  { %v4626_v60 = vrot.slane %v2058_v55, %v4461_v59 }
 0x637   :  { %v2089_v20 = vcombine.low %v4623_v56, %v4626_v60 }
 0x680   :  { %v4630_v62 = vpop.f32.mrb[8].mxu0  ;;  %v4632_v63 = vpop.f32.mrb[16].mxu1 }
 0x681   :  { %v1905_v1 = vrot.slane %v4630_v62, 4  ;;  %v1917_v4 = vrot.slane %v4632_v63, 4  ;;  %v4636_v5 = vpop.f32.mrb[9].mxu0  ;;  %v4638_v6 = vpop.f32.mrb[17].mxu1 }
 0x682   :  { %v1911_v14 = vrot.slane %v4636_v5, 4  ;;  %v1923_v15 = vrot.slane %v4638_v6, 4  ;;  %v1794_v3 = vpop.f32.mrb[10].mxu0  ;;  %v1876_v58 = vpop.f32.mrb[18].mxu1 }
 0x683   :  { %v1906_v61 = vadd.f32 %v1905_v1, %v4630_v62  ;;  %v1918_v47 = vadd.f32 %v1917_v4, %v4632_v63  ;;  %v1795_v7 = vpop.f32.mrb[11].mxu0  ;;  %v1877_v8 = vpop.f32.mrb[19].mxu1 }
 0x684   :  { %v1912_v10 = vadd.f32 %v1911_v14, %v4636_v5  ;;  %v1924_v51 = vadd.f32 %v1923_v15, %v4638_v6 }
 0x685   :  { %v1907_v41 = vrot.slane %v1906_v61, 2  ;;  %v1919_v12 = vrot.slane %v1918_v47, 2 }
 0x686   :  { %v1913_v13 = vrot.slane %v1912_v10, 2  ;;  %v1925_v16 = vrot.slane %v1924_v51, 2 }
 0x687   :  { %v1908_v17 = vadd.f32 %v1907_v41, %v1906_v61  ;;  %v1920_v19 = vadd.f32 %v1919_v12, %v1918_v47 }
 0x688   :  { %v1914_v9 = vadd.f32 %v1913_v13, %v1912_v10  ;;  %v1926_v23 = vadd.f32 %v1925_v16, %v1924_v51 }
 0x689   :  { %v1909_v24 = vrot.slane %v1908_v17, 1  ;;  %v1921_v25 = vrot.slane %v1920_v19, 1 }
 0x68a   :  { %v1915_v27 = vrot.slane %v1914_v9, 1  ;;  %v1927_v28 = vrot.slane %v1926_v23, 1 }
 0x68b   :  { %v1910_v29 = vadd.f32 %v1909_v24, %v1908_v17  ;;  %v1922_v30 = vadd.f32 %v1921_v25, %v1920_v19 }
 0x68c   :  { %v1916_v31 = vadd.f32 %v1915_v27, %v1914_v9  ;;  %v1928_v32 = vadd.f32 %v1927_v28, %v1926_v23 }
 0x68d   :  { %v4646_v33 = vmul.f32 0.25, %v1910_v29  ;;  %v4648_v34 = vmul.f32 0.25, %v1922_v30 }
 0x68e   :  { %v4650_v35 = vmul.f32 0.25, %v1916_v31  ;;  %v4652_v37 = vmul.f32 0.25, %v1928_v32 }
 0x68f   :  { %v1941_v38 = vsub.f32 %v4630_v62, %v4646_v33  ;;  %v1943_v48 = vsub.f32 %v4632_v63, %v4648_v34  ;;  %v2005_v51 = vmul.f32 %v4646_v33, %v4646_v33  ;;  %v2007_v12 = vmul.f32 %v4648_v34, %v4648_v34 }
 0x690   :  { %v1942_v49 = vsub.f32 %v4636_v5, %v4650_v35  ;;  %v1944_v21 = vsub.f32 %v4638_v6, %v4652_v37  ;;  %v2006_v16 = vmul.f32 %v4650_v35, %v4650_v35  ;;  %v2008_v19 = vmul.f32 %v4652_v37, %v4652_v37 }
 0x691   :  { %v1949_v50 = vmul.f32 %v1941_v38, %v1941_v38  ;;  %v1951_v44 = vmul.f32 %v1943_v48, %v1943_v48  ;;  %v2013_v28 = vmul.f32 4.0, %v2005_v51  ;;  %v2015_v30 = vmul.f32 4.0, %v2007_v12 }
 0x692   :  { %v1950_v52 = vmul.f32 %v1942_v49, %v1942_v49  ;;  %v1952_v53 = vmul.f32 %v1944_v21, %v1944_v21  ;;  %v2014_v32 = vmul.f32 4.0, %v2006_v16  ;;  %v2016_v48 = vmul.f32 4.0, %v2008_v19  ;;  %v1879_v16 = vld [vmem:[#allocation16] sm:$0xff] }
 0x693   :  { %v1977_v54 = vrot.slane %v1949_v50, 4  ;;  %v1989_v55 = vrot.slane %v1951_v44, 4  ;;  %v2097_v12 = vrot.slane %v2089_v20, %v4461_v59  ;;  %v4678_v19 = vsub.s32 4, %v4458_v57 }
 0x694   :  { %v1983_v1 = vrot.slane %v1950_v52, 4  ;;  %v1995_v4 = vrot.slane %v1952_v53, 4 }
 0x695   :  { %v1978_v14 = vadd.f32 %v1977_v54, %v1949_v50  ;;  %v1990_v15 = vadd.f32 %v1989_v55, %v1951_v44 }
 0x696   :  { %v1984_v3 = vadd.f32 %v1983_v1, %v1950_v52  ;;  %v1996_v58 = vadd.f32 %v1995_v4, %v1952_v53 }
 0x697   :  { %v1979_v61 = vrot.slane %v1978_v14, 2  ;;  %v1991_v47 = vrot.slane %v1990_v15, 2 }
 0x698   :  { %v1985_v7 = vrot.slane %v1984_v3, 2  ;;  %v1997_v8 = vrot.slane %v1996_v58, 2 }
 0x699   :  { %v1980_v10 = vadd.f32 %v1979_v61, %v1978_v14  ;;  %v1992_v41 = vadd.f32 %v1991_v47, %v1990_v15 }
 0x69a   :  { %v1986_v13 = vadd.f32 %v1985_v7, %v1984_v3  ;;  %v1998_v17 = vadd.f32 %v1997_v8, %v1996_v58 }
 0x69b   :  { %v1981_v9 = vrot.slane %v1980_v10, 1  ;;  %v1993_v23 = vrot.slane %v1992_v41, 1 }
 0x69c   :  { %v1987_v24 = vrot.slane %v1986_v13, 1  ;;  %v1999_v25 = vrot.slane %v1998_v17, 1 }
 0x69d   :  { %v1982_v27 = vadd.f32 %v1981_v9, %v1980_v10  ;;  %v1994_v29 = vadd.f32 %v1993_v23, %v1992_v41  ;;  %v4681_v9 = vsub.s32 5, %v4458_v57  ;;  %v4684_v23 = vsub.s32 6, %v4458_v57 }
 0x69e   :  { %v1988_v31 = vadd.f32 %v1987_v24, %v1986_v13  ;;  %v2000_v38 = vadd.f32 %v1999_v25, %v1998_v17  ;;  %v2139_v24 = vsub.s32 7, %v4458_v57 }
 0x69f   :  { %v2021_v49 = vsub.f32 %v1982_v27, %v2013_v28  ;;  %v2023_v21 = vsub.f32 %v1994_v29, %v2015_v30 }
 0x6a0   :  { %v2022_v50 = vsub.f32 %v1988_v31, %v2014_v32  ;;  %v2024_v44 = vsub.f32 %v2000_v38, %v2016_v48 }
 0x6a1   :  { %v2029_v52 = vmul.f32 0.25, %v2021_v49  ;;  %v2031_v53 = vmul.f32 0.25, %v2023_v21 }
 0x6a2   :  { %v2030_v54 = vmul.f32 0.25, %v2022_v50  ;;  %v2032_v55 = vmul.f32 0.25, %v2024_v44 }
 0x6a3   :  { %v2037_v1 = vadd.f32 1e-05, %v2029_v52  ;;  %v2039_v4 = vadd.f32 1e-05, %v2031_v53 }
 0x6a4   :  { %v2038_v14 = vadd.f32 1e-05, %v2030_v54  ;;  %v2040_v15 = vadd.f32 1e-05, %v2032_v55 }
 0x6a5   :  { %3928 = vrsqrt.f32 %v2037_v1 }
 0x6a6   :  { %3930 = vrsqrt.f32 %v2039_v4 }
 0x6a7   :  { %3932 = vrsqrt.f32 %v2038_v14 }
 0x6a8   :  { %3934 = vrsqrt.f32 %v2040_v15 }
 0x6af   :  { %v3929_v3 = vpop.eup %3928 }
 0x6b0   :  { %v3931_v58 = vpop.eup %3930 }
 0x6b1   :  { %v3933_v61 = vpop.eup %3932 }
 0x6b2   :  { %v3935_v47 = vpop.eup %3934  ;;  %v2059_v7 = vcombine.low %v3929_v3, %v3933_v61  ;;  %v1880_v3 = vld [vmem:[#allocation18] sm:$0xff] }
 0x6b3   :  { %v2060_v8 = vcombine.low %v3931_v58, %v3935_v47 }
 0x6b4   :  { %v2081_v10 = vrot.slane %v2059_v7, %v4461_v59 }
 0x6b5   :  { %v2088_v51 = vrot.slane %v2060_v8, %v4461_v59 }
 0x6b7   :  { %v2090_v41 = vcombine.low %v2081_v10, %v2088_v51 }
 0x6b9   :  { %v2104_v13 = vrot.slane %v2090_v41, %v4461_v59 }
 0x6bb   :  { %v2105_v17 = vcombine.low %v2097_v12, %v2104_v13 }
 0x6bd   :  { %v2107_v25 = vmul.f32 %v2105_v17, %v1879_v16 }
 0x6bf   :  { %v2112_v27 = vrot.slane %v2107_v25, %v4465_v0  ;;  %v2116_v56 = vrot.slane %v2107_v25, %v4469_v2  ;;  %v2120_v60 = vrot.slane %v2107_v25, %v4520_v42  ;;  %v2124_v20 = vrot.slane %v2107_v25, %v4523_v43 }
 0x6c0   :  { %v2128_v28 = vrot.slane %v2107_v25, %v4678_v19  ;;  %v2132_v29 = vrot.slane %v2107_v25, %v4681_v9  ;;  %v2136_v30 = vrot.slane %v2107_v25, %v4684_v23  ;;  %v2140_v31 = vrot.slane %v2107_v25, %v2139_v24 }
 0x6c1   :  { %v2149_v32 = vmul.f32 %v2112_v27, %v4598_v39  ;;  %v2150_v57 = vmul.f32 %v2116_v56, %v4602_v18  ;;  %v2151_v38 = vmul.f32 %v2120_v60, %v4600_v40  ;;  %v2152_v48 = vmul.f32 %v2124_v20, %v4604_v46 }
 0x6c2   :  { %v2153_v49 = vmul.f32 %v2128_v28, %v4646_v33  ;;  %v2154_v21 = vmul.f32 %v2132_v29, %v4650_v35  ;;  %v2155_v50 = vmul.f32 %v2136_v30, %v4648_v34  ;;  %v2156_v44 = vmul.f32 %v2140_v31, %v4652_v37 }
 0x6c3   :  { %v2165_v52 = vcombine.low %v2149_v32, %v2150_v57  ;;  %v2166_v53 = vcombine.low %v2151_v38, %v2152_v48  ;;  %v2216_v54 = vmul.f32 %v2112_v27, %v4582_v11  ;;  %v2217_v39 = vmul.f32 %v2116_v56, %v4588_v45 }
 0x6c4   :  { %v2167_v55 = vcombine.low %v2153_v49, %v2154_v21  ;;  %v2168_v18 = vcombine.low %v2155_v50, %v2156_v44  ;;  %v2218_v40 = vmul.f32 %v2120_v60, %v4584_v26  ;;  %v2219_v46 = vmul.f32 %v2124_v20, %v4590_v36 }
 0x6c5   :  { %v2175_v33 = vrot.slane %v2165_v52, %v4461_v59  ;;  %v2182_v35 = vrot.slane %v2166_v53, %v4461_v59  ;;  %v2220_v34 = vmul.f32 %v2128_v28, %v4630_v62  ;;  %v2221_v37 = vmul.f32 %v2132_v29, %v4636_v5 }
 0x6c6   :  { %v2189_v1 = vrot.slane %v2167_v55, %v4461_v59  ;;  %v2196_v11 = vrot.slane %v2168_v18, %v4461_v59  ;;  %v2222_v45 = vmul.f32 %v2136_v30, %v4632_v63  ;;  %v2223_v4 = vmul.f32 %v2140_v31, %v4638_v6 }
 0x6c7   :  { %v2197_v14 = vcombine.low %v2175_v33, %v2182_v35 }
 0x6c8   :  { %v2198_v26 = vcombine.low %v2189_v1, %v2196_v11 }
 0x6c9   :  { %v2205_v36 = vrot.slane %v2197_v14, %v4461_v59 }
 0x6ca   :  { %v2212_v15 = vrot.slane %v2198_v26, %v4461_v59 }
 0x6cc   :  { %v2213_v58 = vcombine.low %v2205_v36, %v2212_v15 }
 0x6ce   :  { %v2215_v61 = vsub.f32 %v1880_v3, %v2213_v58 }
 0x6d0   :  { %v2228_v62 = vrot.slane %v2215_v61, %v4465_v0  ;;  %v2232_v5 = vrot.slane %v2215_v61, %v4469_v2  ;;  %v2236_v47 = vrot.slane %v2215_v61, %v4520_v42  ;;  %v2240_v7 = vrot.slane %v2215_v61, %v4523_v43 }
 0x6d1   :  { %v2244_v63 = vrot.slane %v2215_v61, %v4678_v19  ;;  %v2248_v6 = vrot.slane %v2215_v61, %v4681_v9  ;;  %v2252_v8 = vrot.slane %v2215_v61, %v4684_v23  ;;  %v2256_v10 = vrot.slane %v2215_v61, %v2139_v24 }
 0x6d2   :  { %v2265_v51 = vadd.f32 %v2228_v62, %v2216_v54  ;;  %v2266_v59 = vadd.f32 %v2232_v5, %v2217_v39  ;;  %v2267_v41 = vadd.f32 %v2236_v47, %v2218_v40  ;;  %v2268_v12 = vadd.f32 %v2240_v7, %v2219_v46 }
 0x6d3   :  { %v2269_v13 = vadd.f32 %v2244_v63, %v2220_v34  ;;  %v2270_v16 = vadd.f32 %v2248_v6, %v2221_v37  ;;  %v2271_v17 = vadd.f32 %v2252_v8, %v2222_v45  ;;  %v2272_v25 = vadd.f32 %v2256_v10, %v2223_v4 }
 0x6d4   :  { %v2273_v27 = vmax.f32 %v2265_v51, 0.0  ;;  %v2274_v56 = vmax.f32 %v2266_v59, 0.0  ;;  %v2275_v60 = vmax.f32 %v2267_v41, 0.0  ;;  %v2276_v20 = vmax.f32 %v2268_v12, 0.0 }
 0x6d5   :  { %v2277_v28 = vmax.f32 %v2269_v13, 0.0  ;;  %v2278_v29 = vmax.f32 %v2270_v16, 0.0  ;;  %v2279_v30 = vmax.f32 %v2271_v17, 0.0  ;;  %v2280_v31 = vmax.f32 %v2272_v25, 0.0 }
 0x6d6   :  { %v4724_v32 = vmul.f32 %v2273_v27, %v4478_v22  ;;  %v2282_v24 = vmul.f32 %v2274_v56, %v4478_v22  ;;  %v4728_v57 = vmul.f32 %v2275_v60, %v4478_v22  ;;  %v4731_v38 = vmul.f32 %v2276_v20, %v4478_v22 }
 0x6d7   :  { %v4734_v48 = vmul.f32 %v2277_v28, %v4478_v22  ;;  %v4737_v49 = vmul.f32 %v2278_v29, %v4478_v22  ;;  %v4740_v21 = vmul.f32 %v2279_v30, %v4478_v22  ;;  %v4743_v50 = vmul.f32 %v2280_v31, %v4478_v22 }
 0x6d8   :  { %4184 = dma.done.wait [#allocation4 + $0x1], 57344 }
 0x6d9   :  { %4185 = vsyncadd [#allocation4 + $0x1], 4294909952  ;;  %v4745_v44 = vpack.c.bf16 %v2282_v24, %v2282_v24  ;;  %v2294_v52 = vld [vmem:[#allocation3 + $0x8] sm:$0xff]  ;;  %v2296_v53 = vld [vmem:[#allocation3 + $0x18] sm:$0xff] }
 0x6da   :  { %v2293_v54 = vld [vmem:[#allocation3] sm:$0xff]  ;;  %2786 = vmatprep.subr.bf16.mxu0 %v2294_v52  ;;  %2950 = vmatprep.subr.bf16.mxu1 %v2296_v53  ;;  %v2295_v39 = vld [vmem:[#allocation3 + $0x10] sm:$0xff]  ;;  %v2300_v22 = vld [vmem:[#allocation3 + $0x38] sm:$0xff] }
 0x6db   :  { %2818 = vmatprep.mubr.bf16.mxu0 %v4745_v44  ;;  %2982 = vmatprep.mubr.bf16.mxu1 %v4745_v44  ;;  %v2301_v55 = vld [vmem:[#allocation3 + $0x40] sm:$0xff]  ;;  %v2303_v18 = vld [vmem:[#allocation3 + $0x50] sm:$0xff]  ;;  %v2302_v40 = vld [vmem:[#allocation3 + $0x48] sm:$0xff] }
 0x6dc   :  { %2787 = vmatpush1.bf16.msra.mxu0 %v2293_v54  ;;  %2951 = vmatpush1.bf16.msra.mxu1 %v2295_v39  ;;  %v2308_v46 = vld [vmem:[#allocation3 + $0x78] sm:$0xff]  ;;  %v2310_v33 = vld [vmem:[#allocation3 + $0x88] sm:$0xff]  ;;  %v2307_v35 = vld [vmem:[#allocation3 + $0x70] sm:$0xff] }
 0x6dd   :  { %2788 = vmatprep.subr.bf16.mxu0 %v2301_v55  ;;  %2952 = vmatprep.subr.bf16.mxu1 %v2303_v18  ;;  %v2309_v34 = vld [vmem:[#allocation3 + $0x80] sm:$0xff]  ;;  %v2315_v37 = vld [vmem:[#allocation3 + $0xb0] sm:$0xff]  ;;  %v2314_v11 = vld [vmem:[#allocation3 + $0xa8] sm:$0xff] }
 0x6de   :  { %v2317_v1 = vld [vmem:[#allocation3 + $0xc0] sm:$0xff]  ;;  %v2316_v45 = vld [vmem:[#allocation3 + $0xb8] sm:$0xff]  ;;  %v2322_v4 = vld [vmem:[#allocation3 + $0xe8] sm:$0xff] }
 0x6df   :  { %v2324_v14 = vld [vmem:[#allocation3 + $0xf8] sm:$0xff]  ;;  %v2321_v26 = vld [vmem:[#allocation3 + $0xe0] sm:$0xff]  ;;  %v2323_v36 = vld [vmem:[#allocation3 + $0xf0] sm:$0xff] }
 0x6e0   :  { %2789 = vmatpush1.bf16.msra.mxu0 %v2300_v22  ;;  %2953 = vmatpush1.bf16.msra.mxu1 %v2302_v40  ;;  %v2329_v15 = vld [vmem:[#allocation3 + $0x120] sm:$0xff]  ;;  %v2331_v3 = vld [vmem:[#allocation3 + $0x130] sm:$0xff]  ;;  %v2328_v58 = vld [vmem:[#allocation3 + $0x118] sm:$0xff] }
 0x6e1   :  { %2790 = vmatprep.subr.bf16.mxu0 %v2308_v46  ;;  %2954 = vmatprep.subr.bf16.mxu1 %v2310_v33  ;;  %v2330_v61 = vld [vmem:[#allocation3 + $0x128] sm:$0xff]  ;;  %v2336_v62 = vld [vmem:[#allocation3 + $0x158] sm:$0xff]  ;;  %v2335_v47 = vld [vmem:[#allocation3 + $0x150] sm:$0xff] }
 0x6e2   :  { %v2338_v5 = vld [vmem:[#allocation3 + $0x168] sm:$0xff]  ;;  %v2337_v7 = vld [vmem:[#allocation3 + $0x160] sm:$0xff]  ;;  %v2343_v63 = vld [vmem:[#allocation3 + $0x190] sm:$0xff] }
 0x6e3   :  { %v2345_v6 = vld [vmem:[#allocation3 + $0x1a0] sm:$0xff]  ;;  %v2342_v8 = vld [vmem:[#allocation3 + $0x188] sm:$0xff]  ;;  %v2344_v10 = vld [vmem:[#allocation3 + $0x198] sm:$0xff] }
 0x6e4   :  { %2791 = vmatpush1.bf16.msra.mxu0 %v2307_v35  ;;  %2955 = vmatpush1.bf16.msra.mxu1 %v2309_v34  ;;  %v2350_v51 = vld [vmem:[#allocation3 + $0x1c8] sm:$0xff]  ;;  %v2352_v59 = vld [vmem:[#allocation3 + $0x1d8] sm:$0xff]  ;;  %v2349_v41 = vld [vmem:[#allocation3 + $0x1c0] sm:$0xff] }
 0x6e5   :  { %2792 = vmatprep.subr.bf16.mxu0 %v2315_v37  ;;  %2956 = vmatprep.subr.bf16.mxu1 %v2317_v1  ;;  %v2351_v12 = vld [vmem:[#allocation3 + $0x1d0] sm:$0xff]  ;;  %v2357_v13 = vld [vmem:[#allocation3 + $0x200] sm:$0xff]  ;;  %v2356_v17 = vld [vmem:[#allocation3 + $0x1f8] sm:$0xff] }
 0x6e6   :  { %v2359_v16 = vld [vmem:[#allocation3 + $0x210] sm:$0xff]  ;;  %v2358_v25 = vld [vmem:[#allocation3 + $0x208] sm:$0xff]  ;;  %v2364_v27 = vld [vmem:[#allocation3 + $0x238] sm:$0xff] }
 0x6e7   :  { %v2366_v56 = vld [vmem:[#allocation3 + $0x248] sm:$0xff]  ;;  %v2363_v60 = vld [vmem:[#allocation3 + $0x230] sm:$0xff]  ;;  %v2365_v20 = vld [vmem:[#allocation3 + $0x240] sm:$0xff] }
 0x6e8   :  { %2793 = vmatpush1.bf16.msra.mxu0 %v2314_v11  ;;  %2957 = vmatpush1.bf16.msra.mxu1 %v2316_v45  ;;  %v2371_v28 = vld [vmem:[#allocation3 + $0x270] sm:$0xff]  ;;  %v2373_v29 = vld [vmem:[#allocation3 + $0x280] sm:$0xff]  ;;  %v2370_v30 = vld [vmem:[#allocation3 + $0x268] sm:$0xff] }
 0x6e9   :  { %2794 = vmatprep.subr.bf16.mxu0 %v2322_v4  ;;  %2958 = vmatprep.subr.bf16.mxu1 %v2324_v14  ;;  %v2372_v31 = vld [vmem:[#allocation3 + $0x278] sm:$0xff]  ;;  %v2378_v24 = vld [vmem:[#allocation3 + $0x2a8] sm:$0xff]  ;;  %v2377_v53 = vld [vmem:[#allocation3 + $0x2a0] sm:$0xff]  ;;  %v4751_v14 = vpack.c.bf16 %v4724_v32, %v4724_v32 }
 0x6ea   :  { %v2380_v52 = vld [vmem:[#allocation3 + $0x2b8] sm:$0xff]  ;;  %v2379_v54 = vld [vmem:[#allocation3 + $0x2b0] sm:$0xff]  ;;  %v2385_v39 = vld [vmem:[#allocation3 + $0x2e0] sm:$0xff] }
 0x6eb   :  { %v2387_v55 = vld [vmem:[#allocation3 + $0x2f0] sm:$0xff]  ;;  %v2384_v18 = vld [vmem:[#allocation3 + $0x2d8] sm:$0xff]  ;;  %v2386_v22 = vld [vmem:[#allocation3 + $0x2e8] sm:$0xff] }
 0x6ec   :  { %2795 = vmatpush1.bf16.msra.mxu0 %v2321_v26  ;;  %2959 = vmatpush1.bf16.msra.mxu1 %v2323_v36  ;;  %v2392_v40 = vld [vmem:[#allocation3 + $0x318] sm:$0xff]  ;;  %v2394_v46 = vld [vmem:[#allocation3 + $0x328] sm:$0xff]  ;;  %v2391_v33 = vld [vmem:[#allocation3 + $0x310] sm:$0xff] }
 0x6ed   :  { %2796 = vmatprep.subr.bf16.mxu0 %v2329_v15  ;;  %2960 = vmatprep.subr.bf16.mxu1 %v2331_v3  ;;  %v2393_v35 = vld [vmem:[#allocation3 + $0x320] sm:$0xff]  ;;  %v2399_v34 = vld [vmem:[#allocation3 + $0x350] sm:$0xff]  ;;  %v2398_v1 = vld [vmem:[#allocation3 + $0x348] sm:$0xff] }
 0x6ee   :  { %v2401_v37 = vld [vmem:[#allocation3 + $0x360] sm:$0xff]  ;;  %v2400_v11 = vld [vmem:[#allocation3 + $0x358] sm:$0xff]  ;;  %v2406_v45 = vld [vmem:[#allocation3 + $0x388] sm:$0xff] }
 0x6ef   :  { %v2408_v4 = vld [vmem:[#allocation3 + $0x398] sm:$0xff]  ;;  %v2405_v26 = vld [vmem:[#allocation3 + $0x380] sm:$0xff]  ;;  %v2407_v36 = vld [vmem:[#allocation3 + $0x390] sm:$0xff] }
 0x6f0   :  { %2797 = vmatpush1.bf16.msra.mxu0 %v2328_v58  ;;  %2961 = vmatpush1.bf16.msra.mxu1 %v2330_v61  ;;  %v2413_v15 = vld [vmem:[#allocation3 + $0x3c0] sm:$0xff]  ;;  %v2415_v3 = vld [vmem:[#allocation3 + $0x3d0] sm:$0xff]  ;;  %v4755_v58 = vpack.c.bf16 %v4731_v38, %v4731_v38  ;;  %v2412_v32 = vld [vmem:[#allocation3 + $0x3b8] sm:$0xff] }
 0x6f1   :  { %2798 = vmatprep.subr.bf16.mxu0 %v2336_v62  ;;  %2962 = vmatprep.subr.bf16.mxu1 %v2338_v5  ;;  %v2414_v61 = vld [vmem:[#allocation3 + $0x3c8] sm:$0xff]  ;;  %v2420_v62 = vld [vmem:[#allocation3 + $0x3f8] sm:$0xff]  ;;  %v2419_v38 = vld [vmem:[#allocation3 + $0x3f0] sm:$0xff] }
 0x6f2   :  { %v2422_v5 = vld [vmem:[#allocation3 + $0x408] sm:$0xff] }
 0x6f4   :  { %2799 = vmatpush1.bf16.msra.mxu0 %v2335_v47  ;;  %2963 = vmatpush1.bf16.msra.mxu1 %v2337_v7  ;;  %v2421_v47 = vld [vmem:[#allocation3 + $0x400] sm:$0xff]  ;;  %v2427_v7 = vld [vmem:[#allocation3 + $0x430] sm:$0xff] }
 0x6f5   :  { %2800 = vmatprep.subr.bf16.mxu0 %v2343_v63  ;;  %2964 = vmatprep.subr.bf16.mxu1 %v2345_v6  ;;  %v2429_v63 = vld [vmem:[#allocation3 + $0x440] sm:$0xff]  ;;  %v2426_v6 = vld [vmem:[#allocation3 + $0x428] sm:$0xff] }
 0x6f8   :  { %2801 = vmatpush1.bf16.msra.mxu0 %v2342_v8  ;;  %2965 = vmatpush1.bf16.msra.mxu1 %v2344_v10  ;;  %v2428_v8 = vld [vmem:[#allocation3 + $0x438] sm:$0xff]  ;;  %v2434_v10 = vld [vmem:[#allocation3 + $0x468] sm:$0xff] }
 0x6f9   :  { %2802 = vmatprep.subr.bf16.mxu0 %v2350_v51  ;;  %2966 = vmatprep.subr.bf16.mxu1 %v2352_v59  ;;  %v2436_v51 = vld [vmem:[#allocation3 + $0x478] sm:$0xff]  ;;  %v2433_v59 = vld [vmem:[#allocation3 + $0x460] sm:$0xff] }
 0x6fc   :  { %2803 = vmatpush1.bf16.msra.mxu0 %v2349_v41  ;;  %2967 = vmatpush1.bf16.msra.mxu1 %v2351_v12  ;;  %v2435_v41 = vld [vmem:[#allocation3 + $0x470] sm:$0xff]  ;;  %v2441_v12 = vld [vmem:[#allocation3 + $0x4a0] sm:$0xff] }
 0x6fd   :  { %2804 = vmatprep.subr.bf16.mxu0 %v2357_v13  ;;  %2968 = vmatprep.subr.bf16.mxu1 %v2359_v16  ;;  %v2443_v13 = vld [vmem:[#allocation3 + $0x4b0] sm:$0xff]  ;;  %v2440_v16 = vld [vmem:[#allocation3 + $0x498] sm:$0xff] }
 0x700   :  { %2805 = vmatpush1.bf16.msra.mxu0 %v2356_v17  ;;  %2969 = vmatpush1.bf16.msra.mxu1 %v2358_v25  ;;  %v2442_v17 = vld [vmem:[#allocation3 + $0x4a8] sm:$0xff]  ;;  %v2448_v25 = vld [vmem:[#allocation3 + $0x4d8] sm:$0xff] }
 0x701   :  { %2806 = vmatprep.subr.bf16.mxu0 %v2364_v27  ;;  %2970 = vmatprep.subr.bf16.mxu1 %v2366_v56  ;;  %v2450_v27 = vld [vmem:[#allocation3 + $0x4e8] sm:$0xff]  ;;  %v2447_v56 = vld [vmem:[#allocation3 + $0x4d0] sm:$0xff] }
 0x704   :  { %2807 = vmatpush1.bf16.msra.mxu0 %v2363_v60  ;;  %2971 = vmatpush1.bf16.msra.mxu1 %v2365_v20  ;;  %v2449_v60 = vld [vmem:[#allocation3 + $0x4e0] sm:$0xff]  ;;  %v2455_v20 = vld [vmem:[#allocation3 + $0x510] sm:$0xff] }
 0x705   :  { %2808 = vmatprep.subr.bf16.mxu0 %v2371_v28  ;;  %2972 = vmatprep.subr.bf16.mxu1 %v2373_v29  ;;  %v2457_v28 = vld [vmem:[#allocation3 + $0x520] sm:$0xff]  ;;  %v2454_v29 = vld [vmem:[#allocation3 + $0x508] sm:$0xff] }
 0x708   :  { %2809 = vmatpush1.bf16.msra.mxu0 %v2370_v30  ;;  %2973 = vmatpush1.bf16.msra.mxu1 %v2372_v31  ;;  %v2456_v30 = vld [vmem:[#allocation3 + $0x518] sm:$0xff]  ;;  %v2462_v31 = vld [vmem:[#allocation3 + $0x548] sm:$0xff] }
 0x709   :  { %2810 = vmatprep.subr.bf16.mxu0 %v2378_v24  ;;  %2974 = vmatprep.subr.bf16.mxu1 %v2380_v52  ;;  %v2464_v24 = vld [vmem:[#allocation3 + $0x558] sm:$0xff]  ;;  %v2461_v52 = vld [vmem:[#allocation3 + $0x540] sm:$0xff] }
 0x70c   :  { %2811 = vmatpush1.bf16.msra.mxu0 %v2377_v53  ;;  %2975 = vmatpush1.bf16.msra.mxu1 %v2379_v54  ;;  %v2463_v53 = vld [vmem:[#allocation3 + $0x550] sm:$0xff]  ;;  %v2469_v54 = vld [vmem:[#allocation3 + $0x580] sm:$0xff] }
 0x70d   :  { %2812 = vmatprep.subr.bf16.mxu0 %v2385_v39  ;;  %2976 = vmatprep.subr.bf16.mxu1 %v2387_v55  ;;  %v2471_v39 = vld [vmem:[#allocation3 + $0x590] sm:$0xff]  ;;  %v2468_v55 = vld [vmem:[#allocation3 + $0x578] sm:$0xff] }
 0x710   :  { %2813 = vmatpush1.bf16.msra.mxu0 %v2384_v18  ;;  %2977 = vmatpush1.bf16.msra.mxu1 %v2386_v22  ;;  %v2470_v18 = vld [vmem:[#allocation3 + $0x588] sm:$0xff]  ;;  %v2476_v22 = vld [vmem:[#allocation3 + $0x5b8] sm:$0xff] }
 0x711   :  { %2814 = vmatprep.subr.bf16.mxu0 %v2392_v40  ;;  %2978 = vmatprep.subr.bf16.mxu1 %v2394_v46  ;;  %v2478_v40 = vld [vmem:[#allocation3 + $0x5c8] sm:$0xff]  ;;  %v2475_v46 = vld [vmem:[#allocation3 + $0x5b0] sm:$0xff] }
 0x714   :  { %2815 = vmatpush1.bf16.msra.mxu0 %v2391_v33  ;;  %2979 = vmatpush1.bf16.msra.mxu1 %v2393_v35  ;;  %v2477_v33 = vld [vmem:[#allocation3 + $0x5c0] sm:$0xff]  ;;  %v2483_v35 = vld [vmem:[#allocation3 + $0x5f0] sm:$0xff] }
 0x715   :  { %2816 = vmatprep.subr.bf16.mxu0 %v2399_v34  ;;  %2980 = vmatprep.subr.bf16.mxu1 %v2401_v37  ;;  %v2485_v34 = vld [vmem:[#allocation3 + $0x600] sm:$0xff]  ;;  %v2482_v37 = vld [vmem:[#allocation3 + $0x5e8] sm:$0xff] }
 0x718   :  { %2817 = vmatpush1.bf16.msra.mxu0 %v2398_v1  ;;  %2981 = vmatpush1.bf16.msra.mxu1 %v2400_v11  ;;  %v2484_v1 = vld [vmem:[#allocation3 + $0x5f8] sm:$0xff]  ;;  %v2490_v11 = vld [vmem:[#allocation3 + $0x628] sm:$0xff] }
 0x719   :  { %2827 = vmatprep.subr.bf16.mxu0 %v2406_v45  ;;  %2991 = vmatprep.subr.bf16.mxu1 %v2408_v4  ;;  %v2492_v45 = vld [vmem:[#allocation3 + $0x638] sm:$0xff]  ;;  %v2489_v4 = vld [vmem:[#allocation3 + $0x620] sm:$0xff] }
 0x71b   :  { %2819 = vmatmul.mubr.bf16.vlgmr.msra.gmra.mrb[12].mxu0 %v4751_v14  ;;  %2983 = vmatmul.mubr.bf16.vlgmr.msra.gmra.mrb[20].mxu1 %v4751_v14 }
 0x71c   :  { %2828 = vmatpush1.bf16.msra.mxu0 %v2405_v26  ;;  %2992 = vmatpush1.bf16.msra.mxu1 %v2407_v36  ;;  %v2491_v26 = vld [vmem:[#allocation3 + $0x630] sm:$0xff]  ;;  %v2497_v36 = vld [vmem:[#allocation3 + $0x660] sm:$0xff] }
 0x71d   :  { %2829 = vmatprep.subr.bf16.mxu0 %v2413_v15  ;;  %2993 = vmatprep.subr.bf16.mxu1 %v2415_v3  ;;  %v2499_v15 = vld [vmem:[#allocation3 + $0x670] sm:$0xff]  ;;  %v2496_v3 = vld [vmem:[#allocation3 + $0x658] sm:$0xff] }
 0x71e   :  { %2859 = vmatprep.mubr.bf16.mxu0 %v4755_v58  ;;  %3023 = vmatprep.mubr.bf16.mxu1 %v4755_v58 }
 0x720   :  { %2830 = vmatpush1.bf16.msra.mxu0 %v2412_v32  ;;  %2994 = vmatpush1.bf16.msra.mxu1 %v2414_v61  ;;  %v2498_v32 = vld [vmem:[#allocation3 + $0x668] sm:$0xff]  ;;  %v2504_v61 = vld [vmem:[#allocation3 + $0x698] sm:$0xff] }
 0x721   :  { %2831 = vmatprep.subr.bf16.mxu0 %v2420_v62  ;;  %2995 = vmatprep.subr.bf16.mxu1 %v2422_v5  ;;  %v2506_v62 = vld [vmem:[#allocation3 + $0x6a8] sm:$0xff]  ;;  %v2503_v5 = vld [vmem:[#allocation3 + $0x690] sm:$0xff] }
 0x724   :  { %2832 = vmatpush1.bf16.msra.mxu0 %v2419_v38  ;;  %2996 = vmatpush1.bf16.msra.mxu1 %v2421_v47  ;;  %v2505_v38 = vld [vmem:[#allocation3 + $0x6a0] sm:$0xff]  ;;  %v2511_v47 = vld [vmem:[#allocation3 + $0x6d0] sm:$0xff] }
 0x725   :  { %2833 = vmatprep.subr.bf16.mxu0 %v2427_v7  ;;  %2997 = vmatprep.subr.bf16.mxu1 %v2429_v63  ;;  %v2513_v7 = vld [vmem:[#allocation3 + $0x6e0] sm:$0xff]  ;;  %v2510_v63 = vld [vmem:[#allocation3 + $0x6c8] sm:$0xff] }
 0x728   :  { %2834 = vmatpush1.bf16.msra.mxu0 %v2426_v6  ;;  %2998 = vmatpush1.bf16.msra.mxu1 %v2428_v8  ;;  %v2512_v6 = vld [vmem:[#allocation3 + $0x6d8] sm:$0xff]  ;;  %v2518_v8 = vld [vmem:[#allocation3 + $0x708] sm:$0xff] }
 0x729   :  { %2835 = vmatprep.subr.bf16.mxu0 %v2434_v10  ;;  %2999 = vmatprep.subr.bf16.mxu1 %v2436_v51  ;;  %v2520_v10 = vld [vmem:[#allocation3 + $0x718] sm:$0xff]  ;;  %v4763_v51 = vpack.c.bf16 %v4728_v57, %v4728_v57 }
 0x72a   :  { %v2524_v57 = vld [vmem:[#allocation3 + $0x738] sm:$0xff] }
 0x72c   :  { %2836 = vmatpush1.bf16.msra.mxu0 %v2433_v59  ;;  %3000 = vmatpush1.bf16.msra.mxu1 %v2435_v41  ;;  %v2517_v59 = vld [vmem:[#allocation3 + $0x700] sm:$0xff]  ;;  %v2519_v41 = vld [vmem:[#allocation3 + $0x710] sm:$0xff] }
 0x72d   :  { %2837 = vmatprep.subr.bf16.mxu0 %v2441_v12  ;;  %3001 = vmatprep.subr.bf16.mxu1 %v2443_v13  ;;  %v2525_v12 = vld [vmem:[#allocation3 + $0x740] sm:$0xff]  ;;  %v2527_v13 = vld [vmem:[#allocation3 + $0x750] sm:$0xff] }
 0x730   :  { %2838 = vmatpush1.bf16.msra.mxu0 %v2440_v16  ;;  %3002 = vmatpush1.bf16.msra.mxu1 %v2442_v17  ;;  %v4767_v16 = vpack.c.bf16 %v4737_v49, %v4737_v49  ;;  %v2526_v17 = vld [vmem:[#allocation3 + $0x748] sm:$0xff]  ;;  %v2531_v49 = vld [vmem:[#allocation3 + $0x770] sm:$0xff] }
 0x731   :  { %2839 = vmatprep.subr.bf16.mxu0 %v2448_v25  ;;  %3003 = vmatprep.subr.bf16.mxu1 %v2450_v27  ;;  %v2532_v25 = vld [vmem:[#allocation3 + $0x778] sm:$0xff]  ;;  %v2534_v27 = vld [vmem:[#allocation3 + $0x788] sm:$0xff] }
 0x734   :  { %2840 = vmatpush1.bf16.msra.mxu0 %v2447_v56  ;;  %3004 = vmatpush1.bf16.msra.mxu1 %v2449_v60  ;;  %v2533_v56 = vld [vmem:[#allocation3 + $0x780] sm:$0xff]  ;;  %v2539_v60 = vld [vmem:[#allocation3 + $0x7b0] sm:$0xff] }
 0x735   :  { %2841 = vmatprep.subr.bf16.mxu0 %v2455_v20  ;;  %3005 = vmatprep.subr.bf16.mxu1 %v2457_v28  ;;  %v2541_v20 = vld [vmem:[#allocation3 + $0x7c0] sm:$0xff]  ;;  %v2538_v28 = vld [vmem:[#allocation3 + $0x7a8] sm:$0xff] }
 0x738   :  { %2842 = vmatpush1.bf16.msra.mxu0 %v2454_v29  ;;  %3006 = vmatpush1.bf16.msra.mxu1 %v2456_v30  ;;  %v2540_v29 = vld [vmem:[#allocation3 + $0x7b8] sm:$0xff]  ;;  %v2546_v30 = vld [vmem:[#allocation3 + $0x7e8] sm:$0xff] }
 0x739   :  { %2843 = vmatprep.subr.bf16.mxu0 %v2462_v31  ;;  %3007 = vmatprep.subr.bf16.mxu1 %v2464_v24  ;;  %v2548_v31 = vld [vmem:[#allocation3 + $0x7f8] sm:$0xff]  ;;  %v2545_v24 = vld [vmem:[#allocation3 + $0x7e0] sm:$0xff] }
 0x73c   :  { %2844 = vmatpush1.bf16.msra.mxu0 %v2461_v52  ;;  %3008 = vmatpush1.bf16.msra.mxu1 %v2463_v53  ;;  %v2547_v52 = vld [vmem:[#allocation3 + $0x7f0] sm:$0xff]  ;;  %v2553_v53 = vld [vmem:[#allocation3 + $0x820] sm:$0xff] }
 0x73d   :  { %2845 = vmatprep.subr.bf16.mxu0 %v2469_v54  ;;  %3009 = vmatprep.subr.bf16.mxu1 %v2471_v39  ;;  %v2555_v54 = vld [vmem:[#allocation3 + $0x830] sm:$0xff]  ;;  %v2552_v39 = vld [vmem:[#allocation3 + $0x818] sm:$0xff] }
 0x740   :  { %2846 = vmatpush1.bf16.msra.mxu0 %v2468_v55  ;;  %3010 = vmatpush1.bf16.msra.mxu1 %v2470_v18  ;;  %v2554_v55 = vld [vmem:[#allocation3 + $0x828] sm:$0xff]  ;;  %v2560_v18 = vld [vmem:[#allocation3 + $0x858] sm:$0xff] }
 0x741   :  { %2847 = vmatprep.subr.bf16.mxu0 %v2476_v22  ;;  %3011 = vmatprep.subr.bf16.mxu1 %v2478_v40  ;;  %v2562_v22 = vld [vmem:[#allocation3 + $0x868] sm:$0xff]  ;;  %v2559_v40 = vld [vmem:[#allocation3 + $0x850] sm:$0xff] }
 0x744   :  { %2848 = vmatpush1.bf16.msra.mxu0 %v2475_v46  ;;  %3012 = vmatpush1.bf16.msra.mxu1 %v2477_v33  ;;  %v2561_v46 = vld [vmem:[#allocation3 + $0x860] sm:$0xff]  ;;  %v2567_v33 = vld [vmem:[#allocation3 + $0x890] sm:$0xff] }
 0x745   :  { %2849 = vmatprep.subr.bf16.mxu0 %v2483_v35  ;;  %3013 = vmatprep.subr.bf16.mxu1 %v2485_v34  ;;  %v2569_v35 = vld [vmem:[#allocation3 + $0x8a0] sm:$0xff]  ;;  %v2566_v34 = vld [vmem:[#allocation3 + $0x888] sm:$0xff] }
 0x748   :  { %2850 = vmatpush1.bf16.msra.mxu0 %v2482_v37  ;;  %3014 = vmatpush1.bf16.msra.mxu1 %v2484_v1  ;;  %v2568_v37 = vld [vmem:[#allocation3 + $0x898] sm:$0xff]  ;;  %v2574_v1 = vld [vmem:[#allocation3 + $0x8c8] sm:$0xff] }
 0x749   :  { %2851 = vmatprep.subr.bf16.mxu0 %v2490_v11  ;;  %3015 = vmatprep.subr.bf16.mxu1 %v2492_v45  ;;  %v2576_v11 = vld [vmem:[#allocation3 + $0x8d8] sm:$0xff]  ;;  %v2573_v45 = vld [vmem:[#allocation3 + $0x8c0] sm:$0xff] }
 0x74c   :  { %2852 = vmatpush1.bf16.msra.mxu0 %v2489_v4  ;;  %3016 = vmatpush1.bf16.msra.mxu1 %v2491_v26  ;;  %v2575_v4 = vld [vmem:[#allocation3 + $0x8d0] sm:$0xff]  ;;  %v2581_v26 = vld [vmem:[#allocation3 + $0x900] sm:$0xff] }
 0x74d   :  { %2853 = vmatprep.subr.bf16.mxu0 %v2497_v36  ;;  %3017 = vmatprep.subr.bf16.mxu1 %v2499_v15  ;;  %v2583_v36 = vld [vmem:[#allocation3 + $0x910] sm:$0xff]  ;;  %v2580_v15 = vld [vmem:[#allocation3 + $0x8f8] sm:$0xff] }
 0x750   :  { %2854 = vmatpush1.bf16.msra.mxu0 %v2496_v3  ;;  %3018 = vmatpush1.bf16.msra.mxu1 %v2498_v32  ;;  %v2582_v3 = vld [vmem:[#allocation3 + $0x908] sm:$0xff]  ;;  %v2588_v32 = vld [vmem:[#allocation3 + $0x938] sm:$0xff] }
 0x751   :  { %2855 = vmatprep.subr.bf16.mxu0 %v2504_v61  ;;  %3019 = vmatprep.subr.bf16.mxu1 %v2506_v62  ;;  %v2590_v61 = vld [vmem:[#allocation3 + $0x948] sm:$0xff]  ;;  %v2587_v62 = vld [vmem:[#allocation3 + $0x930] sm:$0xff] }
 0x754   :  { %2856 = vmatpush1.bf16.msra.mxu0 %v2503_v5  ;;  %3020 = vmatpush1.bf16.msra.mxu1 %v2505_v38  ;;  %v2589_v5 = vld [vmem:[#allocation3 + $0x940] sm:$0xff]  ;;  %v2595_v38 = vld [vmem:[#allocation3 + $0x970] sm:$0xff] }
 0x755   :  { %2857 = vmatprep.subr.bf16.mxu0 %v2511_v47  ;;  %3021 = vmatprep.subr.bf16.mxu1 %v2513_v7  ;;  %v2597_v47 = vld [vmem:[#allocation3 + $0x980] sm:$0xff]  ;;  %v2594_v7 = vld [vmem:[#allocation3 + $0x968] sm:$0xff] }
 0x758   :  { %2858 = vmatpush1.bf16.msra.mxu0 %v2510_v63  ;;  %3022 = vmatpush1.bf16.msra.mxu1 %v2512_v6  ;;  %v2596_v63 = vld [vmem:[#allocation3 + $0x978] sm:$0xff]  ;;  %v2602_v6 = vld [vmem:[#allocation3 + $0x9a8] sm:$0xff] }
 0x759   :  { %2868 = vmatprep.subr.bf16.mxu0 %v2518_v8  ;;  %3032 = vmatprep.subr.bf16.mxu1 %v2520_v10  ;;  %v2604_v8 = vld [vmem:[#allocation3 + $0x9b8] sm:$0xff]  ;;  %v2601_v10 = vld [vmem:[#allocation3 + $0x9a0] sm:$0xff] }
 0x75b   :  { %2860 = vmatmul.mubr.bf16.vlgmr.msra.gmra.mrb[12].mxu0 %v4763_v51  ;;  %3024 = vmatmul.mubr.bf16.vlgmr.msra.gmra.mrb[20].mxu1 %v4763_v51 }
 0x75c   :  { %2869 = vmatpush1.bf16.msra.mxu0 %v2517_v59  ;;  %3033 = vmatpush1.bf16.msra.mxu1 %v2519_v41  ;;  %v2603_v59 = vld [vmem:[#allocation3 + $0x9b0] sm:$0xff]  ;;  %v2609_v41 = vld [vmem:[#allocation3 + $0x9e0] sm:$0xff] }
 0x75d   :  { %2870 = vmatprep.subr.bf16.mxu0 %v2525_v12  ;;  %3034 = vmatprep.subr.bf16.mxu1 %v2527_v13  ;;  %v2611_v12 = vld [vmem:[#allocation3 + $0x9f0] sm:$0xff]  ;;  %v2608_v13 = vld [vmem:[#allocation3 + $0x9d8] sm:$0xff] }
 0x75e   :  { %2900 = vmatprep.mubr.bf16.mxu0 %v4767_v16  ;;  %3064 = vmatprep.mubr.bf16.mxu1 %v4767_v16 }
 0x760   :  { %2871 = vmatpush1.bf16.msra.mxu0 %v2524_v57  ;;  %3035 = vmatpush1.bf16.msra.mxu1 %v2526_v17  ;;  %v2610_v57 = vld [vmem:[#allocation3 + $0x9e8] sm:$0xff]  ;;  %v2616_v17 = vld [vmem:[#allocation3 + $0xa18] sm:$0xff] }
 0x761   :  { %2872 = vmatprep.subr.bf16.mxu0 %v2532_v25  ;;  %3036 = vmatprep.subr.bf16.mxu1 %v2534_v27  ;;  %v2618_v25 = vld [vmem:[#allocation3 + $0xa28] sm:$0xff]  ;;  %v2615_v27 = vld [vmem:[#allocation3 + $0xa10] sm:$0xff] }
 0x764   :  { %2873 = vmatpush1.bf16.msra.mxu0 %v2531_v49  ;;  %3037 = vmatpush1.bf16.msra.mxu1 %v2533_v56  ;;  %v2617_v49 = vld [vmem:[#allocation3 + $0xa20] sm:$0xff]  ;;  %v2623_v56 = vld [vmem:[#allocation3 + $0xa50] sm:$0xff] }
 0x765   :  { %2874 = vmatprep.subr.bf16.mxu0 %v2539_v60  ;;  %3038 = vmatprep.subr.bf16.mxu1 %v2541_v20  ;;  %v2625_v60 = vld [vmem:[#allocation3 + $0xa60] sm:$0xff]  ;;  %v2622_v20 = vld [vmem:[#allocation3 + $0xa48] sm:$0xff] }
 0x768   :  { %2875 = vmatpush1.bf16.msra.mxu0 %v2538_v28  ;;  %3039 = vmatpush1.bf16.msra.mxu1 %v2540_v29  ;;  %v2624_v28 = vld [vmem:[#allocation3 + $0xa58] sm:$0xff]  ;;  %v2630_v29 = vld [vmem:[#allocation3 + $0xa88] sm:$0xff] }
 0x769   :  { %2876 = vmatprep.subr.bf16.mxu0 %v2546_v30  ;;  %3040 = vmatprep.subr.bf16.mxu1 %v2548_v31  ;;  %v2632_v30 = vld [vmem:[#allocation3 + $0xa98] sm:$0xff]  ;;  %v4775_v31 = vpack.c.bf16 %v4734_v48, %v4734_v48 }
 0x76a   :  { %v2636_v48 = vld [vmem:[#allocation3 + $0xab8] sm:$0xff] }
 0x76c   :  { %2877 = vmatpush1.bf16.msra.mxu0 %v2545_v24  ;;  %3041 = vmatpush1.bf16.msra.mxu1 %v2547_v52  ;;  %v2629_v24 = vld [vmem:[#allocation3 + $0xa80] sm:$0xff]  ;;  %v2631_v52 = vld [vmem:[#allocation3 + $0xa90] sm:$0xff] }
 0x76d   :  { %2878 = vmatprep.subr.bf16.mxu0 %v2553_v53  ;;  %3042 = vmatprep.subr.bf16.mxu1 %v2555_v54  ;;  %v2637_v53 = vld [vmem:[#allocation3 + $0xac0] sm:$0xff]  ;;  %v2639_v54 = vld [vmem:[#allocation3 + $0xad0] sm:$0xff] }
 0x770   :  { %2879 = vmatpush1.bf16.msra.mxu0 %v2552_v39  ;;  %3043 = vmatpush1.bf16.msra.mxu1 %v2554_v55  ;;  %v4779_v39 = vpack.c.bf16 %v4743_v50, %v4743_v50  ;;  %v2638_v55 = vld [vmem:[#allocation3 + $0xac8] sm:$0xff]  ;;  %v2643_v50 = vld [vmem:[#allocation3 + $0xaf0] sm:$0xff] }
 0x771   :  { %2880 = vmatprep.subr.bf16.mxu0 %v2560_v18  ;;  %3044 = vmatprep.subr.bf16.mxu1 %v2562_v22  ;;  %v2644_v18 = vld [vmem:[#allocation3 + $0xaf8] sm:$0xff]  ;;  %v2646_v22 = vld [vmem:[#allocation3 + $0xb08] sm:$0xff] }
 0x774   :  { %2881 = vmatpush1.bf16.msra.mxu0 %v2559_v40  ;;  %3045 = vmatpush1.bf16.msra.mxu1 %v2561_v46  ;;  %v2645_v40 = vld [vmem:[#allocation3 + $0xb00] sm:$0xff]  ;;  %v2651_v46 = vld [vmem:[#allocation3 + $0xb30] sm:$0xff] }
 0x775   :  { %2882 = vmatprep.subr.bf16.mxu0 %v2567_v33  ;;  %3046 = vmatprep.subr.bf16.mxu1 %v2569_v35  ;;  %v2653_v33 = vld [vmem:[#allocation3 + $0xb40] sm:$0xff]  ;;  %v2650_v35 = vld [vmem:[#allocation3 + $0xb28] sm:$0xff] }
 0x778   :  { %2883 = vmatpush1.bf16.msra.mxu0 %v2566_v34  ;;  %3047 = vmatpush1.bf16.msra.mxu1 %v2568_v37  ;;  %v2652_v34 = vld [vmem:[#allocation3 + $0xb38] sm:$0xff]  ;;  %v2658_v37 = vld [vmem:[#allocation3 + $0xb68] sm:$0xff] }
 0x779   :  { %2884 = vmatprep.subr.bf16.mxu0 %v2574_v1  ;;  %3048 = vmatprep.subr.bf16.mxu1 %v2576_v11  ;;  %v2660_v1 = vld [vmem:[#allocation3 + $0xb78] sm:$0xff]  ;;  %v2657_v11 = vld [vmem:[#allocation3 + $0xb60] sm:$0xff] }
 0x77c   :  { %2885 = vmatpush1.bf16.msra.mxu0 %v2573_v45  ;;  %3049 = vmatpush1.bf16.msra.mxu1 %v2575_v4  ;;  %v2659_v45 = vld [vmem:[#allocation3 + $0xb70] sm:$0xff]  ;;  %v2665_v4 = vld [vmem:[#allocation3 + $0xba0] sm:$0xff] }
 0x77d   :  { %2886 = vmatprep.subr.bf16.mxu0 %v2581_v26  ;;  %3050 = vmatprep.subr.bf16.mxu1 %v2583_v36  ;;  %v2667_v26 = vld [vmem:[#allocation3 + $0xbb0] sm:$0xff]  ;;  %v2664_v36 = vld [vmem:[#allocation3 + $0xb98] sm:$0xff] }
 0x780   :  { %2887 = vmatpush1.bf16.msra.mxu0 %v2580_v15  ;;  %3051 = vmatpush1.bf16.msra.mxu1 %v2582_v3  ;;  %v2666_v15 = vld [vmem:[#allocation3 + $0xba8] sm:$0xff]  ;;  %v2672_v3 = vld [vmem:[#allocation3 + $0xbd8] sm:$0xff] }
 0x781   :  { %2888 = vmatprep.subr.bf16.mxu0 %v2588_v32  ;;  %3052 = vmatprep.subr.bf16.mxu1 %v2590_v61  ;;  %v2674_v32 = vld [vmem:[#allocation3 + $0xbe8] sm:$0xff]  ;;  %v2671_v61 = vld [vmem:[#allocation3 + $0xbd0] sm:$0xff] }
 0x784   :  { %2889 = vmatpush1.bf16.msra.mxu0 %v2587_v62  ;;  %3053 = vmatpush1.bf16.msra.mxu1 %v2589_v5  ;;  %v2673_v62 = vld [vmem:[#allocation3 + $0xbe0] sm:$0xff]  ;;  %v2679_v5 = vld [vmem:[#allocation3 + $0xc10] sm:$0xff] }
 0x785   :  { %2890 = vmatprep.subr.bf16.mxu0 %v2595_v38  ;;  %3054 = vmatprep.subr.bf16.mxu1 %v2597_v47  ;;  %v2681_v38 = vld [vmem:[#allocation3 + $0xc20] sm:$0xff]  ;;  %v2678_v47 = vld [vmem:[#allocation3 + $0xc08] sm:$0xff] }
 0x788   :  { %2891 = vmatpush1.bf16.msra.mxu0 %v2594_v7  ;;  %3055 = vmatpush1.bf16.msra.mxu1 %v2596_v63  ;;  %v2680_v7 = vld [vmem:[#allocation3 + $0xc18] sm:$0xff]  ;;  %v2686_v63 = vld [vmem:[#allocation3 + $0xc48] sm:$0xff] }
 0x789   :  { %2892 = vmatprep.subr.bf16.mxu0 %v2602_v6  ;;  %3056 = vmatprep.subr.bf16.mxu1 %v2604_v8  ;;  %v2688_v6 = vld [vmem:[#allocation3 + $0xc58] sm:$0xff]  ;;  %v2685_v8 = vld [vmem:[#allocation3 + $0xc40] sm:$0xff] }
 0x78c   :  { %2893 = vmatpush1.bf16.msra.mxu0 %v2601_v10  ;;  %3057 = vmatpush1.bf16.msra.mxu1 %v2603_v59  ;;  %v2687_v10 = vld [vmem:[#allocation3 + $0xc50] sm:$0xff]  ;;  %v2693_v59 = vld [vmem:[#allocation3 + $0xc80] sm:$0xff] }
 0x78d   :  { %2894 = vmatprep.subr.bf16.mxu0 %v2609_v41  ;;  %3058 = vmatprep.subr.bf16.mxu1 %v2611_v12  ;;  %v2695_v41 = vld [vmem:[#allocation3 + $0xc90] sm:$0xff]  ;;  %v2692_v12 = vld [vmem:[#allocation3 + $0xc78] sm:$0xff] }
 0x790   :  { %2895 = vmatpush1.bf16.msra.mxu0 %v2608_v13  ;;  %3059 = vmatpush1.bf16.msra.mxu1 %v2610_v57  ;;  %v2694_v13 = vld [vmem:[#allocation3 + $0xc88] sm:$0xff]  ;;  %v2700_v57 = vld [vmem:[#allocation3 + $0xcb8] sm:$0xff] }
 0x791   :  { %2896 = vmatprep.subr.bf16.mxu0 %v2616_v17  ;;  %3060 = vmatprep.subr.bf16.mxu1 %v2618_v25  ;;  %v2702_v17 = vld [vmem:[#allocation3 + $0xcc8] sm:$0xff]  ;;  %v2699_v25 = vld [vmem:[#allocation3 + $0xcb0] sm:$0xff] }
 0x794   :  { %2897 = vmatpush1.bf16.msra.mxu0 %v2615_v27  ;;  %3061 = vmatpush1.bf16.msra.mxu1 %v2617_v49  ;;  %v2701_v27 = vld [vmem:[#allocation3 + $0xcc0] sm:$0xff]  ;;  %v2707_v49 = vld [vmem:[#allocation3 + $0xcf0] sm:$0xff] }
 0x795   :  { %2898 = vmatprep.subr.bf16.mxu0 %v2623_v56  ;;  %3062 = vmatprep.subr.bf16.mxu1 %v2625_v60  ;;  %v2709_v56 = vld [vmem:[#allocation3 + $0xd00] sm:$0xff]  ;;  %v2706_v60 = vld [vmem:[#allocation3 + $0xce8] sm:$0xff] }
 0x798   :  { %2899 = vmatpush1.bf16.msra.mxu0 %v2622_v20  ;;  %3063 = vmatpush1.bf16.msra.mxu1 %v2624_v28  ;;  %v2708_v20 = vld [vmem:[#allocation3 + $0xcf8] sm:$0xff]  ;;  %v2714_v28 = vld [vmem:[#allocation3 + $0xd28] sm:$0xff] }
 0x799   :  { %2909 = vmatprep.subr.bf16.mxu0 %v2630_v29  ;;  %3073 = vmatprep.subr.bf16.mxu1 %v2632_v30  ;;  %v2716_v29 = vld [vmem:[#allocation3 + $0xd38] sm:$0xff]  ;;  %v2713_v30 = vld [vmem:[#allocation3 + $0xd20] sm:$0xff] }
 0x79b   :  { %2901 = vmatmul.mubr.bf16.vlgmr.msra.gmra.mrb[12].mxu0 %v4775_v31  ;;  %3065 = vmatmul.mubr.bf16.vlgmr.msra.gmra.mrb[20].mxu1 %v4775_v31 }
 0x79c   :  { %2910 = vmatpush1.bf16.msra.mxu0 %v2629_v24  ;;  %3074 = vmatpush1.bf16.msra.mxu1 %v2631_v52  ;;  %v2715_v24 = vld [vmem:[#allocation3 + $0xd30] sm:$0xff]  ;;  %v2721_v52 = vld [vmem:[#allocation3 + $0xd60] sm:$0xff] }
 0x79d   :  { %2911 = vmatprep.subr.bf16.mxu0 %v2637_v53  ;;  %3075 = vmatprep.subr.bf16.mxu1 %v2639_v54  ;;  %v2723_v53 = vld [vmem:[#allocation3 + $0xd70] sm:$0xff]  ;;  %v2720_v54 = vld [vmem:[#allocation3 + $0xd58] sm:$0xff] }
 0x79e   :  { %2941 = vmatprep.mubr.bf16.mxu0 %v4779_v39  ;;  %3105 = vmatprep.mubr.bf16.mxu1 %v4779_v39 }
 0x7a0   :  { %2912 = vmatpush1.bf16.msra.mxu0 %v2636_v48  ;;  %3076 = vmatpush1.bf16.msra.mxu1 %v2638_v55  ;;  %v2722_v48 = vld [vmem:[#allocation3 + $0xd68] sm:$0xff]  ;;  %v2728_v55 = vld [vmem:[#allocation3 + $0xd98] sm:$0xff] }
 0x7a1   :  { %2913 = vmatprep.subr.bf16.mxu0 %v2644_v18  ;;  %3077 = vmatprep.subr.bf16.mxu1 %v2646_v22  ;;  %v2730_v18 = vld [vmem:[#allocation3 + $0xda8] sm:$0xff]  ;;  %v2727_v22 = vld [vmem:[#allocation3 + $0xd90] sm:$0xff] }
 0x7a4   :  { %2914 = vmatpush1.bf16.msra.mxu0 %v2643_v50  ;;  %3078 = vmatpush1.bf16.msra.mxu1 %v2645_v40  ;;  %v2729_v50 = vld [vmem:[#allocation3 + $0xda0] sm:$0xff]  ;;  %v2735_v40 = vld [vmem:[#allocation3 + $0xdd0] sm:$0xff] }
 0x7a5   :  { %2915 = vmatprep.subr.bf16.mxu0 %v2651_v46  ;;  %3079 = vmatprep.subr.bf16.mxu1 %v2653_v33  ;;  %v2737_v46 = vld [vmem:[#allocation3 + $0xde0] sm:$0xff]  ;;  %v2734_v33 = vld [vmem:[#allocation3 + $0xdc8] sm:$0xff] }
 0x7a8   :  { %2916 = vmatpush1.bf16.msra.mxu0 %v2650_v35  ;;  %3080 = vmatpush1.bf16.msra.mxu1 %v2652_v34  ;;  %v2736_v35 = vld [vmem:[#allocation3 + $0xdd8] sm:$0xff]  ;;  %v2298_v34 = vld [vmem:[#allocation3 + $0x28] sm:$0xff] }
 0x7a9   :  { %2917 = vmatprep.subr.bf16.mxu0 %v2658_v37  ;;  %3081 = vmatprep.subr.bf16.mxu1 %v2660_v1  ;;  %v2355_v37 = vld [vmem:[#allocation3 + $0x1f0] sm:$0xff]  ;;  %v4787_v1 = vpack.c.bf16 %v4740_v21, %v4740_v21  ;;  %v2312_v21 = vld [vmem:[#allocation3 + $0x98] sm:$0xff] }
 0x7ac   :  { %2918 = vmatpush1.bf16.msra.mxu0 %v2657_v11  ;;  %3082 = vmatpush1.bf16.msra.mxu1 %v2659_v45  ;;  %v2297_v11 = vld [vmem:[#allocation3 + $0x20] sm:$0xff]  ;;  %v2299_v45 = vld [vmem:[#allocation3 + $0x30] sm:$0xff] }
 0x7ad   :  { %2919 = vmatprep.subr.bf16.mxu0 %v2665_v4  ;;  %3083 = vmatprep.subr.bf16.mxu1 %v2667_v26  ;;  %v2305_v4 = vld [vmem:[#allocation3 + $0x60] sm:$0xff]  ;;  %v2362_v26 = vld [vmem:[#allocation3 + $0x228] sm:$0xff] }
 0x7b0   :  { %2920 = vmatpush1.bf16.msra.mxu0 %v2664_v36  ;;  %3084 = vmatpush1.bf16.msra.mxu1 %v2666_v15  ;;  %v2304_v36 = vld [vmem:[#allocation3 + $0x58] sm:$0xff]  ;;  %v2306_v15 = vld [vmem:[#allocation3 + $0x68] sm:$0xff] }
 0x7b1   :  { %2921 = vmatprep.subr.bf16.mxu0 %v2672_v3  ;;  %3085 = vmatprep.subr.bf16.mxu1 %v2674_v32  ;;  %v2369_v3 = vld [vmem:[#allocation3 + $0x260] sm:$0xff]  ;;  %v2311_v32 = vld [vmem:[#allocation3 + $0x90] sm:$0xff] }
 0x7b4   :  { %2922 = vmatpush1.bf16.msra.mxu0 %v2671_v61  ;;  %3086 = vmatpush1.bf16.msra.mxu1 %v2673_v62  ;;  %v2313_v61 = vld [vmem:[#allocation3 + $0xa0] sm:$0xff]  ;;  %v2319_v62 = vld [vmem:[#allocation3 + $0xd0] sm:$0xff] }
 0x7b5   :  { %2923 = vmatprep.subr.bf16.mxu0 %v2679_v5  ;;  %3087 = vmatprep.subr.bf16.mxu1 %v2681_v38  ;;  %v2376_v5 = vld [vmem:[#allocation3 + $0x298] sm:$0xff]  ;;  %v2318_v38 = vld [vmem:[#allocation3 + $0xc8] sm:$0xff] }
 0x7b8   :  { %2924 = vmatpush1.bf16.msra.mxu0 %v2678_v47  ;;  %3088 = vmatpush1.bf16.msra.mxu1 %v2680_v7  ;;  %v2320_v47 = vld [vmem:[#allocation3 + $0xd8] sm:$0xff]  ;;  %v2326_v7 = vld [vmem:[#allocation3 + $0x108] sm:$0xff] }
 0x7b9   :  { %2925 = vmatprep.subr.bf16.mxu0 %v2686_v63  ;;  %3089 = vmatprep.subr.bf16.mxu1 %v2688_v6  ;;  %v2383_v63 = vld [vmem:[#allocation3 + $0x2d0] sm:$0xff] }
 0x7ba   :  { %v2327_v6 = vld [vmem:[#allocation3 + $0x110] sm:$0xff] }
 0x7bc   :  { %2926 = vmatpush1.bf16.msra.mxu0 %v2685_v8  ;;  %3090 = vmatpush1.bf16.msra.mxu1 %v2687_v10  ;;  %v2333_v8 = vld [vmem:[#allocation3 + $0x140] sm:$0xff]  ;;  %v2390_v10 = vld [vmem:[#allocation3 + $0x308] sm:$0xff] }
 0x7bd   :  { %2927 = vmatprep.subr.bf16.mxu0 %v2693_v59  ;;  %3091 = vmatprep.subr.bf16.mxu1 %v2695_v41  ;;  %v2332_v59 = vld [vmem:[#allocation3 + $0x138] sm:$0xff]  ;;  %v2334_v41 = vld [vmem:[#allocation3 + $0x148] sm:$0xff] }
 0x7c0   :  { %2928 = vmatpush1.bf16.msra.mxu0 %v2692_v12  ;;  %3092 = vmatpush1.bf16.msra.mxu1 %v2694_v13  ;;  %v2340_v12 = vld [vmem:[#allocation3 + $0x178] sm:$0xff]  ;;  %v2397_v13 = vld [vmem:[#allocation3 + $0x340] sm:$0xff] }
 0x7c1   :  { %2929 = vmatprep.subr.bf16.mxu0 %v2700_v57  ;;  %3093 = vmatprep.subr.bf16.mxu1 %v2702_v17  ;;  %v2339_v57 = vld [vmem:[#allocation3 + $0x170] sm:$0xff]  ;;  %v2341_v17 = vld [vmem:[#allocation3 + $0x180] sm:$0xff] }
 0x7c4   :  { %2930 = vmatpush1.bf16.msra.mxu0 %v2699_v25  ;;  %3094 = vmatpush1.bf16.msra.mxu1 %v2701_v27  ;;  %v2347_v25 = vld [vmem:[#allocation3 + $0x1b0] sm:$0xff]  ;;  %v2404_v27 = vld [vmem:[#allocation3 + $0x378] sm:$0xff] }
 0x7c5   :  { %2931 = vmatprep.subr.bf16.mxu0 %v2707_v49  ;;  %3095 = vmatprep.subr.bf16.mxu1 %v2709_v56  ;;  %v2346_v49 = vld [vmem:[#allocation3 + $0x1a8] sm:$0xff]  ;;  %v2348_v56 = vld [vmem:[#allocation3 + $0x1b8] sm:$0xff] }
 0x7c8   :  { %2932 = vmatpush1.bf16.msra.mxu0 %v2706_v60  ;;  %3096 = vmatpush1.bf16.msra.mxu1 %v2708_v20  ;;  %v2354_v60 = vld [vmem:[#allocation3 + $0x1e8] sm:$0xff]  ;;  %v2467_v20 = vld [vmem:[#allocation3 + $0x570] sm:$0xff] }
 0x7c9   :  { %2933 = vmatprep.subr.bf16.mxu0 %v2714_v28  ;;  %3097 = vmatprep.subr.bf16.mxu1 %v2716_v29  ;;  %v2353_v28 = vld [vmem:[#allocation3 + $0x1e0] sm:$0xff]  ;;  %v2411_v29 = vld [vmem:[#allocation3 + $0x3b0] sm:$0xff] }
 0x7cc   :  { %2934 = vmatpush1.bf16.msra.mxu0 %v2713_v30  ;;  %3098 = vmatpush1.bf16.msra.mxu1 %v2715_v24  ;;  %v2361_v30 = vld [vmem:[#allocation3 + $0x220] sm:$0xff]  ;;  %v2474_v24 = vld [vmem:[#allocation3 + $0x5a8] sm:$0xff] }
 0x7cd   :  { %2935 = vmatprep.subr.bf16.mxu0 %v2721_v52  ;;  %3099 = vmatprep.subr.bf16.mxu1 %v2723_v53  ;;  %v2360_v52 = vld [vmem:[#allocation3 + $0x218] sm:$0xff]  ;;  %v2418_v53 = vld [vmem:[#allocation3 + $0x3e8] sm:$0xff] }
 0x7d0   :  { %2936 = vmatpush1.bf16.msra.mxu0 %v2720_v54  ;;  %3100 = vmatpush1.bf16.msra.mxu1 %v2722_v48  ;;  %v2368_v54 = vld [vmem:[#allocation3 + $0x258] sm:$0xff]  ;;  %v2481_v48 = vld [vmem:[#allocation3 + $0x5e0] sm:$0xff] }
 0x7d1   :  { %2937 = vmatprep.subr.bf16.mxu0 %v2728_v55  ;;  %3101 = vmatprep.subr.bf16.mxu1 %v2730_v18  ;;  %v2367_v55 = vld [vmem:[#allocation3 + $0x250] sm:$0xff]  ;;  %v2425_v18 = vld [vmem:[#allocation3 + $0x420] sm:$0xff] }
 0x7d4   :  { %2938 = vmatpush1.bf16.msra.mxu0 %v2727_v22  ;;  %3102 = vmatpush1.bf16.msra.mxu1 %v2729_v50  ;;  %v2375_v22 = vld [vmem:[#allocation3 + $0x290] sm:$0xff]  ;;  %v2488_v50 = vld [vmem:[#allocation3 + $0x618] sm:$0xff] }
 0x7d5   :  { %2939 = vmatprep.subr.bf16.mxu0 %v2735_v40  ;;  %3103 = vmatprep.subr.bf16.mxu1 %v2737_v46  ;;  %v2374_v40 = vld [vmem:[#allocation3 + $0x288] sm:$0xff]  ;;  %v2432_v46 = vld [vmem:[#allocation3 + $0x458] sm:$0xff] }
 0x7d8   :  { %2940 = vmatpush1.bf16.msra.mxu0 %v2734_v33  ;;  %3104 = vmatpush1.bf16.msra.mxu1 %v2736_v35  ;;  %v2382_v33 = vld [vmem:[#allocation3 + $0x2c8] sm:$0xff]  ;;  %v2495_v35 = vld [vmem:[#allocation3 + $0x650] sm:$0xff] }
 0x7d9   :  { %3114 = vmatprep.subr.bf16.mxu0 %v2298_v34  ;;  %3580 = vmatprep.subr.bf16.mxu1 %v2355_v37  ;;  %v2381_v34 = vld [vmem:[#allocation3 + $0x2c0] sm:$0xff]  ;;  %v2439_v37 = vld [vmem:[#allocation3 + $0x490] sm:$0xff] }
 0x7db   :  { %2942 = vmatmul.mubr.bf16.vlgmr.msra.gmra.mrb[12].mxu0 %v4787_v1  ;;  %3106 = vmatmul.mubr.bf16.vlgmr.msra.gmra.mrb[20].mxu1 %v4787_v1 }
 0x7dc   :  { %3115 = vmatpush1.bf16.msra.mxu0 %v2297_v11  ;;  %3581 = vmatpush3.bf16.msra.mxu1 %v2299_v45  ;;  %v2389_v11 = vld [vmem:[#allocation3 + $0x300] sm:$0xff]  ;;  %v2502_v45 = vld [vmem:[#allocation3 + $0x688] sm:$0xff] }
 0x7dd   :  { %3116 = vmatprep.subr.bf16.mxu0 %v2305_v4  ;;  %3582 = vmatprep.subr.bf16.mxu1 %v2362_v26  ;;  %v2388_v4 = vld [vmem:[#allocation3 + $0x2f8] sm:$0xff]  ;;  %v2446_v26 = vld [vmem:[#allocation3 + $0x4c8] sm:$0xff] }
 0x7de   :  { %3146 = vmatprep.mubr.bf16.mxu0 %v4745_v44  ;;  %3310 = vmatprep.mubr.bf16.mxu1 %v4745_v44  ;;  %v2325_v44 = vld [vmem:[#allocation3 + $0x100] sm:$0xff] }
 0x7e0   :  { %3117 = vmatpush1.bf16.msra.mxu0 %v2304_v36  ;;  %3583 = vmatpush3.bf16.msra.mxu1 %v2306_v15  ;;  %v2396_v36 = vld [vmem:[#allocation3 + $0x338] sm:$0xff]  ;;  %v2509_v15 = vld [vmem:[#allocation3 + $0x6c0] sm:$0xff] }
 0x7e1   :  { %3118 = vmatprep.subr.bf16.mxu0 %v2312_v21  ;;  %3584 = vmatprep.subr.bf16.mxu1 %v2369_v3  ;;  %v2395_v21 = vld [vmem:[#allocation3 + $0x330] sm:$0xff]  ;;  %v2453_v3 = vld [vmem:[#allocation3 + $0x500] sm:$0xff] }
 0x7e4   :  { %3119 = vmatpush1.bf16.msra.mxu0 %v2311_v32  ;;  %3585 = vmatpush3.bf16.msra.mxu1 %v2313_v61  ;;  %v2403_v32 = vld [vmem:[#allocation3 + $0x370] sm:$0xff]  ;;  %v2516_v61 = vld [vmem:[#allocation3 + $0x6f8] sm:$0xff] }
 0x7e5   :  { %3120 = vmatprep.subr.bf16.mxu0 %v2319_v62  ;;  %3586 = vmatprep.subr.bf16.mxu1 %v2376_v5  ;;  %v2402_v62 = vld [vmem:[#allocation3 + $0x368] sm:$0xff]  ;;  %v2460_v5 = vld [vmem:[#allocation3 + $0x538] sm:$0xff] }
 0x7e8   :  { %3121 = vmatpush1.bf16.msra.mxu0 %v2318_v38  ;;  %3587 = vmatpush3.bf16.msra.mxu1 %v2320_v47  ;;  %v2410_v38 = vld [vmem:[#allocation3 + $0x3a8] sm:$0xff]  ;;  %v2579_v47 = vld [vmem:[#allocation3 + $0x8f0] sm:$0xff] }
 0x7e9   :  { %3122 = vmatprep.subr.bf16.mxu0 %v2326_v7  ;;  %3588 = vmatprep.subr.bf16.mxu1 %v2383_v63  ;;  %v2409_v7 = vld [vmem:[#allocation3 + $0x3a0] sm:$0xff]  ;;  %v2523_v63 = vld [vmem:[#allocation3 + $0x730] sm:$0xff] }
 0x7ec   :  { %3123 = vmatpush1.bf16.msra.mxu0 %v2325_v44  ;;  %3589 = vmatpush3.bf16.msra.mxu1 %v2327_v6  ;;  %v2417_v44 = vld [vmem:[#allocation3 + $0x3e0] sm:$0xff]  ;;  %v2586_v6 = vld [vmem:[#allocation3 + $0x928] sm:$0xff] }
 0x7ed   :  { %3124 = vmatprep.subr.bf16.mxu0 %v2333_v8  ;;  %3590 = vmatprep.subr.bf16.mxu1 %v2390_v10  ;;  %v2416_v8 = vld [vmem:[#allocation3 + $0x3d8] sm:$0xff]  ;;  %v2530_v10 = vld [vmem:[#allocation3 + $0x768] sm:$0xff] }
 0x7f0   :  { %3125 = vmatpush1.bf16.msra.mxu0 %v2332_v59  ;;  %3591 = vmatpush3.bf16.msra.mxu1 %v2334_v41  ;;  %v2424_v59 = vld [vmem:[#allocation3 + $0x418] sm:$0xff]  ;;  %v2593_v41 = vld [vmem:[#allocation3 + $0x960] sm:$0xff] }
 0x7f1   :  { %3126 = vmatprep.subr.bf16.mxu0 %v2340_v12  ;;  %3592 = vmatprep.subr.bf16.mxu1 %v2397_v13  ;;  %v2423_v12 = vld [vmem:[#allocation3 + $0x410] sm:$0xff] }
 0x7f2   :  { %v2431_v13 = vld [vmem:[#allocation3 + $0x450] sm:$0xff] }
 0x7f4   :  { %3127 = vmatpush1.bf16.msra.mxu0 %v2339_v57  ;;  %3593 = vmatpush3.bf16.msra.mxu1 %v2341_v17  ;;  %v2600_v57 = vld [vmem:[#allocation3 + $0x998] sm:$0xff]  ;;  %v2430_v17 = vld [vmem:[#allocation3 + $0x448] sm:$0xff] }
 0x7f5   :  { %3128 = vmatprep.subr.bf16.mxu0 %v2347_v25  ;;  %3594 = vmatprep.subr.bf16.mxu1 %v2404_v27  ;;  %v2544_v25 = vld [vmem:[#allocation3 + $0x7d8] sm:$0xff]  ;;  %v2438_v27 = vld [vmem:[#allocation3 + $0x488] sm:$0xff] }
 0x7f8   :  { %3129 = vmatpush1.bf16.msra.mxu0 %v2346_v49  ;;  %3595 = vmatpush3.bf16.msra.mxu1 %v2348_v56  ;;  %v2607_v49 = vld [vmem:[#allocation3 + $0x9d0] sm:$0xff] }
 0x7f9   :  { %3130 = vmatprep.subr.bf16.mxu0 %v2354_v60  ;;  %3602 = vmatprep.subr.bf16.mxu1 %v2467_v20  ;;  %v2551_v56 = vld [vmem:[#allocation3 + $0x810] sm:$0xff]  ;;  %v2445_v60 = vld [vmem:[#allocation3 + $0x4c0] sm:$0xff]  ;;  %v2614_v20 = vld [vmem:[#allocation3 + $0xa08] sm:$0xff] }
 0x7fb   :  { %3311 = vmatmul.mubr.bf16.vlgmr.msra.gmra.mrb[24].mxu1 %v4751_v14 }
 0x7fc   :  { %3131 = vmatpush1.bf16.msra.mxu0 %v2353_v28  ;;  %3603 = vmatpush3.bf16.msra.mxu1 %v2411_v29  ;;  %v2444_v28 = vld [vmem:[#allocation3 + $0x4b8] sm:$0xff]  ;;  %v2558_v29 = vld [vmem:[#allocation3 + $0x848] sm:$0xff] }
 0x7fd   :  { %3132 = vmatprep.subr.bf16.mxu0 %v2361_v30  ;;  %3604 = vmatprep.subr.bf16.mxu1 %v2474_v24  ;;  %v2452_v30 = vld [vmem:[#allocation3 + $0x4f8] sm:$0xff]  ;;  %v2621_v24 = vld [vmem:[#allocation3 + $0xa40] sm:$0xff] }
 0x7fe   :  { %3350 = vmatprep.mubr.bf16.mxu1 %v4755_v58 }
 0x800   :  { %3133 = vmatpush1.bf16.msra.mxu0 %v2360_v52  ;;  %3605 = vmatpush3.bf16.msra.mxu1 %v2418_v53  ;;  %v2451_v52 = vld [vmem:[#allocation3 + $0x4f0] sm:$0xff]  ;;  %v2565_v53 = vld [vmem:[#allocation3 + $0x880] sm:$0xff] }
 0x801   :  { %3134 = vmatprep.subr.bf16.mxu0 %v2368_v54  ;;  %3606 = vmatprep.subr.bf16.mxu1 %v2481_v48  ;;  %v2459_v54 = vld [vmem:[#allocation3 + $0x530] sm:$0xff]  ;;  %v2628_v48 = vld [vmem:[#allocation3 + $0xa78] sm:$0xff] }
 0x804   :  { %3135 = vmatpush1.bf16.msra.mxu0 %v2367_v55  ;;  %3607 = vmatpush3.bf16.msra.mxu1 %v2425_v18  ;;  %v2458_v55 = vld [vmem:[#allocation3 + $0x528] sm:$0xff]  ;;  %v2572_v18 = vld [vmem:[#allocation3 + $0x8b8] sm:$0xff] }
 0x805   :  { %3136 = vmatprep.subr.bf16.mxu0 %v2375_v22  ;;  %3608 = vmatprep.subr.bf16.mxu1 %v2488_v50  ;;  %v2466_v22 = vld [vmem:[#allocation3 + $0x568] sm:$0xff]  ;;  %v2691_v50 = vld [vmem:[#allocation3 + $0xc70] sm:$0xff] }
 0x808   :  { %3137 = vmatpush1.bf16.msra.mxu0 %v2374_v40  ;;  %3609 = vmatpush3.bf16.msra.mxu1 %v2432_v46  ;;  %v2465_v40 = vld [vmem:[#allocation3 + $0x560] sm:$0xff]  ;;  %v2635_v46 = vld [vmem:[#allocation3 + $0xab0] sm:$0xff] }
 0x809   :  { %3138 = vmatprep.subr.bf16.mxu0 %v2382_v33  ;;  %3610 = vmatprep.subr.bf16.mxu1 %v2495_v35  ;;  %v2473_v33 = vld [vmem:[#allocation3 + $0x5a0] sm:$0xff]  ;;  %v2698_v35 = vld [vmem:[#allocation3 + $0xca8] sm:$0xff] }
 0x80c   :  { %3139 = vmatpush1.bf16.msra.mxu0 %v2381_v34  ;;  %3611 = vmatpush3.bf16.msra.mxu1 %v2439_v37  ;;  %v2472_v34 = vld [vmem:[#allocation3 + $0x598] sm:$0xff]  ;;  %v2642_v37 = vld [vmem:[#allocation3 + $0xae8] sm:$0xff] }
 0x80d   :  { %3140 = vmatprep.subr.bf16.mxu0 %v2389_v11  ;;  %3612 = vmatprep.subr.bf16.mxu1 %v2502_v45  ;;  %v2480_v11 = vld [vmem:[#allocation3 + $0x5d8] sm:$0xff]  ;;  %v2705_v45 = vld [vmem:[#allocation3 + $0xce0] sm:$0xff] }
 0x810   :  { %3141 = vmatpush1.bf16.msra.mxu0 %v2388_v4  ;;  %3613 = vmatpush3.bf16.msra.mxu1 %v2446_v26  ;;  %v2479_v4 = vld [vmem:[#allocation3 + $0x5d0] sm:$0xff]  ;;  %v2649_v26 = vld [vmem:[#allocation3 + $0xb20] sm:$0xff] }
 0x811   :  { %3142 = vmatprep.subr.bf16.mxu0 %v2396_v36  ;;  %3614 = vmatprep.subr.bf16.mxu1 %v2509_v15  ;;  %v2487_v36 = vld [vmem:[#allocation3 + $0x610] sm:$0xff]  ;;  %v2712_v15 = vld [vmem:[#allocation3 + $0xd18] sm:$0xff] }
 0x814   :  { %3143 = vmatpush1.bf16.msra.mxu0 %v2395_v21  ;;  %3615 = vmatpush3.bf16.msra.mxu1 %v2453_v3  ;;  %v2486_v21 = vld [vmem:[#allocation3 + $0x608] sm:$0xff]  ;;  %v2656_v3 = vld [vmem:[#allocation3 + $0xb58] sm:$0xff] }
 0x815   :  { %3144 = vmatprep.subr.bf16.mxu0 %v2403_v32  ;;  %3616 = vmatprep.subr.bf16.mxu1 %v2516_v61  ;;  %v2494_v32 = vld [vmem:[#allocation3 + $0x648] sm:$0xff]  ;;  %v2719_v61 = vld [vmem:[#allocation3 + $0xd50] sm:$0xff] }
 0x818   :  { %3145 = vmatpush1.bf16.msra.mxu0 %v2402_v62  ;;  %3617 = vmatpush3.bf16.msra.mxu1 %v2460_v5  ;;  %v2493_v62 = vld [vmem:[#allocation3 + $0x640] sm:$0xff]  ;;  %v2663_v5 = vld [vmem:[#allocation3 + $0xb90] sm:$0xff] }
 0x819   :  { %3155 = vmatprep.subr.bf16.mxu0 %v2410_v38  ;;  %3624 = vmatprep.subr.bf16.mxu1 %v2579_v47  ;;  %v2501_v38 = vld [vmem:[#allocation3 + $0x680] sm:$0xff]  ;;  %v2726_v47 = vld [vmem:[#allocation3 + $0xd88] sm:$0xff] }
 0x81b   :  { %3147 = vmatmul.mubr.bf16.vlgmr.msra.gmra.mrb[16].mxu0 %v4751_v14  ;;  %3351 = vmatmul.mubr.bf16.vlgmr.msra.gmra.mrb[28].mxu1 %v4763_v51  ;;  %v2537_v14 = vld [vmem:[#allocation3 + $0x7a0] sm:$0xff] }
 0x81c   :  { %3156 = vmatpush1.bf16.msra.mxu0 %v2409_v7  ;;  %3625 = vmatpush3.bf16.msra.mxu1 %v2523_v63  ;;  %v2500_v7 = vld [vmem:[#allocation3 + $0x678] sm:$0xff]  ;;  %v2670_v63 = vld [vmem:[#allocation3 + $0xbc8] sm:$0xff] }
 0x81d   :  { %3157 = vmatprep.subr.bf16.mxu0 %v2417_v44  ;;  %3626 = vmatprep.subr.bf16.mxu1 %v2586_v6  ;;  %v2508_v44 = vld [vmem:[#allocation3 + $0x6b8] sm:$0xff]  ;;  %v2733_v6 = vld [vmem:[#allocation3 + $0xdc0] sm:$0xff] }
 0x81e   :  { %3187 = vmatprep.mubr.bf16.mxu0 %v4755_v58  ;;  %3390 = vmatprep.mubr.bf16.mxu1 %v4767_v16  ;;  %v2437_v58 = vld [vmem:[#allocation3 + $0x480] sm:$0xff] }
 0x820   :  { %3158 = vmatpush1.bf16.msra.mxu0 %v2416_v8  ;;  %3627 = vmatpush3.bf16.msra.mxu1 %v2530_v10  ;;  %v2507_v8 = vld [vmem:[#allocation3 + $0x6b0] sm:$0xff]  ;;  %v2677_v10 = vld [vmem:[#allocation3 + $0xc00] sm:$0xff] }
 0x821   :  { %3159 = vmatprep.subr.bf16.mxu0 %v2424_v59  ;;  %3628 = vmatprep.subr.bf16.mxu1 %v2593_v41  ;;  %v2515_v59 = vld [vmem:[#allocation3 + $0x6f0] sm:$0xff]  ;;  %v2740_v41 = vld [vmem:[#allocation3 + $0xdf8] sm:$0xff] }
 0x824   :  { %3160 = vmatpush1.bf16.msra.mxu0 %v2423_v12  ;;  %3629 = vmatpush3.bf16.msra.mxu1 %v2537_v14  ;;  %v2514_v12 = vld [vmem:[#allocation3 + $0x6e8] sm:$0xff]  ;;  %v2684_v14 = vld [vmem:[#allocation3 + $0xc38] sm:$0xff] }
 0x825   :  { %3161 = vmatprep.subr.bf16.mxu0 %v2431_v13  ;;  %3630 = vmatprep.subr.bf16.mxu1 %v2600_v57  ;;  %v2522_v13 = vld [vmem:[#allocation3 + $0x728] sm:$0xff]  ;;  %v2521_v57 = vld [vmem:[#allocation3 + $0x720] sm:$0xff] }
 0x828   :  { %3162 = vmatpush1.bf16.msra.mxu0 %v2430_v17  ;;  %3631 = vmatpush3.bf16.msra.mxu1 %v2544_v25  ;;  %v2529_v17 = vld [vmem:[#allocation3 + $0x760] sm:$0xff]  ;;  %v2528_v25 = vld [vmem:[#allocation3 + $0x758] sm:$0xff] }
 0x829   :  { %3163 = vmatprep.subr.bf16.mxu0 %v2438_v27  ;;  %3632 = vmatprep.subr.bf16.mxu1 %v2607_v49  ;;  %v2536_v27 = vld [vmem:[#allocation3 + $0x798] sm:$0xff]  ;;  %v2535_v49 = vld [vmem:[#allocation3 + $0x790] sm:$0xff] }
 0x82c   :  { %3164 = vmatpush1.bf16.msra.mxu0 %v2437_v58  ;;  %3633 = vmatpush3.bf16.msra.mxu1 %v2551_v56  ;;  %v2543_v58 = vld [vmem:[#allocation3 + $0x7d0] sm:$0xff]  ;;  %v2542_v56 = vld [vmem:[#allocation3 + $0x7c8] sm:$0xff] }
 0x82d   :  { %3165 = vmatprep.subr.bf16.mxu0 %v2445_v60  ;;  %3634 = vmatprep.subr.bf16.mxu1 %v2614_v20  ;;  %v2550_v60 = vld [vmem:[#allocation3 + $0x808] sm:$0xff]  ;;  %v2549_v20 = vld [vmem:[#allocation3 + $0x800] sm:$0xff] }
 0x830   :  { %3166 = vmatpush1.bf16.msra.mxu0 %v2444_v28  ;;  %3635 = vmatpush3.bf16.msra.mxu1 %v2558_v29  ;;  %v2556_v28 = vld [vmem:[#allocation3 + $0x838] sm:$0xff] }
 0x831   :  { %3167 = vmatprep.subr.bf16.mxu0 %v2452_v30  ;;  %3636 = vmatprep.subr.bf16.mxu1 %v2621_v24  ;;  %v2564_v29 = vld [vmem:[#allocation3 + $0x878] sm:$0xff]  ;;  %v2571_v30 = vld [vmem:[#allocation3 + $0x8b0] sm:$0xff]  ;;  %v2570_v24 = vld [vmem:[#allocation3 + $0x8a8] sm:$0xff] }
 0x834   :  { %3168 = vmatpush1.bf16.msra.mxu0 %v2451_v52  ;;  %3637 = vmatpush3.bf16.msra.mxu1 %v2565_v53  ;;  %v2578_v52 = vld [vmem:[#allocation3 + $0x8e8] sm:$0xff]  ;;  %v2577_v53 = vld [vmem:[#allocation3 + $0x8e0] sm:$0xff] }
 0x835   :  { %3169 = vmatprep.subr.bf16.mxu0 %v2459_v54  ;;  %3638 = vmatprep.subr.bf16.mxu1 %v2628_v48  ;;  %v2585_v54 = vld [vmem:[#allocation3 + $0x920] sm:$0xff]  ;;  %v2584_v48 = vld [vmem:[#allocation3 + $0x918] sm:$0xff] }
 0x838   :  { %3170 = vmatpush1.bf16.msra.mxu0 %v2458_v55  ;;  %3639 = vmatpush3.bf16.msra.mxu1 %v2572_v18  ;;  %v2592_v55 = vld [vmem:[#allocation3 + $0x958] sm:$0xff]  ;;  %v2591_v18 = vld [vmem:[#allocation3 + $0x950] sm:$0xff] }
 0x839   :  { %3171 = vmatprep.subr.bf16.mxu0 %v2466_v22  ;;  %3646 = vmatprep.subr.bf16.mxu1 %v2691_v50  ;;  %v2599_v22 = vld [vmem:[#allocation3 + $0x990] sm:$0xff]  ;;  %v2598_v50 = vld [vmem:[#allocation3 + $0x988] sm:$0xff] }
 0x83b   :  { %3391 = vmatmul.mubr.bf16.vlgmr.msra.gmra.mrb[32].mxu1 %v4775_v31 }
 0x83c   :  { %3172 = vmatpush1.bf16.msra.mxu0 %v2465_v40  ;;  %3647 = vmatpush3.bf16.msra.mxu1 %v2635_v46  ;;  %v2606_v40 = vld [vmem:[#allocation3 + $0x9c8] sm:$0xff]  ;;  %v2605_v46 = vld [vmem:[#allocation3 + $0x9c0] sm:$0xff] }
 0x83d   :  { %3173 = vmatprep.subr.bf16.mxu0 %v2473_v33  ;;  %3648 = vmatprep.subr.bf16.mxu1 %v2698_v35  ;;  %v2613_v33 = vld [vmem:[#allocation3 + $0xa00] sm:$0xff]  ;;  %v2612_v35 = vld [vmem:[#allocation3 + $0x9f8] sm:$0xff] }
 0x83e   :  { %3430 = vmatprep.mubr.bf16.mxu1 %v4779_v39 }
 0x840   :  { %3174 = vmatpush1.bf16.msra.mxu0 %v2472_v34  ;;  %3649 = vmatpush3.bf16.msra.mxu1 %v2642_v37  ;;  %v2620_v34 = vld [vmem:[#allocation3 + $0xa38] sm:$0xff]  ;;  %v2619_v37 = vld [vmem:[#allocation3 + $0xa30] sm:$0xff] }
 0x841   :  { %3175 = vmatprep.subr.bf16.mxu0 %v2480_v11  ;;  %3650 = vmatprep.subr.bf16.mxu1 %v2705_v45  ;;  %v2627_v11 = vld [vmem:[#allocation3 + $0xa70] sm:$0xff]  ;;  %v2626_v45 = vld [vmem:[#allocation3 + $0xa68] sm:$0xff] }
 0x844   :  { %3176 = vmatpush1.bf16.msra.mxu0 %v2479_v4  ;;  %3651 = vmatpush3.bf16.msra.mxu1 %v2649_v26  ;;  %v2634_v4 = vld [vmem:[#allocation3 + $0xaa8] sm:$0xff]  ;;  %v2633_v26 = vld [vmem:[#allocation3 + $0xaa0] sm:$0xff] }
 0x845   :  { %3177 = vmatprep.subr.bf16.mxu0 %v2487_v36  ;;  %3652 = vmatprep.subr.bf16.mxu1 %v2712_v15  ;;  %v2641_v36 = vld [vmem:[#allocation3 + $0xae0] sm:$0xff]  ;;  %v2640_v15 = vld [vmem:[#allocation3 + $0xad8] sm:$0xff] }
 0x848   :  { %3178 = vmatpush1.bf16.msra.mxu0 %v2486_v21  ;;  %3653 = vmatpush3.bf16.msra.mxu1 %v2656_v3  ;;  %v2648_v21 = vld [vmem:[#allocation3 + $0xb18] sm:$0xff]  ;;  %v2647_v3 = vld [vmem:[#allocation3 + $0xb10] sm:$0xff] }
 0x849   :  { %3179 = vmatprep.subr.bf16.mxu0 %v2494_v32  ;;  %3654 = vmatprep.subr.bf16.mxu1 %v2719_v61  ;;  %v2655_v32 = vld [vmem:[#allocation3 + $0xb50] sm:$0xff]  ;;  %v2654_v61 = vld [vmem:[#allocation3 + $0xb48] sm:$0xff] }
 0x84c   :  { %3180 = vmatpush1.bf16.msra.mxu0 %v2493_v62  ;;  %3655 = vmatpush3.bf16.msra.mxu1 %v2663_v5  ;;  %v2662_v62 = vld [vmem:[#allocation3 + $0xb88] sm:$0xff]  ;;  %v4806_v5 = vld [vmem:[#allocation19] sm:$0xff] }
 0x84d   :  { %3181 = vmatprep.subr.bf16.mxu0 %v2501_v38  ;;  %3656 = vmatprep.subr.bf16.mxu1 %v2726_v47  ;;  %v2661_v38 = vld [vmem:[#allocation3 + $0xb80] sm:$0xff]  ;;  %v2762_v47 = vrot.slane %v4806_v5, %v4520_v42 }
 0x850   :  { %3182 = vmatpush1.bf16.msra.mxu0 %v2500_v7  ;;  %3657 = vmatpush3.bf16.msra.mxu1 %v2670_v63  ;;  %v2758_v7 = vrot.slane %v4806_v5, %v4469_v2  ;;  %v2766_v63 = vrot.slane %v4806_v5, %v4523_v43  ;;  %v2683_v43 = vld [vmem:[#allocation3 + $0xc30] sm:$0xff] }
 0x851   :  { %3183 = vmatprep.subr.bf16.mxu0 %v2508_v44  ;;  %3658 = vmatprep.subr.bf16.mxu1 %v2733_v6  ;;  %v2668_v44 = vld [vmem:[#allocation3 + $0xbb8] sm:$0xff] }
 0x854   :  { %3184 = vmatpush1.bf16.msra.mxu0 %v2507_v8  ;;  %3659 = vmatpush3.bf16.msra.mxu1 %v2677_v10  ;;  %v2676_v10 = vld [vmem:[#allocation3 + $0xbf8] sm:$0xff] }
 0x855   :  { %3185 = vmatprep.subr.bf16.mxu0 %v2515_v59  ;;  %3660 = vmatprep.subr.bf16.mxu1 %v2740_v41 }
 0x858   :  { %3186 = vmatpush1.bf16.msra.mxu0 %v2514_v12  ;;  %3661 = vmatpush3.bf16.msra.mxu1 %v2684_v14 }
 0x859   :  { %3196 = vmatprep.subr.bf16.mxu0 %v2522_v13 }
 0x85b   :  { %3188 = vmatmul.mubr.bf16.vlgmr.msra.gmra.mrb[16].mxu0 %v4763_v51  ;;  %3431 = vmatmul.mubr.bf16.vlgmr.msra.gmra.mrb[36].mxu1 %v4787_v1  ;;  %v2557_v51 = vld [vmem:[#allocation3 + $0x840] sm:$0xff] }
 0x85c   :  { %3197 = vmatpush1.bf16.msra.mxu0 %v2521_v57  ;;  %3228 = vmatprep.mubr.bf16.mxu0 %v4767_v16  ;;  %v2563_v16 = vld [vmem:[#allocation3 + $0x870] sm:$0xff] }
 0x85d   :  { %3198 = vmatprep.subr.bf16.mxu0 %v2529_v17 }
 0x860   :  { %3199 = vmatpush1.bf16.msra.mxu0 %v2528_v25  ;;  %v2675_v25 = vld [vmem:[#allocation3 + $0xbf0] sm:$0xff] }
 0x861   :  { %3200 = vmatprep.subr.bf16.mxu0 %v2536_v27  ;;  %v2682_v27 = vld [vmem:[#allocation3 + $0xc28] sm:$0xff] }
 0x864   :  { %3201 = vmatpush1.bf16.msra.mxu0 %v2535_v49  ;;  %v2690_v49 = vld [vmem:[#allocation3 + $0xc68] sm:$0xff] }
 0x865   :  { %3202 = vmatprep.subr.bf16.mxu0 %v2543_v58  ;;  %v2689_v58 = vld [vmem:[#allocation3 + $0xc60] sm:$0xff] }
 0x868   :  { %3203 = vmatpush1.bf16.msra.mxu0 %v2542_v56  ;;  %v2697_v56 = vld [vmem:[#allocation3 + $0xca0] sm:$0xff] }
 0x869   :  { %3204 = vmatprep.subr.bf16.mxu0 %v2550_v60 }
 0x86c   :  { %3205 = vmatpush1.bf16.msra.mxu0 %v2549_v20 }
 0x86d   :  { %3206 = vmatprep.subr.bf16.mxu0 %v2557_v51 }
 0x870   :  { %3207 = vmatpush1.bf16.msra.mxu0 %v2556_v28  ;;  %v2696_v28 = vld [vmem:[#allocation3 + $0xc98] sm:$0xff] }
 0x871   :  { %3208 = vmatprep.subr.bf16.mxu0 %v2564_v29 }
 0x874   :  { %3209 = vmatpush1.bf16.msra.mxu0 %v2563_v16  ;;  %v2704_v16 = vld [vmem:[#allocation3 + $0xcd8] sm:$0xff] }
 0x875   :  { %3210 = vmatprep.subr.bf16.mxu0 %v2571_v30  ;;  %v2703_v30 = vld [vmem:[#allocation3 + $0xcd0] sm:$0xff] }
 0x878   :  { %3211 = vmatpush1.bf16.msra.mxu0 %v2570_v24  ;;  %v2711_v24 = vld [vmem:[#allocation3 + $0xd10] sm:$0xff] }
 0x879   :  { %3212 = vmatprep.subr.bf16.mxu0 %v2578_v52  ;;  %v2710_v52 = vld [vmem:[#allocation3 + $0xd08] sm:$0xff] }
 0x87c   :  { %3213 = vmatpush1.bf16.msra.mxu0 %v2577_v53  ;;  %v2718_v53 = vld [vmem:[#allocation3 + $0xd48] sm:$0xff] }
 0x87d   :  { %3214 = vmatprep.subr.bf16.mxu0 %v2585_v54  ;;  %v2717_v54 = vld [vmem:[#allocation3 + $0xd40] sm:$0xff] }
 0x880   :  { %3215 = vmatpush1.bf16.msra.mxu0 %v2584_v48  ;;  %v2725_v48 = vld [vmem:[#allocation3 + $0xd80] sm:$0xff] }
 0x881   :  { %3216 = vmatprep.subr.bf16.mxu0 %v2592_v55  ;;  %v2724_v55 = vld [vmem:[#allocation3 + $0xd78] sm:$0xff] }
 0x884   :  { %3217 = vmatpush1.bf16.msra.mxu0 %v2591_v18  ;;  %v2732_v18 = vld [vmem:[#allocation3 + $0xdb8] sm:$0xff] }
 0x885   :  { %3218 = vmatprep.subr.bf16.mxu0 %v2599_v22 }
 0x888   :  { %3219 = vmatpush1.bf16.msra.mxu0 %v2598_v50 }
 0x889   :  { %3220 = vmatprep.subr.bf16.mxu0 %v2606_v40 }
 0x88c   :  { %3221 = vmatpush1.bf16.msra.mxu0 %v2605_v46 }
 0x88d   :  { %3222 = vmatprep.subr.bf16.mxu0 %v2613_v33  ;;  %v2731_v33 = vld [vmem:[#allocation3 + $0xdb0] sm:$0xff] }
 0x890   :  { %3223 = vmatpush1.bf16.msra.mxu0 %v2612_v35 }
 0x891   :  { %3224 = vmatprep.subr.bf16.mxu0 %v2620_v34  ;;  %v2739_v34 = vld [vmem:[#allocation3 + $0xdf0] sm:$0xff] }
 0x894   :  { %3225 = vmatpush1.bf16.msra.mxu0 %v2619_v37  ;;  %v2738_v37 = vld [vmem:[#allocation3 + $0xde8] sm:$0xff] }
 0x895   :  { %3226 = vmatprep.subr.bf16.mxu0 %v2627_v11  ;;  %v2778_v11 = vrot.slane %v4806_v5, %v4684_v23 }
 0x898   :  { %3227 = vmatpush1.bf16.msra.mxu0 %v2626_v45 }
 0x899   :  { %3237 = vmatprep.subr.bf16.mxu0 %v2634_v4 }
 0x89b   :  { %3229 = vmatmul.mubr.bf16.vlgmr.msra.gmra.mrb[16].mxu0 %v4775_v31  ;;  %v2669_v31 = vld [vmem:[#allocation3 + $0xbc0] sm:$0xff] }
 0x89c   :  { %3238 = vmatpush1.bf16.msra.mxu0 %v2633_v26  ;;  %3269 = vmatprep.mubr.bf16.mxu0 %v4779_v39  ;;  %v2754_v39 = vrot.slane %v4806_v5, %v4465_v0 }
 0x89d   :  { %3239 = vmatprep.subr.bf16.mxu0 %v2641_v36 }
 0x8a0   :  { %3240 = vmatpush1.bf16.msra.mxu0 %v2640_v15 }
 0x8a1   :  { %3241 = vmatprep.subr.bf16.mxu0 %v2648_v21 }
 0x8a4   :  { %3242 = vmatpush1.bf16.msra.mxu0 %v2647_v3 }
 0x8a5   :  { %3243 = vmatprep.subr.bf16.mxu0 %v2655_v32 }
 0x8a8   :  { %3244 = vmatpush1.bf16.msra.mxu0 %v2654_v61 }
 0x8a9   :  { %3245 = vmatprep.subr.bf16.mxu0 %v2662_v62 }
 0x8ac   :  { %3246 = vmatpush1.bf16.msra.mxu0 %v2661_v38 }
 0x8ad   :  { %3247 = vmatprep.subr.bf16.mxu0 %v2669_v31 }
 0x8ae   :  { %v2943_v6 = vpop.f32.mrb[12].mxu0  ;;  %v3107_v8 = vpop.f32.mrb[20].mxu1 }
 0x8af   :  { %v3688_v59 = vadd.f32 %v2943_v6, %v2754_v39  ;;  %v3690_v41 = vadd.f32 %v3107_v8, %v2762_v47  ;;  %v2945_v12 = vpop.f32.mrb[13].mxu0  ;;  %v3109_v14 = vpop.f32.mrb[21].mxu1  ;;  %v2770_v8 = vrot.slane %v4806_v5, %v4678_v19 }
 0x8b0   :  { %v3689_v0 = vadd.f32 %v2945_v12, %v2758_v7  ;;  %v3691_v13 = vadd.f32 %v3109_v14, %v2766_v63  ;;  %v2947_v57 = vpop.f32.mrb[14].mxu0  ;;  %v3111_v42 = vpop.f32.mrb[22].mxu1  ;;  %3248 = vmatpush1.bf16.msra.mxu0 %v2668_v44 }
 0x8b1   :  { %3936 = vtanh.f32 %v3688_v59  ;;  %v2948_v17 = vpop.f32.mrb[15].mxu0  ;;  %v3112_v2 = vpop.f32.mrb[23].mxu1  ;;  %3249 = vmatprep.subr.bf16.mxu0 %v2676_v10  ;;  %v2774_v10 = vrot.slane %v4806_v5, %v4681_v9 }
 0x8b2   :  { %3938 = vtanh.f32 %v3690_v41 }
 0x8b3   :  { %3940 = vtanh.f32 %v3689_v0 }
 0x8b4   :  { %3942 = vtanh.f32 %v3691_v13  ;;  %3250 = vmatpush1.bf16.msra.mxu0 %v2675_v25 }
 0x8b5   :  { %3251 = vmatprep.subr.bf16.mxu0 %v2683_v43 }
 0x8b8   :  { %3252 = vmatpush1.bf16.msra.mxu0 %v2682_v27 }
 0x8b9   :  { %3253 = vmatprep.subr.bf16.mxu0 %v2690_v49 }
 0x8bb   :  { %v3937_v60 = vpop.eup %3936 }
 0x8bc   :  { %v3939_v20 = vpop.eup %3938  ;;  %3445 = vst [vmem:[%s4858_s14] sm:$0xff] %v3937_v60  ;;  %3254 = vmatpush1.bf16.msra.mxu0 %v2689_v58 }
 0x8bd   :  { %v3941_v51 = vpop.eup %3940  ;;  %3447 = vst [vmem:[%s4858_s14 + $0x10] sm:$0xff] %v3939_v20  ;;  %3255 = vmatprep.subr.bf16.mxu0 %v2697_v56 }
 0x8be   :  { %v3943_v29 = vpop.eup %3942  ;;  %3446 = vst [vmem:[%s4858_s14 + $0x8] sm:$0xff] %v3941_v51 }
 0x8bf   :  { %3448 = vst [vmem:[%s4858_s14 + $0x18] sm:$0xff] %v3943_v29 }
 0x8c0   :  { %3256 = vmatpush1.bf16.msra.mxu0 %v2696_v28 }
 0x8c1   :  { %3257 = vmatprep.subr.bf16.mxu0 %v2704_v16 }
 0x8c4   :  { %3258 = vmatpush1.bf16.msra.mxu0 %v2703_v30 }
 0x8c5   :  { %3259 = vmatprep.subr.bf16.mxu0 %v2711_v24 }
 0x8c8   :  { %3260 = vmatpush1.bf16.msra.mxu0 %v2710_v52 }
 0x8c9   :  { %3261 = vmatprep.subr.bf16.mxu0 %v2718_v53 }
 0x8cc   :  { %3262 = vmatpush1.bf16.msra.mxu0 %v2717_v54 }
 0x8cd   :  { %3263 = vmatprep.subr.bf16.mxu0 %v2725_v48 }
 0x8ce   :  { %v3596_v22 = vpop.f32.mrb[24].mxu1 }
 0x8cf   :  { %v3597_v50 = vpop.f32.mrb[25].mxu1 }
 0x8d0   :  { %3264 = vmatpush1.bf16.msra.mxu0 %v2724_v55  ;;  %v3598_v40 = vadd.f32 %v3597_v50, %v3596_v22  ;;  %v3599_v46 = vpop.f32.mrb[26].mxu1 }
 0x8d1   :  { %3265 = vmatprep.subr.bf16.mxu0 %v2732_v18  ;;  %v3600_v35 = vpop.f32.mrb[27].mxu1 }
 0x8d2   :  { %v3313_v45 = vadd.f32 %v3598_v40, %v2778_v11 }
 0x8d4   :  { %3266 = vmatpush1.bf16.msra.mxu0 %v2731_v33 }
 0x8d5   :  { %3267 = vmatprep.subr.bf16.mxu0 %v2739_v34 }
 0x8d8   :  { %3268 = vmatpush1.bf16.msra.mxu0 %v2738_v37 }
 0x8db   :  { %3270 = vmatmul.mubr.bf16.vlgmr.msra.gmra.mrb[16].mxu0 %v4787_v1 }
 0x8ee   :  { %v3618_v4 = vpop.f32.mrb[28].mxu1 }
 0x8ef   :  { %v3619_v26 = vpop.f32.mrb[29].mxu1 }
 0x8f0   :  { %v3620_v36 = vadd.f32 %v3619_v26, %v3618_v4  ;;  %v3621_v15 = vpop.f32.mrb[30].mxu1 }
 0x8f1   :  { %v3622_v21 = vpop.f32.mrb[31].mxu1 }
 0x8f2   :  { %v3353_v3 = vadd.f32 %v3620_v36, %v3313_v45 }
 0x90e   :  { %v3640_v32 = vpop.f32.mrb[32].mxu1 }
 0x90f   :  { %v3641_v61 = vpop.f32.mrb[33].mxu1 }
 0x910   :  { %v3642_v62 = vadd.f32 %v3641_v61, %v3640_v32  ;;  %v3643_v38 = vpop.f32.mrb[34].mxu1 }
 0x911   :  { %v3644_v31 = vpop.f32.mrb[35].mxu1 }
 0x912   :  { %v3393_v39 = vadd.f32 %v3642_v62, %v3353_v3 }
 0x92e   :  { %v3662_v47 = vpop.f32.mrb[36].mxu1 }
 0x92f   :  { %v3663_v7 = vpop.f32.mrb[37].mxu1 }
 0x930   :  { %v3664_v63 = vadd.f32 %v3663_v7, %v3662_v47  ;;  %v3665_v1 = vpop.f32.mrb[38].mxu1 }
 0x931   :  { %v3666_v44 = vpop.f32.mrb[39].mxu1 }
 0x932   :  { %v3433_v6 = vadd.f32 %v3664_v63, %v3393_v39 }
 0x934   :  { %3944 = vtanh.f32 %v3433_v6 }
 0x93e   :  { %v3945_v23 = vpop.eup %3944 }
 0x93f   :  { %3451 = vst [vmem:[%s4858_s14 + $0x30] sm:$0xff] %v3945_v23 }
 0x9ae   :  { %v3271_v59 = vpop.f32.mrb[16].mxu0 }
 0x9af   :  { %v3692_v41 = vadd.f32 %v3271_v59, %v2770_v8  ;;  %v3273_v12 = vpop.f32.mrb[17].mxu0 }
 0x9b0   :  { %v3693_v14 = vadd.f32 %v3273_v12, %v2774_v10  ;;  %v3275_v0 = vpop.f32.mrb[18].mxu0 }
 0x9b1   :  { %3946 = vtanh.f32 %v3692_v41  ;;  %v3276_v13 = vpop.f32.mrb[19].mxu0 }
 0x9b2   :  { %3948 = vtanh.f32 %v3693_v14 }
 0x9bb   :  { %v3947_v57 = vpop.eup %3946 }
 0x9bc   :  { %v3949_v42 = vpop.eup %3948  ;;  %3449 = vst [vmem:[%s4858_s14 + $0x20] sm:$0xff] %v3947_v57 }
 0x9bd   :  { %3450 = vst [vmem:[%s4858_s14 + $0x28] sm:$0xff] %v3949_v42 }
 0x9be   :  { %3456 = vsyncpa [#allocation6], 1 }
 0x9bf   :  { %3457 = vsyncpa [#allocation8], 1 }
 0x9c0   :  { %3458 = vsyncpa [#allocation11], 1 }
 0x9c1   :  { %3459 = vsyncpa [#allocation14], 1 }
 0x9c2   :  { %3460 = vsyncpa [#allocation17], 1 }
 0x9c3   :  { %3461 = vsyncpa [#allocation20], 1 }
 0x9c4   :  { %3462 = vsyncmov [#allocation4] }
 0x9c7   :  { %s3463_s27 = vpop.sfrf %3462 }
 0x9c8   :  { %p3569_p10 = scmp.ne.s32.totalorder %s3463_s27, 0 }
 0x9ca   :  { %3467 = shalt.err (%p3569_p10)  }
 0x9cb   :  { %3469 = vsyncmov [#allocation4 + $0x1] }
 0x9ce   :  { %s3470_s24 = vpop.sfrf %3469 }
 0x9cf   :  { %p3570_p11 = scmp.ne.s32.totalorder %s3470_s24, 0 }
 0x9d1   :  { %3474 = shalt.err (%p3570_p11)  }

</bundles_post_ra>
